<compile_context>
chip_gen: v5e
topology: v5e:2x2
jax: 0.10.0
libtpu: 0.0.40
codegen_flags: <defaults>
</compile_context>

<pallas_src>
import functools

import jax
import jax.numpy as jnp
from jax.experimental import pallas as pl
from jax.experimental.pallas import tpu as pltpu


_VMEM_SPEC = pl.BlockSpec(memory_space=pltpu.MemorySpace.VMEM)


# ------------------------------ fused kernel --------------------------------


def _fused_kernel(state_ref, action_ref, h_ref,
                  w1_ref, b1_ref, w2_ref, b2_ref,
                  wgc_ref, wga_ref, whh_ref, bih_ref, bhh_ref,
                  wf1_ref, bf1_ref, wf2_ref, bf2_ref,
                  probs_ref, hnew_ref, *, img_w):
    """Full forward pass on (C, H*W) slabs and (1, feature) row vectors.

    state : (C, H*W)        f32   channel-major slab of the input image
    wgc   : (16, H*W, 192)  bf16  GRU input weight for the conv features,
                                  zero-padded at invalid spatial positions
    wga   : (A, 192)        f32   GRU input weight for the action features
    """
    # ---- conv1 (1x1) + ReLU: dense matmul on the un-im2col'd slab ----------
    y1 = jnp.dot(w1_ref[...], state_ref[...],
                 preferred_element_type=jnp.float32)
    y1 = jnp.maximum(y1 + b1_ref[...], 0.0)                       # (32, H*W)

    # ---- im2col of the 32-channel activation via lane rolls ----------------
    # Spatial shift (di, dj) <=> flat lane shift di*W + dj.  Wrap-around
    # columns produce garbage only at spatial positions that the GRU weight
    # layout zeroes out, so they never leak into the recurrent state.
    cols = []
    for di in range(3):
        for dj in range(3):
            off = di * img_w + dj
            cols.append(y1 if off == 0 else jnp.roll(y1, -off, axis=1))
    slab = jnp.concatenate(cols, axis=0)                          # (288, H*W)

    # ---- conv2 (3x3, valid) + ReLU as a single matmul -----------------------
    y2 = jnp.dot(w2_ref[...], slab, preferred_element_type=jnp.float32)
    y2 = jnp.maximum(y2 + b2_ref[...], 0.0)                       # (16, H*W)

    # ---- GRU input gates ----------------------------------------------------
    # gi = cat(flatten(conv_out_valid), action) @ W_ih^T + b_ih, realized as
    # per-channel row matmuls against the zero-padded weight (no in-kernel
    # flatten needed, padded columns contribute exactly zero).
    gi = jnp.dot(action_ref[...], wga_ref[...],
                 preferred_element_type=jnp.float32) + bih_ref[...]   # (1,192)
    for c in range(y2.shape[0]):
        w_c = wgc_ref[c].astype(jnp.float32)                      # (H*W, 192)
        gi = gi + jnp.dot(y2[c:c + 1, :], w_c,
                          preferred_element_type=jnp.float32)

    gh = jnp.dot(h_ref[...], whh_ref[...],
                 preferred_element_type=jnp.float32) + bhh_ref[...]   # (1,192)

    # ---- GRU cell (PyTorch gate order: r, z, n) -----------------------------
    hd = h_ref.shape[-1]
    r = jax.nn.sigmoid(gi[:, :hd] + gh[:, :hd])
    z = jax.nn.sigmoid(gi[:, hd:2 * hd] + gh[:, hd:2 * hd])
    n = jnp.tanh(gi[:, 2 * hd:] + r * gh[:, 2 * hd:])
    h_new = (1.0 - z) * n + z * h_ref[...]                        # (1, 64)

    # ---- heads: relu -> fc1 -> relu -> fc2 -> softmax -----------------------
    a = jnp.maximum(h_new, 0.0)
    a = jnp.maximum(
        jnp.dot(a, wf1_ref[...], preferred_element_type=jnp.float32)
        + bf1_ref[...], 0.0)                                      # (1, 32)
    logits = jnp.dot(a, wf2_ref[...],
                     preferred_element_type=jnp.float32) + bf2_ref[...]
    m = jnp.max(logits, axis=-1, keepdims=True)
    e = jnp.exp(logits - m)
    inv = pl.reciprocal(jnp.sum(e, axis=-1, keepdims=True), approx=True)
    probs_ref[...] = e * inv
    hnew_ref[...] = h_new


# -------------------------------- forward -----------------------------------


@jax.jit
def intention_forward(kp, state, action, hidden):
    C, H, W = state.shape
    state_slab = state.reshape(C, H * W)          # only per-call XLA glue
    dim_intention = kp["b_fc2"].shape[1]

    probs, h_new = pl.pallas_call(
        functools.partial(_fused_kernel, img_w=W),
        out_shape=(jax.ShapeDtypeStruct((1, dim_intention), jnp.float32),
                   jax.ShapeDtypeStruct((1, 64), jnp.float32)),
        in_specs=[_VMEM_SPEC] * 16,
        out_specs=(_VMEM_SPEC, _VMEM_SPEC),
    )(state_slab, action, hidden,
      kp["w1"], kp["b1"], kp["w2"], kp["b2"],
      kp["w_gru_conv"], kp["w_gru_act"], kp["w_hh"], kp["b_ih"], kp["b_hh"],
      kp["w_fc1"], kp["b_fc1"], kp["w_fc2"], kp["b_fc2"])

    return probs.reshape(-1), h_new               # squeeze, like torch


# --------------------- weight layout prep (done once) -----------------------


def prepare_kernel_params(master, dim_state, dim_action):
    C, H, W = dim_state
    Ho, Wo, HW = H - 2, W - 2, H * W
    n_conv = 16 * Ho * Wo
    f32 = jnp.float32

    # GRU input weight: split conv / action parts; scatter the conv columns
    # into the full H*W grid (zeros at positions outside the valid conv
    # output) and pre-transpose to (channel, position, gate).
    gih = master["gru_wih"]                                       # (192, nF)
    wc = gih[:, :n_conv].reshape(192, 16, Ho, Wo)
    wc_full = jnp.zeros((192, 16, H, W), f32).at[:, :, :Ho, :Wo].set(wc)
    w_gru_conv = (wc_full.reshape(192, 16, HW)
                  .transpose(1, 2, 0)
                  .astype(jnp.bfloat16))                          # (16,HW,192)
    w_gru_act = jnp.asarray(gih[:, n_conv:].T, f32)               # (A, 192)

    return dict(
        w1=master["conv1_w"].reshape(32, C).astype(f32),
        b1=master["conv1_b"].reshape(32, 1).astype(f32),
        w2=master["conv2_w"].transpose(0, 2, 3, 1).reshape(16, 288).astype(f32),
        b2=master["conv2_b"].reshape(16, 1).astype(f32),
        w_gru_conv=w_gru_conv,
        w_gru_act=w_gru_act,
        w_hh=master["gru_whh"].T.astype(f32),                     # (64, 192)
        b_ih=master["gru_bih"].reshape(1, -1).astype(f32),
        b_hh=master["gru_bhh"].reshape(1, -1).astype(f32),
        w_fc1=master["fc1_w"].T.astype(f32),                      # (64, 32)
        b_fc1=master["fc1_b"].reshape(1, -1).astype(f32),
        w_fc2=master["fc2_w"].T.astype(f32),                      # (32, K)
        b_fc2=master["fc2_b"].reshape(1, -1).astype(f32),
    )


def init_params(key, dim_state, dim_action, dim_intention):
    C, H, W = dim_state
    dim_flatten = 16 * (H - 2) * (W - 2) + dim_action
    ks = jax.random.split(key, 12)

    def u(k, shape, fan_in):
        b = 1.0 / jnp.sqrt(jnp.float32(fan_in))
        return jax.random.uniform(k, shape, jnp.float32, -b, b)

    return dict(
        conv1_w=u(ks[0], (32, C, 1, 1), C),
        conv1_b=u(ks[1], (32,), C),
        conv2_w=u(ks[2], (16, 32, 3, 3), 32 * 9),
        conv2_b=u(ks[3], (16,), 32 * 9),
        gru_wih=u(ks[4], (3 * 64, dim_flatten), 64),
        gru_whh=u(ks[5], (3 * 64, 64), 64),
        gru_bih=u(ks[6], (3 * 64,), 64),
        gru_bhh=u(ks[7], (3 * 64,), 64),
        fc1_w=u(ks[8], (32, 64), 64),
        fc1_b=u(ks[9], (32,), 64),
        fc2_w=u(ks[10], (dim_intention, 32), 32),
        fc2_b=u(ks[11], (dim_intention,), 32),
    )


# --------------------------- module-like wrapper -----------------------------


class IntentionNetworkPallas:
    # Note: for multi-step rollouts a grid=(T,) variant with VMEM-resident
    # weights would amortize the GRU-weight DMA; the module API is single-step.
    def __init__(self, dim_state, dim_action, dim_intention, key):
        self.master = init_params(key, dim_state, dim_action, dim_intention)
        self.kparams = prepare_kernel_params(self.master, dim_state, dim_action)
        self.hidden = None

    def reset(self):
        self.hidden = None

    def __call__(self, state, action):
        h = self.hidden if self.hidden is not None else jnp.zeros((1, 64), jnp.float32)
        probs, h_new = intention_forward(self.kparams, state, action, h)
        self.hidden = h_new            # mimics self.hidden = h.detach()
        return probs


# -------------------------------- reference ----------------------------------


def reference_forward(params, state, action):
    x = state[None]
    dn = ("NCHW", "OIHW", "NCHW")
    y = jax.lax.conv_general_dilated(x, params["conv1_w"], (1, 1), "VALID",
                                     dimension_numbers=dn)
    y = jax.nn.relu(y + params["conv1_b"].reshape(1, -1, 1, 1))
    y = jax.lax.conv_general_dilated(y, params["conv2_w"], (1, 1), "VALID",
                                     dimension_numbers=dn)
    y = jax.nn.relu(y + params["conv2_b"].reshape(1, -1, 1, 1))
    y = y.reshape(1, -1)
    xcat = jnp.concatenate([y, action], axis=1)
    h = jnp.zeros((1, 64), jnp.float32)
    gi = xcat @ params["gru_wih"].T + params["gru_bih"]
    gh = h @ params["gru_whh"].T + params["gru_bhh"]
    r = jax.nn.sigmoid(gi[:, :64] + gh[:, :64])
    z = jax.nn.sigmoid(gi[:, 64:128] + gh[:, 64:128])
    n = jnp.tanh(gi[:, 128:] + r * gh[:, 128:])
    hn = (1.0 - z) * n + z * h
    a = jax.nn.relu(hn)
    a = jax.nn.relu(a @ params["fc1_w"].T + params["fc1_b"])
    logits = a @ params["fc2_w"].T + params["fc2_b"]
    return jax.nn.softmax(logits, axis=1).reshape(-1)


# ----------------------------------- main -------------------------------------


if __name__ == "__main__":
    dim_state = (4, 16, 16)     # (C, H, W)
    dim_action = 8
    dim_intention = 6

    key = jax.random.PRNGKey(0)
    pkey, skey, akey = jax.random.split(key, 3)

    net = IntentionNetworkPallas(dim_state, dim_action, dim_intention, pkey)
    state = jax.random.normal(skey, dim_state, jnp.float32)
    action = jax.random.normal(akey, (1, dim_action), jnp.float32)

    probs = net(state, action)
    jax.block_until_ready(probs)

    # Reference uses the same (bf16-stored) conv part of the GRU input weight,
    # so the check isolates kernel math from the deliberate weight quantization.
    Ho, Wo = dim_state[1] - 2, dim_state[2] - 2
    n_conv = 16 * Ho * Wo
    gw = net.master["gru_wih"]
    ref_params = dict(net.master)
    ref_params["gru_wih"] = jnp.concatenate(
        [gw[:, :n_conv].astype(jnp.bfloat16).astype(jnp.float32),
         gw[:, n_conv:]], axis=1)
    ref = reference_forward(ref_params, state, action)

    assert probs.shape == (dim_intention,)
    assert jnp.allclose(jnp.sum(probs), 1.0, atol=5e-3)
    assert jnp.allclose(probs, ref, rtol=2e-2, atol=2e-3), (probs, ref)

    print("KERNEL_OK")
</pallas_src>

<mosaic_0001>
module attributes {stable_mosaic.version = 11 : i64} {
  func.func @_fused_kernel(%arg0: memref<4x256xf32, #tpu.memory_space<vmem>>, %arg1: memref<1x8xf32, #tpu.memory_space<vmem>>, %arg2: memref<1x64xf32, #tpu.memory_space<vmem>>, %arg3: memref<32x4xf32, #tpu.memory_space<vmem>>, %arg4: memref<32x1xf32, #tpu.memory_space<vmem>>, %arg5: memref<16x288xf32, #tpu.memory_space<vmem>>, %arg6: memref<16x1xf32, #tpu.memory_space<vmem>>, %arg7: memref<16x256x192xbf16, #tpu.memory_space<vmem>>, %arg8: memref<8x192xf32, #tpu.memory_space<vmem>>, %arg9: memref<64x192xf32, #tpu.memory_space<vmem>>, %arg10: memref<1x192xf32, #tpu.memory_space<vmem>>, %arg11: memref<1x192xf32, #tpu.memory_space<vmem>>, %arg12: memref<64x32xf32, #tpu.memory_space<vmem>>, %arg13: memref<1x32xf32, #tpu.memory_space<vmem>>, %arg14: memref<32x6xf32, #tpu.memory_space<vmem>>, %arg15: memref<1x6xf32, #tpu.memory_space<vmem>>, %arg16: memref<1x6xf32, #tpu.memory_space<vmem>>, %arg17: memref<1x64xf32, #tpu.memory_space<vmem>>) attributes {dimension_semantics = [], scalar_prefetch = 0 : i64, scratch_operands = 0 : i64, tpu.core_type = #tpu.core_type<tc>} {
    %c0 = arith.constant 0 : index
    %c0_0 = arith.constant 0 : index
    %0 = vector.load %arg3[%c0, %c0_0] : memref<32x4xf32, #tpu.memory_space<vmem>>, vector<32x4xf32>
    %c0_1 = arith.constant 0 : index
    %c0_2 = arith.constant 0 : index
    %1 = vector.load %arg0[%c0_1, %c0_2] : memref<4x256xf32, #tpu.memory_space<vmem>>, vector<4x256xf32>
    %cst = arith.constant dense<0.000000e+00> : vector<32x256xf32>
    %2 = tpu.matmul %0, %1, %cst {dimension_numbers = #tpu.dot_dimension_numbers<[1], [0], [0], [1], [0, 0, 1, 1], [], []>} : vector<32x4xf32>, vector<4x256xf32>, vector<32x256xf32> -> vector<32x256xf32>
    %c0_3 = arith.constant 0 : index
    %c0_4 = arith.constant 0 : index
    %3 = vector.load %arg4[%c0_3, %c0_4] : memref<32x1xf32, #tpu.memory_space<vmem>>, vector<32x1xf32>
    %4 = vector.broadcast %3 : vector<32x1xf32> to vector<32x256xf32>
    %5 = arith.addf %2, %4 : vector<32x256xf32>
    %cst_5 = arith.constant 0.000000e+00 : f32
    %6 = vector.broadcast %cst_5 : f32 to vector<32x256xf32>
    %7 = arith.maximumf %5, %6 : vector<32x256xf32>
    %8 = vector.extract_strided_slice %7 {offsets = [0, 1], sizes = [32, 255], strides = [1, 1]} : vector<32x256xf32> to vector<32x255xf32>
    %9 = vector.extract_strided_slice %7 {offsets = [0, 0], sizes = [32, 1], strides = [1, 1]} : vector<32x256xf32> to vector<32x1xf32>
    %10 = tpu.concatenate %8, %9 in 1 : vector<32x255xf32>, vector<32x1xf32> -> vector<32x256xf32>
    %11 = vector.extract_strided_slice %7 {offsets = [0, 2], sizes = [32, 254], strides = [1, 1]} : vector<32x256xf32> to vector<32x254xf32>
    %12 = vector.extract_strided_slice %7 {offsets = [0, 0], sizes = [32, 2], strides = [1, 1]} : vector<32x256xf32> to vector<32x2xf32>
    %13 = tpu.concatenate %11, %12 in 1 : vector<32x254xf32>, vector<32x2xf32> -> vector<32x256xf32>
    %14 = vector.extract_strided_slice %7 {offsets = [0, 16], sizes = [32, 240], strides = [1, 1]} : vector<32x256xf32> to vector<32x240xf32>
    %15 = vector.extract_strided_slice %7 {offsets = [0, 0], sizes = [32, 16], strides = [1, 1]} : vector<32x256xf32> to vector<32x16xf32>
    %16 = tpu.concatenate %14, %15 in 1 : vector<32x240xf32>, vector<32x16xf32> -> vector<32x256xf32>
    %17 = vector.extract_strided_slice %7 {offsets = [0, 17], sizes = [32, 239], strides = [1, 1]} : vector<32x256xf32> to vector<32x239xf32>
    %18 = vector.extract_strided_slice %7 {offsets = [0, 0], sizes = [32, 17], strides = [1, 1]} : vector<32x256xf32> to vector<32x17xf32>
    %19 = tpu.concatenate %17, %18 in 1 : vector<32x239xf32>, vector<32x17xf32> -> vector<32x256xf32>
    %20 = vector.extract_strided_slice %7 {offsets = [0, 18], sizes = [32, 238], strides = [1, 1]} : vector<32x256xf32> to vector<32x238xf32>
    %21 = vector.extract_strided_slice %7 {offsets = [0, 0], sizes = [32, 18], strides = [1, 1]} : vector<32x256xf32> to vector<32x18xf32>
    %22 = tpu.concatenate %20, %21 in 1 : vector<32x238xf32>, vector<32x18xf32> -> vector<32x256xf32>
    %23 = vector.extract_strided_slice %7 {offsets = [0, 32], sizes = [32, 224], strides = [1, 1]} : vector<32x256xf32> to vector<32x224xf32>
    %24 = vector.extract_strided_slice %7 {offsets = [0, 0], sizes = [32, 32], strides = [1, 1]} : vector<32x256xf32> to vector<32x32xf32>
    %25 = tpu.concatenate %23, %24 in 1 : vector<32x224xf32>, vector<32x32xf32> -> vector<32x256xf32>
    %26 = vector.extract_strided_slice %7 {offsets = [0, 33], sizes = [32, 223], strides = [1, 1]} : vector<32x256xf32> to vector<32x223xf32>
    %27 = vector.extract_strided_slice %7 {offsets = [0, 0], sizes = [32, 33], strides = [1, 1]} : vector<32x256xf32> to vector<32x33xf32>
    %28 = tpu.concatenate %26, %27 in 1 : vector<32x223xf32>, vector<32x33xf32> -> vector<32x256xf32>
    %29 = vector.extract_strided_slice %7 {offsets = [0, 34], sizes = [32, 222], strides = [1, 1]} : vector<32x256xf32> to vector<32x222xf32>
    %30 = vector.extract_strided_slice %7 {offsets = [0, 0], sizes = [32, 34], strides = [1, 1]} : vector<32x256xf32> to vector<32x34xf32>
    %31 = tpu.concatenate %29, %30 in 1 : vector<32x222xf32>, vector<32x34xf32> -> vector<32x256xf32>
    %32 = tpu.concatenate %7, %10, %13, %16, %19, %22, %25, %28, %31 in 0 : vector<32x256xf32>, vector<32x256xf32>, vector<32x256xf32>, vector<32x256xf32>, vector<32x256xf32>, vector<32x256xf32>, vector<32x256xf32>, vector<32x256xf32>, vector<32x256xf32> -> vector<288x256xf32>
    %c0_6 = arith.constant 0 : index
    %c0_7 = arith.constant 0 : index
    %33 = vector.load %arg5[%c0_6, %c0_7] : memref<16x288xf32, #tpu.memory_space<vmem>>, vector<16x288xf32>
    %cst_8 = arith.constant dense<0.000000e+00> : vector<16x256xf32>
    %34 = tpu.matmul %33, %32, %cst_8 {dimension_numbers = #tpu.dot_dimension_numbers<[1], [0], [0], [1], [0, 0, 1, 1], [], []>} : vector<16x288xf32>, vector<288x256xf32>, vector<16x256xf32> -> vector<16x256xf32>
    %c0_9 = arith.constant 0 : index
    %c0_10 = arith.constant 0 : index
    %35 = vector.load %arg6[%c0_9, %c0_10] : memref<16x1xf32, #tpu.memory_space<vmem>>, vector<16x1xf32>
    %36 = vector.broadcast %35 : vector<16x1xf32> to vector<16x256xf32>
    %37 = arith.addf %34, %36 : vector<16x256xf32>
    %cst_11 = arith.constant 0.000000e+00 : f32
    %38 = vector.broadcast %cst_11 : f32 to vector<16x256xf32>
    %39 = arith.maximumf %37, %38 : vector<16x256xf32>
    %c0_12 = arith.constant 0 : index
    %c0_13 = arith.constant 0 : index
    %40 = vector.load %arg1[%c0_12, %c0_13] : memref<1x8xf32, #tpu.memory_space<vmem>>, vector<1x8xf32>
    %c0_14 = arith.constant 0 : index
    %c0_15 = arith.constant 0 : index
    %41 = vector.load %arg8[%c0_14, %c0_15] : memref<8x192xf32, #tpu.memory_space<vmem>>, vector<8x192xf32>
    %cst_16 = arith.constant dense<0.000000e+00> : vector<1x192xf32>
    %42 = tpu.matmul %40, %41, %cst_16 {dimension_numbers = #tpu.dot_dimension_numbers<[1], [0], [0], [1], [0, 0, 1, 1], [], []>} : vector<1x8xf32>, vector<8x192xf32>, vector<1x192xf32> -> vector<1x192xf32>
    %c0_17 = arith.constant 0 : index
    %c0_18 = arith.constant 0 : index
    %43 = vector.load %arg10[%c0_17, %c0_18] : memref<1x192xf32, #tpu.memory_space<vmem>>, vector<1x192xf32>
    %44 = arith.addf %42, %43 : vector<1x192xf32>
    %c0_19 = arith.constant 0 : index
    %c0_20 = arith.constant 0 : index
    %c0_21 = arith.constant 0 : index
    %45 = vector.load %arg7[%c0_19, %c0_20, %c0_21] : memref<16x256x192xbf16, #tpu.memory_space<vmem>>, vector<1x256x192xbf16>
    %46 = vector.shape_cast %45 : vector<1x256x192xbf16> to vector<256x192xbf16>
    %47 = arith.extf %46 : vector<256x192xbf16> to vector<256x192xf32>
    %48 = vector.extract_strided_slice %39 {offsets = [0, 0], sizes = [1, 256], strides = [1, 1]} : vector<16x256xf32> to vector<1x256xf32>
    %cst_22 = arith.constant dense<0.000000e+00> : vector<1x192xf32>
    %49 = tpu.matmul %48, %47, %cst_22 {dimension_numbers = #tpu.dot_dimension_numbers<[1], [0], [0], [1], [0, 0, 1, 1], [], []>} : vector<1x256xf32>, vector<256x192xf32>, vector<1x192xf32> -> vector<1x192xf32>
    %50 = arith.addf %44, %49 : vector<1x192xf32>
    %c1 = arith.constant 1 : index
    %c0_23 = arith.constant 0 : index
    %c0_24 = arith.constant 0 : index
    %51 = vector.load %arg7[%c1, %c0_23, %c0_24] : memref<16x256x192xbf16, #tpu.memory_space<vmem>>, vector<1x256x192xbf16>
    %52 = vector.shape_cast %51 : vector<1x256x192xbf16> to vector<256x192xbf16>
    %53 = arith.extf %52 : vector<256x192xbf16> to vector<256x192xf32>
    %54 = vector.extract_strided_slice %39 {offsets = [1, 0], sizes = [1, 256], strides = [1, 1]} : vector<16x256xf32> to vector<1x256xf32>
    %cst_25 = arith.constant dense<0.000000e+00> : vector<1x192xf32>
    %55 = tpu.matmul %54, %53, %cst_25 {dimension_numbers = #tpu.dot_dimension_numbers<[1], [0], [0], [1], [0, 0, 1, 1], [], []>} : vector<1x256xf32>, vector<256x192xf32>, vector<1x192xf32> -> vector<1x192xf32>
    %56 = arith.addf %50, %55 : vector<1x192xf32>
    %c2 = arith.constant 2 : index
    %c0_26 = arith.constant 0 : index
    %c0_27 = arith.constant 0 : index
    %57 = vector.load %arg7[%c2, %c0_26, %c0_27] : memref<16x256x192xbf16, #tpu.memory_space<vmem>>, vector<1x256x192xbf16>
    %58 = vector.shape_cast %57 : vector<1x256x192xbf16> to vector<256x192xbf16>
    %59 = arith.extf %58 : vector<256x192xbf16> to vector<256x192xf32>
    %60 = vector.extract_strided_slice %39 {offsets = [2, 0], sizes = [1, 256], strides = [1, 1]} : vector<16x256xf32> to vector<1x256xf32>
    %cst_28 = arith.constant dense<0.000000e+00> : vector<1x192xf32>
    %61 = tpu.matmul %60, %59, %cst_28 {dimension_numbers = #tpu.dot_dimension_numbers<[1], [0], [0], [1], [0, 0, 1, 1], [], []>} : vector<1x256xf32>, vector<256x192xf32>, vector<1x192xf32> -> vector<1x192xf32>
    %62 = arith.addf %56, %61 : vector<1x192xf32>
    %c3 = arith.constant 3 : index
    %c0_29 = arith.constant 0 : index
    %c0_30 = arith.constant 0 : index
    %63 = vector.load %arg7[%c3, %c0_29, %c0_30] : memref<16x256x192xbf16, #tpu.memory_space<vmem>>, vector<1x256x192xbf16>
    %64 = vector.shape_cast %63 : vector<1x256x192xbf16> to vector<256x192xbf16>
    %65 = arith.extf %64 : vector<256x192xbf16> to vector<256x192xf32>
    %66 = vector.extract_strided_slice %39 {offsets = [3, 0], sizes = [1, 256], strides = [1, 1]} : vector<16x256xf32> to vector<1x256xf32>
    %cst_31 = arith.constant dense<0.000000e+00> : vector<1x192xf32>
    %67 = tpu.matmul %66, %65, %cst_31 {dimension_numbers = #tpu.dot_dimension_numbers<[1], [0], [0], [1], [0, 0, 1, 1], [], []>} : vector<1x256xf32>, vector<256x192xf32>, vector<1x192xf32> -> vector<1x192xf32>
    %68 = arith.addf %62, %67 : vector<1x192xf32>
    %c4 = arith.constant 4 : index
    %c0_32 = arith.constant 0 : index
    %c0_33 = arith.constant 0 : index
    %69 = vector.load %arg7[%c4, %c0_32, %c0_33] : memref<16x256x192xbf16, #tpu.memory_space<vmem>>, vector<1x256x192xbf16>
    %70 = vector.shape_cast %69 : vector<1x256x192xbf16> to vector<256x192xbf16>
    %71 = arith.extf %70 : vector<256x192xbf16> to vector<256x192xf32>
    %72 = vector.extract_strided_slice %39 {offsets = [4, 0], sizes = [1, 256], strides = [1, 1]} : vector<16x256xf32> to vector<1x256xf32>
    %cst_34 = arith.constant dense<0.000000e+00> : vector<1x192xf32>
    %73 = tpu.matmul %72, %71, %cst_34 {dimension_numbers = #tpu.dot_dimension_numbers<[1], [0], [0], [1], [0, 0, 1, 1], [], []>} : vector<1x256xf32>, vector<256x192xf32>, vector<1x192xf32> -> vector<1x192xf32>
    %74 = arith.addf %68, %73 : vector<1x192xf32>
    %c5 = arith.constant 5 : index
    %c0_35 = arith.constant 0 : index
    %c0_36 = arith.constant 0 : index
    %75 = vector.load %arg7[%c5, %c0_35, %c0_36] : memref<16x256x192xbf16, #tpu.memory_space<vmem>>, vector<1x256x192xbf16>
    %76 = vector.shape_cast %75 : vector<1x256x192xbf16> to vector<256x192xbf16>
    %77 = arith.extf %76 : vector<256x192xbf16> to vector<256x192xf32>
    %78 = vector.extract_strided_slice %39 {offsets = [5, 0], sizes = [1, 256], strides = [1, 1]} : vector<16x256xf32> to vector<1x256xf32>
    %cst_37 = arith.constant dense<0.000000e+00> : vector<1x192xf32>
    %79 = tpu.matmul %78, %77, %cst_37 {dimension_numbers = #tpu.dot_dimension_numbers<[1], [0], [0], [1], [0, 0, 1, 1], [], []>} : vector<1x256xf32>, vector<256x192xf32>, vector<1x192xf32> -> vector<1x192xf32>
    %80 = arith.addf %74, %79 : vector<1x192xf32>
    %c6 = arith.constant 6 : index
    %c0_38 = arith.constant 0 : index
    %c0_39 = arith.constant 0 : index
    %81 = vector.load %arg7[%c6, %c0_38, %c0_39] : memref<16x256x192xbf16, #tpu.memory_space<vmem>>, vector<1x256x192xbf16>
    %82 = vector.shape_cast %81 : vector<1x256x192xbf16> to vector<256x192xbf16>
    %83 = arith.extf %82 : vector<256x192xbf16> to vector<256x192xf32>
    %84 = vector.extract_strided_slice %39 {offsets = [6, 0], sizes = [1, 256], strides = [1, 1]} : vector<16x256xf32> to vector<1x256xf32>
    %cst_40 = arith.constant dense<0.000000e+00> : vector<1x192xf32>
    %85 = tpu.matmul %84, %83, %cst_40 {dimension_numbers = #tpu.dot_dimension_numbers<[1], [0], [0], [1], [0, 0, 1, 1], [], []>} : vector<1x256xf32>, vector<256x192xf32>, vector<1x192xf32> -> vector<1x192xf32>
    %86 = arith.addf %80, %85 : vector<1x192xf32>
    %c7 = arith.constant 7 : index
    %c0_41 = arith.constant 0 : index
    %c0_42 = arith.constant 0 : index
    %87 = vector.load %arg7[%c7, %c0_41, %c0_42] : memref<16x256x192xbf16, #tpu.memory_space<vmem>>, vector<1x256x192xbf16>
    %88 = vector.shape_cast %87 : vector<1x256x192xbf16> to vector<256x192xbf16>
    %89 = arith.extf %88 : vector<256x192xbf16> to vector<256x192xf32>
    %90 = vector.extract_strided_slice %39 {offsets = [7, 0], sizes = [1, 256], strides = [1, 1]} : vector<16x256xf32> to vector<1x256xf32>
    %cst_43 = arith.constant dense<0.000000e+00> : vector<1x192xf32>
    %91 = tpu.matmul %90, %89, %cst_43 {dimension_numbers = #tpu.dot_dimension_numbers<[1], [0], [0], [1], [0, 0, 1, 1], [], []>} : vector<1x256xf32>, vector<256x192xf32>, vector<1x192xf32> -> vector<1x192xf32>
    %92 = arith.addf %86, %91 : vector<1x192xf32>
    %c8 = arith.constant 8 : index
    %c0_44 = arith.constant 0 : index
    %c0_45 = arith.constant 0 : index
    %93 = vector.load %arg7[%c8, %c0_44, %c0_45] : memref<16x256x192xbf16, #tpu.memory_space<vmem>>, vector<1x256x192xbf16>
    %94 = vector.shape_cast %93 : vector<1x256x192xbf16> to vector<256x192xbf16>
    %95 = arith.extf %94 : vector<256x192xbf16> to vector<256x192xf32>
    %96 = vector.extract_strided_slice %39 {offsets = [8, 0], sizes = [1, 256], strides = [1, 1]} : vector<16x256xf32> to vector<1x256xf32>
    %cst_46 = arith.constant dense<0.000000e+00> : vector<1x192xf32>
    %97 = tpu.matmul %96, %95, %cst_46 {dimension_numbers = #tpu.dot_dimension_numbers<[1], [0], [0], [1], [0, 0, 1, 1], [], []>} : vector<1x256xf32>, vector<256x192xf32>, vector<1x192xf32> -> vector<1x192xf32>
    %98 = arith.addf %92, %97 : vector<1x192xf32>
    %c9 = arith.constant 9 : index
    %c0_47 = arith.constant 0 : index
    %c0_48 = arith.constant 0 : index
    %99 = vector.load %arg7[%c9, %c0_47, %c0_48] : memref<16x256x192xbf16, #tpu.memory_space<vmem>>, vector<1x256x192xbf16>
    %100 = vector.shape_cast %99 : vector<1x256x192xbf16> to vector<256x192xbf16>
    %101 = arith.extf %100 : vector<256x192xbf16> to vector<256x192xf32>
    %102 = vector.extract_strided_slice %39 {offsets = [9, 0], sizes = [1, 256], strides = [1, 1]} : vector<16x256xf32> to vector<1x256xf32>
    %cst_49 = arith.constant dense<0.000000e+00> : vector<1x192xf32>
    %103 = tpu.matmul %102, %101, %cst_49 {dimension_numbers = #tpu.dot_dimension_numbers<[1], [0], [0], [1], [0, 0, 1, 1], [], []>} : vector<1x256xf32>, vector<256x192xf32>, vector<1x192xf32> -> vector<1x192xf32>
    %104 = arith.addf %98, %103 : vector<1x192xf32>
    %c10 = arith.constant 10 : index
    %c0_50 = arith.constant 0 : index
    %c0_51 = arith.constant 0 : index
    %105 = vector.load %arg7[%c10, %c0_50, %c0_51] : memref<16x256x192xbf16, #tpu.memory_space<vmem>>, vector<1x256x192xbf16>
    %106 = vector.shape_cast %105 : vector<1x256x192xbf16> to vector<256x192xbf16>
    %107 = arith.extf %106 : vector<256x192xbf16> to vector<256x192xf32>
    %108 = vector.extract_strided_slice %39 {offsets = [10, 0], sizes = [1, 256], strides = [1, 1]} : vector<16x256xf32> to vector<1x256xf32>
    %cst_52 = arith.constant dense<0.000000e+00> : vector<1x192xf32>
    %109 = tpu.matmul %108, %107, %cst_52 {dimension_numbers = #tpu.dot_dimension_numbers<[1], [0], [0], [1], [0, 0, 1, 1], [], []>} : vector<1x256xf32>, vector<256x192xf32>, vector<1x192xf32> -> vector<1x192xf32>
    %110 = arith.addf %104, %109 : vector<1x192xf32>
    %c11 = arith.constant 11 : index
    %c0_53 = arith.constant 0 : index
    %c0_54 = arith.constant 0 : index
    %111 = vector.load %arg7[%c11, %c0_53, %c0_54] : memref<16x256x192xbf16, #tpu.memory_space<vmem>>, vector<1x256x192xbf16>
    %112 = vector.shape_cast %111 : vector<1x256x192xbf16> to vector<256x192xbf16>
    %113 = arith.extf %112 : vector<256x192xbf16> to vector<256x192xf32>
    %114 = vector.extract_strided_slice %39 {offsets = [11, 0], sizes = [1, 256], strides = [1, 1]} : vector<16x256xf32> to vector<1x256xf32>
    %cst_55 = arith.constant dense<0.000000e+00> : vector<1x192xf32>
    %115 = tpu.matmul %114, %113, %cst_55 {dimension_numbers = #tpu.dot_dimension_numbers<[1], [0], [0], [1], [0, 0, 1, 1], [], []>} : vector<1x256xf32>, vector<256x192xf32>, vector<1x192xf32> -> vector<1x192xf32>
    %116 = arith.addf %110, %115 : vector<1x192xf32>
    %c12 = arith.constant 12 : index
    %c0_56 = arith.constant 0 : index
    %c0_57 = arith.constant 0 : index
    %117 = vector.load %arg7[%c12, %c0_56, %c0_57] : memref<16x256x192xbf16, #tpu.memory_space<vmem>>, vector<1x256x192xbf16>
    %118 = vector.shape_cast %117 : vector<1x256x192xbf16> to vector<256x192xbf16>
    %119 = arith.extf %118 : vector<256x192xbf16> to vector<256x192xf32>
    %120 = vector.extract_strided_slice %39 {offsets = [12, 0], sizes = [1, 256], strides = [1, 1]} : vector<16x256xf32> to vector<1x256xf32>
    %cst_58 = arith.constant dense<0.000000e+00> : vector<1x192xf32>
    %121 = tpu.matmul %120, %119, %cst_58 {dimension_numbers = #tpu.dot_dimension_numbers<[1], [0], [0], [1], [0, 0, 1, 1], [], []>} : vector<1x256xf32>, vector<256x192xf32>, vector<1x192xf32> -> vector<1x192xf32>
    %122 = arith.addf %116, %121 : vector<1x192xf32>
    %c13 = arith.constant 13 : index
    %c0_59 = arith.constant 0 : index
    %c0_60 = arith.constant 0 : index
    %123 = vector.load %arg7[%c13, %c0_59, %c0_60] : memref<16x256x192xbf16, #tpu.memory_space<vmem>>, vector<1x256x192xbf16>
    %124 = vector.shape_cast %123 : vector<1x256x192xbf16> to vector<256x192xbf16>
    %125 = arith.extf %124 : vector<256x192xbf16> to vector<256x192xf32>
    %126 = vector.extract_strided_slice %39 {offsets = [13, 0], sizes = [1, 256], strides = [1, 1]} : vector<16x256xf32> to vector<1x256xf32>
    %cst_61 = arith.constant dense<0.000000e+00> : vector<1x192xf32>
    %127 = tpu.matmul %126, %125, %cst_61 {dimension_numbers = #tpu.dot_dimension_numbers<[1], [0], [0], [1], [0, 0, 1, 1], [], []>} : vector<1x256xf32>, vector<256x192xf32>, vector<1x192xf32> -> vector<1x192xf32>
    %128 = arith.addf %122, %127 : vector<1x192xf32>
    %c14 = arith.constant 14 : index
    %c0_62 = arith.constant 0 : index
    %c0_63 = arith.constant 0 : index
    %129 = vector.load %arg7[%c14, %c0_62, %c0_63] : memref<16x256x192xbf16, #tpu.memory_space<vmem>>, vector<1x256x192xbf16>
    %130 = vector.shape_cast %129 : vector<1x256x192xbf16> to vector<256x192xbf16>
    %131 = arith.extf %130 : vector<256x192xbf16> to vector<256x192xf32>
    %132 = vector.extract_strided_slice %39 {offsets = [14, 0], sizes = [1, 256], strides = [1, 1]} : vector<16x256xf32> to vector<1x256xf32>
    %cst_64 = arith.constant dense<0.000000e+00> : vector<1x192xf32>
    %133 = tpu.matmul %132, %131, %cst_64 {dimension_numbers = #tpu.dot_dimension_numbers<[1], [0], [0], [1], [0, 0, 1, 1], [], []>} : vector<1x256xf32>, vector<256x192xf32>, vector<1x192xf32> -> vector<1x192xf32>
    %134 = arith.addf %128, %133 : vector<1x192xf32>
    %c15 = arith.constant 15 : index
    %c0_65 = arith.constant 0 : index
    %c0_66 = arith.constant 0 : index
    %135 = vector.load %arg7[%c15, %c0_65, %c0_66] : memref<16x256x192xbf16, #tpu.memory_space<vmem>>, vector<1x256x192xbf16>
    %136 = vector.shape_cast %135 : vector<1x256x192xbf16> to vector<256x192xbf16>
    %137 = arith.extf %136 : vector<256x192xbf16> to vector<256x192xf32>
    %138 = vector.extract_strided_slice %39 {offsets = [15, 0], sizes = [1, 256], strides = [1, 1]} : vector<16x256xf32> to vector<1x256xf32>
    %cst_67 = arith.constant dense<0.000000e+00> : vector<1x192xf32>
    %139 = tpu.matmul %138, %137, %cst_67 {dimension_numbers = #tpu.dot_dimension_numbers<[1], [0], [0], [1], [0, 0, 1, 1], [], []>} : vector<1x256xf32>, vector<256x192xf32>, vector<1x192xf32> -> vector<1x192xf32>
    %140 = arith.addf %134, %139 : vector<1x192xf32>
    %c0_68 = arith.constant 0 : index
    %c0_69 = arith.constant 0 : index
    %141 = vector.load %arg2[%c0_68, %c0_69] : memref<1x64xf32, #tpu.memory_space<vmem>>, vector<1x64xf32>
    %c0_70 = arith.constant 0 : index
    %c0_71 = arith.constant 0 : index
    %142 = vector.load %arg9[%c0_70, %c0_71] : memref<64x192xf32, #tpu.memory_space<vmem>>, vector<64x192xf32>
    %cst_72 = arith.constant dense<0.000000e+00> : vector<1x192xf32>
    %143 = tpu.matmul %141, %142, %cst_72 {dimension_numbers = #tpu.dot_dimension_numbers<[1], [0], [0], [1], [0, 0, 1, 1], [], []>} : vector<1x64xf32>, vector<64x192xf32>, vector<1x192xf32> -> vector<1x192xf32>
    %c0_73 = arith.constant 0 : index
    %c0_74 = arith.constant 0 : index
    %144 = vector.load %arg11[%c0_73, %c0_74] : memref<1x192xf32, #tpu.memory_space<vmem>>, vector<1x192xf32>
    %145 = arith.addf %143, %144 : vector<1x192xf32>
    %146 = vector.extract_strided_slice %140 {offsets = [0, 0], sizes = [1, 64], strides = [1, 1]} : vector<1x192xf32> to vector<1x64xf32>
    %147 = vector.extract_strided_slice %145 {offsets = [0, 0], sizes = [1, 64], strides = [1, 1]} : vector<1x192xf32> to vector<1x64xf32>
    %148 = arith.addf %146, %147 : vector<1x64xf32>
    %149 = arith.negf %148 : vector<1x64xf32>
    %150 = math.exp %149 : vector<1x64xf32>
    %cst_75 = arith.constant 1.000000e+00 : f32
    %151 = vector.broadcast %cst_75 : f32 to vector<1x64xf32>
    %152 = arith.addf %151, %150 : vector<1x64xf32>
    %153 = arith.divf %151, %152 : vector<1x64xf32>
    %154 = vector.extract_strided_slice %140 {offsets = [0, 64], sizes = [1, 64], strides = [1, 1]} : vector<1x192xf32> to vector<1x64xf32>
    %155 = vector.extract_strided_slice %145 {offsets = [0, 64], sizes = [1, 64], strides = [1, 1]} : vector<1x192xf32> to vector<1x64xf32>
    %156 = arith.addf %154, %155 : vector<1x64xf32>
    %157 = arith.negf %156 : vector<1x64xf32>
    %158 = math.exp %157 : vector<1x64xf32>
    %cst_76 = arith.constant 1.000000e+00 : f32
    %159 = vector.broadcast %cst_76 : f32 to vector<1x64xf32>
    %160 = arith.addf %159, %158 : vector<1x64xf32>
    %161 = arith.divf %159, %160 : vector<1x64xf32>
    %162 = vector.extract_strided_slice %140 {offsets = [0, 128], sizes = [1, 64], strides = [1, 1]} : vector<1x192xf32> to vector<1x64xf32>
    %163 = vector.extract_strided_slice %145 {offsets = [0, 128], sizes = [1, 64], strides = [1, 1]} : vector<1x192xf32> to vector<1x64xf32>
    %164 = arith.mulf %153, %163 : vector<1x64xf32>
    %165 = arith.addf %162, %164 : vector<1x64xf32>
    %166 = math.tanh %165 : vector<1x64xf32>
    %cst_77 = arith.constant 1.000000e+00 : f32
    %167 = vector.broadcast %cst_77 : f32 to vector<1x64xf32>
    %168 = arith.subf %167, %161 : vector<1x64xf32>
    %169 = arith.mulf %168, %166 : vector<1x64xf32>
    %c0_78 = arith.constant 0 : index
    %c0_79 = arith.constant 0 : index
    %170 = vector.load %arg2[%c0_78, %c0_79] : memref<1x64xf32, #tpu.memory_space<vmem>>, vector<1x64xf32>
    %171 = arith.mulf %161, %170 : vector<1x64xf32>
    %172 = arith.addf %169, %171 : vector<1x64xf32>
    %cst_80 = arith.constant 0.000000e+00 : f32
    %173 = vector.broadcast %cst_80 : f32 to vector<1x64xf32>
    %174 = arith.maximumf %172, %173 : vector<1x64xf32>
    %c0_81 = arith.constant 0 : index
    %c0_82 = arith.constant 0 : index
    %175 = vector.load %arg12[%c0_81, %c0_82] : memref<64x32xf32, #tpu.memory_space<vmem>>, vector<64x32xf32>
    %cst_83 = arith.constant dense<0.000000e+00> : vector<1x32xf32>
    %176 = tpu.matmul %174, %175, %cst_83 {dimension_numbers = #tpu.dot_dimension_numbers<[1], [0], [0], [1], [0, 0, 1, 1], [], []>} : vector<1x64xf32>, vector<64x32xf32>, vector<1x32xf32> -> vector<1x32xf32>
    %c0_84 = arith.constant 0 : index
    %c0_85 = arith.constant 0 : index
    %177 = vector.load %arg13[%c0_84, %c0_85] : memref<1x32xf32, #tpu.memory_space<vmem>>, vector<1x32xf32>
    %178 = arith.addf %176, %177 : vector<1x32xf32>
    %cst_86 = arith.constant 0.000000e+00 : f32
    %179 = vector.broadcast %cst_86 : f32 to vector<1x32xf32>
    %180 = arith.maximumf %178, %179 : vector<1x32xf32>
    %c0_87 = arith.constant 0 : index
    %c0_88 = arith.constant 0 : index
    %181 = vector.load %arg14[%c0_87, %c0_88] : memref<32x6xf32, #tpu.memory_space<vmem>>, vector<32x6xf32>
    %cst_89 = arith.constant dense<0.000000e+00> : vector<1x6xf32>
    %182 = tpu.matmul %180, %181, %cst_89 {dimension_numbers = #tpu.dot_dimension_numbers<[1], [0], [0], [1], [0, 0, 1, 1], [], []>} : vector<1x32xf32>, vector<32x6xf32>, vector<1x6xf32> -> vector<1x6xf32>
    %c0_90 = arith.constant 0 : index
    %c0_91 = arith.constant 0 : index
    %183 = vector.load %arg15[%c0_90, %c0_91] : memref<1x6xf32, #tpu.memory_space<vmem>>, vector<1x6xf32>
    %184 = arith.addf %182, %183 : vector<1x6xf32>
    %cst_92 = arith.constant dense<0xFF800000> : vector<1xf32>
    %185 = vector.multi_reduction <maximumf>, %184, %cst_92 [1] : vector<1x6xf32> to vector<1xf32>
    %186 = vector.shape_cast %185 : vector<1xf32> to vector<1x1xf32>
    %187 = vector.broadcast %186 : vector<1x1xf32> to vector<1x6xf32>
    %188 = arith.subf %184, %187 : vector<1x6xf32>
    %189 = math.exp %188 : vector<1x6xf32>
    %cst_93 = arith.constant dense<0.000000e+00> : vector<1xf32>
    %190 = vector.multi_reduction <add>, %189, %cst_93 [1] : vector<1x6xf32> to vector<1xf32>
    %191 = vector.shape_cast %190 : vector<1xf32> to vector<1x1xf32>
    %192 = tpu.reciprocal %191 {approx = true} : vector<1x1xf32> -> vector<1x1xf32>
    %193 = vector.broadcast %192 : vector<1x1xf32> to vector<1x6xf32>
    %194 = arith.mulf %189, %193 : vector<1x6xf32>
    %c0_94 = arith.constant 0 : index
    %c0_95 = arith.constant 0 : index
    %195 = vector.load %arg16[%c0_94, %c0_95] : memref<1x6xf32, #tpu.memory_space<vmem>>, vector<1x6xf32>
    tpu.vector_store %arg16[%c0_94, %c0_95], %194 {strides = array<i32>} : memref<1x6xf32, #tpu.memory_space<vmem>>, vector<1x6xf32>,
    %c0_96 = arith.constant 0 : index
    %c0_97 = arith.constant 0 : index
    %196 = vector.load %arg17[%c0_96, %c0_97] : memref<1x64xf32, #tpu.memory_space<vmem>>, vector<1x64xf32>
    tpu.vector_store %arg17[%c0_96, %c0_97], %172 {strides = array<i32>} : memref<1x64xf32, #tpu.memory_space<vmem>>, vector<1x64xf32>,
    return
  }
}

</mosaic_0001>

<bundles_post_ra>
// kernel: intention_forward.1
= control target key start
LH: loop header
LB: loop body
LE: loop exit
PB: predicated region body
PF: predicated region fallthrough
CT: control target
= control target key end

     0   :  { %s6882_s0 = inlined_call_operand.vmem [shape: f32[4,256], index: 0, kind: input, shape index: {}]   ;;  %s6883_s1 = inlined_call_operand.vmem [shape: f32[1,8], index: 1, kind: input, shape index: {}]   ;;  %s6884_s2 = inlined_call_operand.vmem [shape: f32[1,64], index: 2, kind: input, shape index: {}]   ;;  %s6885_s3 = inlined_call_operand.vmem [shape: f32[32,4], index: 3, kind: input, shape index: {}]   ;;  %s6886_s4 = inlined_call_operand.vmem [shape: f32[32,1], index: 4, kind: input, shape index: {}]   ;;  %s6887_s5 = inlined_call_operand.vmem [shape: f32[16,288], index: 5, kind: input, shape index: {}]   ;;  %s6888_s6 = inlined_call_operand.vmem [shape: f32[16,1], index: 6, kind: input, shape index: {}]   ;;  %s6889_s7 = inlined_call_operand.vmem [shape: bf16[16,256,192], index: 7, kind: input, shape index: {}]   ;;  %s6890_s8 = inlined_call_operand.vmem [shape: f32[8,192], index: 8, kind: input, shape index: {}]   ;;  %s6891_s9 = inlined_call_operand.vmem [shape: f32[64,192], index: 9, kind: input, shape index: {}]   ;;  %s6892_s10 = inlined_call_operand.vmem [shape: f32[1,192], index: 10, kind: input, shape index: {}]   ;;  %s6893_s11 = inlined_call_operand.vmem [shape: f32[1,192], index: 11, kind: input, shape index: {}]   ;;  %s6894_s12 = inlined_call_operand.vmem [shape: f32[64,32], index: 12, kind: input, shape index: {}]   ;;  %s6895_s13 = inlined_call_operand.vmem [shape: f32[1,32], index: 13, kind: input, shape index: {}]   ;;  %s6896_s14 = inlined_call_operand.vmem [shape: f32[32,6], index: 14, kind: input, shape index: {}]   ;;  %s6897_s15 = inlined_call_operand.vmem [shape: f32[1,6], index: 15, kind: input, shape index: {}]   ;;  %s6898_s16 = inlined_call_operand.hbm [shape: f32[1,6], index: 16, kind: output, shape index: {0}]   ;;  %s6899_s17 = inlined_call_operand.hbm [shape: f32[1,64], index: 17, kind: output, shape index: {1}]  }
   0x1   :  { %6900 = sst [smem:[#allocation8_spill]] %s6882_s0 }
   0x2   :  { %6901 = sst [smem:[#allocation9_spill]] %s6883_s1 }
   0x3   :  { %23 = vsyncpa [#allocation3], 0  ;;  %s6902_s26 = sld [smem:[#allocation8_spill]]  ;;  %v63_v1 = vld [vmem:[%s6886_s4 + $0x8] sm:$0xff]  ;;  %v4576_v2 = vmov 0   ;;  %v65_v3 = vld [vmem:[%s6886_s4 + $0x18] sm:$0xff] }
   0x4   :  { %4352 = vset.pattern.permute.xlu1 %v4576_v2  ;;  %4351 = vset.pattern.permute.xlu0 %v4576_v2 }
   0x5   :  { %73 = vperm.xlu1 %4352, %v63_v1   ;;  %83 = vperm.xlu0 %4351, %v65_v3  }
   0x9   :  { %v61_v0 = vld [vmem:[%s6902_s26] sm:$0xff] }
   0xa   :  { %87 = vst [vmem:[#allocation1] ss:$2 sm:$0xff] %v61_v0 }
   0xb   :  { %24 = vsyncpa [#allocation5], 0  ;;  %vm103_vm0 = vcmask 1043456   ;;  %v57_v4 = vld [vmem:[%s6885_s3] sm:$0xff]  ;;  %vm90_vm1 = vcmask 31744   ;;  %v64_v6 = vld [vmem:[%s6886_s4 + $0x10] sm:$0xff] }
   0xc   :  { %v62_v5 = vld [vmem:[%s6886_s4] sm:$0xff]  ;;  %v58_v9 = vld [vmem:[%s6885_s3 + $0x8] sm:$0xff]  ;;  %v59_v10 = vld [vmem:[%s6885_s3 + $0x10] sm:$0xff]  ;;  %s4578_s27 = smov 112   ;;  %s4579_s28 = smov 96   ;;  %vm272_vm2 = vcmask 916480  }
   0xd   :  { %68 = vperm.xlu1 %4352, %v62_v5   ;;  %78 = vperm.xlu0 %4351, %v64_v6   ;;  %v60_v11 = vld [vmem:[%s6885_s3 + $0x18] sm:$0xff]  ;;  %s4577_s3 = smov 126   ;;  %s4580_s29 = smov 95   ;;  %v484_v44 = vld [vmem:[%s6888_s6] sm:$0xff]  ;;  %v485_v45 = vld [vmem:[%s6888_s6 + $0x8] sm:$0xff]  ;;  %vm235_vm3 = vcmask 1031168  }
   0xe   :  { %s4581_s0 = smov 127   ;;  %s4582_s30 = smov 110   ;;  %vm420_vm4 = vcmask 777216   ;;  %vm383_vm5 = vcmask 785408   ;;  %vm198_vm6 = vcmask 1039360   ;;  %vm457_vm7 = vcmask 769024  }
   0xf   :  { %s4583_s18 = smov 111   ;;  %s4584_s19 = smov 94   ;;  %vm346_vm8 = vcmask 900096   ;;  %vm309_vm9 = vcmask 908288   ;;  %vm496_vm10 = vcmask 261120   ;;  %vm654_vm11 = vcmask 64512  }
  0x10   :  { %vm3644_vm12 = vcmask 523264   ;;  %s3813_s20 = sshll.u32 %s6898_s16, 4  ;;  %s3814_s20 = int_to_ptr.hbm [resolvable:$true] %s3813_s20 }
  0x11   :  { %v88_v7 = vld.sshfl [vmem:[#allocation1] sm:$0xff pattern:$0x75316420]  ;;  %v89_v8 = vld.sshfl [vmem:[#allocation1 + $0x8] sm:$0xff pattern:$0x75316420] }
  0x12   :  { %3838 = vmatpush.msk.msra.mxu0 %vm103_vm0, %v88_v7  ;;  %3843 = vmatpush.msk.msra.mxu1 %vm103_vm0, %v89_v8 }
  0x13   :  { %3839 = vmatmul.msk.f32.vlgmr.msra.gmra.mxu0 %vm90_vm1, %v57_v4  ;;  %3844 = vmatmul.msk.f32.vlgmr.msra.gmra.mxu1 %vm90_vm1, %v57_v4 }
  0x1b   :  { %3840 = vmatmul.msk.f32.gmra.mxu0 %vm90_vm1, %v58_v9  ;;  %3845 = vmatmul.msk.f32.gmra.mxu1 %vm90_vm1, %v58_v9 }
  0x23   :  { %3841 = vmatmul.msk.f32.gmra.mxu0 %vm90_vm1, %v59_v10  ;;  %3846 = vmatmul.msk.f32.gmra.mxu1 %vm90_vm1, %v59_v10 }
  0x2b   :  { %3842 = vmatmul.msk.f32.gmra.mxu0 %vm90_vm1, %v60_v11  ;;  %3847 = vmatmul.msk.f32.gmra.mxu1 %vm90_vm1, %v60_v11  ;;  %vm3804_vm1 = vcmask 516096  }
  0x77   :  { %v74_v12 = vpop.permute.xlu1 %73  ;;  %v84_v20 = vpop.permute.xlu0 %83 }
  0x7f   :  { %v69_v13 = vpop.permute.xlu1 %68  ;;  %v79_v29 = vpop.permute.xlu0 %78 }
  0x90   :  { %v125_v14 = vpop.f32.mrf.mxu0  ;;  %v154_v15 = vpop.f32.mrf.mxu1 }
  0x91   :  { %v4713_v16 = vadd.f32 %v125_v14, %v69_v13  ;;  %v4715_v17 = vadd.f32 %v154_v15, %v69_v13 }
  0x93   :  { %v166_v18 = vmax.f32 %v4713_v16, 0.0  ;;  %v167_v19 = vmax.f32 %v4715_v17, 0.0 }
  0x95   :  { %v4723_v21 = vpack.i.bf16 %v167_v19, %v166_v18 }
  0x97   :  { %4364 = vrot.lane.b32.xlu2 %v4723_v21, %s4577_s3  ;;  %4354 = vrot.lane.b32.xlu0 %v4723_v21, %s4578_s27 }
  0x98   :  { %v128_v22 = vpop.f32.mrf.mxu0  ;;  %v157_v23 = vpop.f32.mrf.mxu1 }
  0x99   :  { %v4729_v24 = vadd.f32 %v128_v22, %v74_v12  ;;  %v4731_v25 = vadd.f32 %v157_v23, %v74_v12 }
  0x9b   :  { %v168_v26 = vmax.f32 %v4729_v24, 0.0  ;;  %v169_v27 = vmax.f32 %v4731_v25, 0.0 }
  0x9d   :  { %v4373_v28 = vpack.i.bf16 %v169_v27, %v168_v26 }
  0x9f   :  { %4374 = vrot.lane.b32.xlu1 %v4373_v28, %s4578_s27  ;;  %4369 = vrot.lane.b32.xlu2 %v4723_v21, %s4579_s28 }
  0xa0   :  { %4359 = vrot.lane.b32.xlu0 %v4723_v21, %s4580_s29  ;;  %v131_v30 = vpop.f32.mrf.mxu0  ;;  %v160_v31 = vpop.f32.mrf.mxu1 }
  0xa1   :  { %v4743_v32 = vadd.f32 %v131_v30, %v79_v29  ;;  %v4745_v33 = vadd.f32 %v160_v31, %v79_v29 }
  0xa3   :  { %v170_v34 = vmax.f32 %v4743_v32, 0.0  ;;  %v171_v35 = vmax.f32 %v4745_v33, 0.0  ;;  %v478_v32 = vld [vmem:[%s6887_s5] sm:$0xff] }
  0xa5   :  { %v4393_v36 = vpack.i.bf16 %v171_v35, %v170_v34 }
  0xa7   :  { %4379 = vrot.lane.b32.xlu1 %v4373_v28, %s4580_s29  ;;  %4394 = vrot.lane.b32.xlu2 %v4393_v36, %s4578_s27 }
  0xa8   :  { %4384 = vrot.lane.b32.xlu0 %v4373_v28, %s4577_s3  ;;  %v134_v37 = vpop.f32.mrf.mxu0  ;;  %v163_v38 = vpop.f32.mrf.mxu1 }
  0xa9   :  { %v4755_v39 = vadd.f32 %v134_v37, %v84_v20  ;;  %v4757_v40 = vadd.f32 %v163_v38, %v84_v20 }
  0xab   :  { %v172_v41 = vmax.f32 %v4755_v39, 0.0  ;;  %v173_v42 = vmax.f32 %v4757_v40, 0.0 }
  0xad   :  { %v4413_v43 = vpack.i.bf16 %v173_v42, %v172_v41 }
  0xaf   :  { %4404 = vrot.lane.b32.xlu1 %v4393_v36, %s4577_s3  ;;  %4399 = vrot.lane.b32.xlu2 %v4393_v36, %s4580_s29 }
  0xb0   :  { %4389 = vrot.lane.b32.xlu0 %v4373_v28, %s4579_s28 }
  0xb7   :  { %4409 = vrot.lane.b32.xlu1 %v4393_v36, %s4579_s28  ;;  %4414 = vrot.lane.b32.xlu2 %v4413_v43, %s4578_s27 }
  0xb8   :  { %4419 = vrot.lane.b32.xlu0 %v4413_v43, %s4580_s29 }
  0xbf   :  { %4439 = vrot.lane.b32.xlu1 %v4723_v21, %s4581_s0  ;;  %4429 = vrot.lane.b32.xlu2 %v4373_v28, %s4581_s0 }
  0xc0   :  { %4424 = vrot.lane.b32.xlu0 %v4393_v36, %s4581_s0 }
  0xc7   :  { %4474 = vrot.lane.b32.xlu1 %v4413_v43, %s4581_s0  ;;  %4444 = vrot.lane.b32.xlu2 %v4413_v43, %s4577_s3  ;;  %s6903_s3 = sld [smem:[#allocation9_spill]] }
  0xc8   :  { %4434 = vrot.lane.b32.xlu0 %v4393_v36, %s4582_s30 }
  0xcf   :  { %4479 = vrot.lane.b32.xlu1 %v4413_v43, %s4582_s30  ;;  %4449 = vrot.lane.b32.xlu2 %v4413_v43, %s4579_s28 }
  0xd0   :  { %4459 = vrot.lane.b32.xlu0 %v4723_v21, %s4582_s30 }
  0xd7   :  { %4484 = vrot.lane.b32.xlu1 %v4413_v43, %s4583_s18  ;;  %4454 = vrot.lane.b32.xlu2 %v4373_v28, %s4582_s30 }
  0xd8   :  { %4469 = vrot.lane.b32.xlu0 %v4373_v28, %s4583_s18 }
  0xdf   :  { %4489 = vrot.lane.b32.xlu1 %v4723_v21, %s4583_s18  ;;  %4464 = vrot.lane.b32.xlu2 %v4393_v36, %s4583_s18 }
  0xe0   :  { %4494 = vrot.lane.b32.xlu0 %v4393_v36, %s4584_s19 }
  0xe7   :  { %4499 = vrot.lane.b32.xlu1 %v4373_v28, %s4584_s19  ;;  %4504 = vrot.lane.b32.xlu2 %v4413_v43, %s4584_s19 }
  0xe8   :  { %488 = vperm.xlu0 %4351, %v484_v44  }
  0xef   :  { %493 = vperm.xlu1 %4352, %v485_v45   ;;  %4509 = vrot.lane.b32.xlu2 %v4723_v21, %s4584_s19 }
  0xf1   :  { %v4781_v46 = vpop.permute.xlu2 %4364 }
  0xf2   :  { %v4367_v28 = vunpack.i.h.bf16 %v4781_v46  ;;  %v4366_v29 = vunpack.i.l.bf16 %v4781_v46 }
  0xf4   :  { %v236_v45 = vsel %vm235_vm3, %v4366_v29, %v4367_v28  ;;  %v252_v46 = vsel %vm235_vm3, %v4367_v28, %v4366_v29 }
  0xf9   :  { %v4783_v47 = vpop.permute.xlu2 %4369 }
 0x101   :  { %v4395_v48 = vpop.permute.xlu2 %4394 }
 0x102   :  { %v4397_v53 = vunpack.i.h.bf16 %v4395_v48  ;;  %v4396_v54 = vunpack.i.l.bf16 %v4395_v48 }
 0x104   :  { %v275_v0 = vsel %vm272_vm2, %v4396_v54, %v4397_v53  ;;  %v291_v1 = vsel %vm272_vm2, %v4397_v53, %v4396_v54 }
 0x109   :  { %v4785_v49 = vpop.permute.xlu2 %4399  ;;  %v4355_v50 = vpop.permute.xlu0 %4354 }
 0x10a   :  { %v4357_v62 = vunpack.i.h.bf16 %v4355_v50  ;;  %v4356_v63 = vunpack.i.l.bf16 %v4355_v50  ;;  %v4402_v48 = vunpack.i.h.bf16 %v4785_v49  ;;  %v4401_v50 = vunpack.i.l.bf16 %v4785_v49 }
 0x10c   :  { %v273_v7 = vsel %vm272_vm2, %v4356_v63, %v4357_v62  ;;  %v289_v8 = vsel %vm272_vm2, %v4357_v62, %v4356_v63  ;;  %v439_v17 = vsel %vm420_vm4, %v4402_v48, %v4401_v50 }
 0x111   :  { %v4375_v51 = vpop.permute.xlu1 %4374  ;;  %v4415_v52 = vpop.permute.xlu2 %4414 }
 0x112   :  { %v4417_v55 = vunpack.i.h.bf16 %v4415_v52  ;;  %v4416_v56 = vunpack.i.l.bf16 %v4415_v52  ;;  %v4787_v57 = vpop.permute.xlu0 %4359  ;;  %v4377_v58 = vunpack.i.h.bf16 %v4375_v51  ;;  %v4376_v59 = vunpack.i.l.bf16 %v4375_v51 }
 0x114   :  { %v276_v60 = vsel %vm272_vm2, %v4416_v56, %v4417_v55  ;;  %v292_v61 = vsel %vm272_vm2, %v4417_v55, %v4416_v56  ;;  %v274_v2 = vsel %vm272_vm2, %v4376_v59, %v4377_v58  ;;  %v290_v3 = vsel %vm272_vm2, %v4377_v58, %v4376_v59 }
 0x115   :  { %503 = vmatpush.msra.mxu2 %v276_v60  ;;  %572 = vmatpush.msrb.mxu1 %v292_v61  ;;  %v4362_v56 = vunpack.i.h.bf16 %v4787_v57  ;;  %v4361_v58 = vunpack.i.l.bf16 %v4787_v57  ;;  %v423_v59 = vsel %vm420_vm4, %v4401_v50, %v4402_v48  ;;  %v481_v48 = vld [vmem:[%s6887_s5 + $0x18] sm:$0xff]  ;;  %v5016_v57 = vld [vmem:[%s6887_s5 + $0x8] sm:$0xff]  ;;  %vm3787_vm2 = vcmask 40960  }
 0x117   :  { %504 = vmatpush.msra.mxu2 %v275_v0  ;;  %573 = vmatpush.msrb.mxu1 %v291_v1 }
 0x119   :  { %v4795_v4 = vpop.permute.xlu1 %4379  ;;  %v4797_v5 = vpop.permute.xlu2 %4429  ;;  %505 = vmatpush.msra.mxu2 %v274_v2  ;;  %574 = vmatpush.msrb.mxu1 %v290_v3 }
 0x11a   :  { %v4385_v6 = vpop.permute.xlu0 %4384  ;;  %v4382_v53 = vunpack.i.h.bf16 %v4795_v4  ;;  %v4381_v54 = vunpack.i.l.bf16 %v4795_v4 }
 0x11b   :  { %506 = vmatpush.msra.mxu2 %v273_v7  ;;  %575 = vmatpush.msrb.mxu1 %v289_v8  ;;  %v4387_v20 = vunpack.i.h.bf16 %v4385_v6  ;;  %v4386_v21 = vunpack.i.l.bf16 %v4385_v6  ;;  %v421_v6 = vsel %vm420_vm4, %v4361_v58, %v4362_v56 }
 0x11c   :  { %v422_v0 = vsel %vm420_vm4, %v4381_v54, %v4382_v53 }
 0x11d   :  { %v237_v36 = vsel %vm235_vm3, %v4386_v21, %v4387_v20  ;;  %v253_v37 = vsel %vm235_vm3, %v4387_v20, %v4386_v21 }
 0x121   :  { %v4405_v9 = vpop.permute.xlu1 %4404  ;;  %v4445_v10 = vpop.permute.xlu2 %4444 }
 0x122   :  { %v4407_v11 = vunpack.i.h.bf16 %v4405_v9  ;;  %v4406_v12 = vunpack.i.l.bf16 %v4405_v9  ;;  %v4447_v13 = vunpack.i.h.bf16 %v4445_v10  ;;  %v4446_v14 = vunpack.i.l.bf16 %v4445_v10  ;;  %v4801_v15 = vpop.permute.xlu0 %4389 }
 0x123   :  { %v4392_v7 = vunpack.i.h.bf16 %v4801_v15  ;;  %v4391_v8 = vunpack.i.l.bf16 %v4801_v15  ;;  %v4372_v10 = vunpack.i.h.bf16 %v4783_v47 }
 0x124   :  { %v239_v22 = vsel %vm235_vm3, %v4446_v14, %v4447_v13  ;;  %v255_v23 = vsel %vm235_vm3, %v4447_v13, %v4446_v14  ;;  %v238_v30 = vsel %vm235_vm3, %v4406_v12, %v4407_v11  ;;  %v254_v31 = vsel %vm235_vm3, %v4407_v11, %v4406_v12 }
 0x125   :  { %507 = vmatpush.msra.mxu2 %v239_v22  ;;  %576 = vmatpush.msrb.mxu1 %v255_v23  ;;  %v4371_v11 = vunpack.i.l.bf16 %v4783_v47  ;;  %v385_v20 = vsel %vm383_vm5, %v4391_v8, %v4392_v7 }
 0x127   :  { %508 = vmatpush.msra.mxu2 %v238_v30  ;;  %577 = vmatpush.msrb.mxu1 %v254_v31  ;;  %v384_v30 = vsel %vm383_vm5, %v4371_v11, %v4372_v10  ;;  %v4432_v31 = vunpack.i.h.bf16 %v4797_v5 }
 0x129   :  { %v4811_v38 = vpop.permute.xlu1 %4409  ;;  %v4813_v43 = vpop.permute.xlu2 %4449  ;;  %509 = vmatpush.msra.mxu2 %v237_v36  ;;  %578 = vmatpush.msrb.mxu1 %v253_v37  ;;  %v4431_v36 = vunpack.i.l.bf16 %v4797_v5 }
 0x12a   :  { %v4815_v44 = vpop.permute.xlu0 %4419  ;;  %v4452_v60 = vunpack.i.h.bf16 %v4813_v43  ;;  %v4451_v61 = vunpack.i.l.bf16 %v4813_v43  ;;  %v4412_v2 = vunpack.i.h.bf16 %v4811_v38  ;;  %v4411_v3 = vunpack.i.l.bf16 %v4811_v38  ;;  %v5026_v43 = vld [vmem:[%s6889_s7 + $0x70] sm:$0xff] }
 0x12b   :  { %v4422_v51 = vunpack.i.h.bf16 %v4815_v44  ;;  %v4421_v52 = vunpack.i.l.bf16 %v4815_v44  ;;  %510 = vmatpush.msra.mxu2 %v236_v45  ;;  %579 = vmatpush.msrb.mxu1 %v252_v46  ;;  %v401_v38 = vsel %vm383_vm5, %v4392_v7, %v4391_v8  ;;  %v710_v7 = vld [vmem:[%s6889_s7 + $0x60] sm:$0xff] }
 0x12c   :  { %v387_v9 = vsel %vm383_vm5, %v4451_v61, %v4452_v60  ;;  %v386_v12 = vsel %vm383_vm5, %v4411_v3, %v4412_v2 }
 0x12d   :  { %v424_v55 = vsel %vm420_vm4, %v4421_v52, %v4422_v51  ;;  %v440_v25 = vsel %vm420_vm4, %v4422_v51, %v4421_v52  ;;  %v437_v52 = vsel %vm420_vm4, %v4362_v56, %v4361_v58  ;;  %v5021_v56 = vld [vmem:[%s6889_s7 + $0x78] sm:$0xff] }
 0x12e   :  { %526 = vmatpush.msra.mxu3 %v424_v55 }
 0x130   :  { %527 = vmatpush.msra.mxu3 %v423_v59 }
 0x131   :  { %v4440_v62 = vpop.permute.xlu1 %4439  ;;  %v4839_v63 = vpop.permute.xlu2 %4454 }
 0x132   :  { %v4425_v1 = vpop.permute.xlu0 %4424  ;;  %528 = vmatpush.msra.mxu3 %v422_v0  ;;  %v4442_v46 = vunpack.i.h.bf16 %v4440_v62  ;;  %v4441_v55 = vunpack.i.l.bf16 %v4440_v62 }
 0x133   :  { %v4427_v21 = vunpack.i.h.bf16 %v4425_v1  ;;  %v4426_v22 = vunpack.i.l.bf16 %v4425_v1  ;;  %v200_v1 = vsel %vm198_vm6, %v4431_v36, %v4432_v31 }
 0x134   :  { %529 = vmatpush.msra.mxu3 %v421_v6  ;;  %v216_v6 = vsel %vm198_vm6, %v4432_v31, %v4431_v36  ;;  %v4457_v31 = vunpack.i.h.bf16 %v4839_v63  ;;  %v4456_v36 = vunpack.i.l.bf16 %v4839_v63 }
 0x135   :  { %v201_v59 = vsel %vm198_vm6, %v4426_v22, %v4427_v21  ;;  %v217_v0 = vsel %vm198_vm6, %v4427_v21, %v4426_v22 }
 0x136   :  { %530 = vmatpush.msra.mxu3 %v387_v9  ;;  %v348_v39 = vsel %vm346_vm8, %v4456_v36, %v4457_v31 }
 0x138   :  { %531 = vmatpush.msra.mxu3 %v386_v12 }
 0x139   :  { %v4475_v13 = vpop.permute.xlu1 %4474  ;;  %v4867_v14 = vpop.permute.xlu2 %4464 }
 0x13a   :  { %v4477_v23 = vunpack.i.h.bf16 %v4475_v13  ;;  %v4476_v28 = vunpack.i.l.bf16 %v4475_v13  ;;  %v4874_v29 = vpop.permute.xlu0 %4434  ;;  %532 = vmatpush.msra.mxu3 %v385_v20  ;;  %v199_v13 = vsel %vm198_vm6, %v4441_v55, %v4442_v46  ;;  %v215_v20 = vsel %vm198_vm6, %v4442_v46, %v4441_v55 }
 0x13b   :  { %v4437_v5 = vunpack.i.h.bf16 %v4874_v29  ;;  %v4436_v9 = vunpack.i.l.bf16 %v4874_v29 }
 0x13c   :  { %533 = vmatpush.msra.mxu3 %v384_v30  ;;  %v202_v37 = vsel %vm198_vm6, %v4476_v28, %v4477_v23  ;;  %v218_v45 = vsel %vm198_vm6, %v4477_v23, %v4476_v28 }
 0x13d   :  { %511 = vmatpush.msra.mxu2 %v202_v37  ;;  %580 = vmatpush.msrb.mxu1 %v218_v45 }
 0x13f   :  { %512 = vmatpush.msra.mxu2 %v201_v59  ;;  %581 = vmatpush.msrb.mxu1 %v217_v0  ;;  %v349_v59 = vsel %vm346_vm8, %v4436_v9, %v4437_v5  ;;  %v403_v0 = vsel %vm383_vm5, %v4452_v60, %v4451_v61  ;;  %v647_v60 = vld [vmem:[%s6890_s8 + $0x8] sm:$0xff]  ;;  %v761_v61 = vunpack.c.h.bf16 %v5021_v56 }
 0x141   :  { %v4891_v12 = vpop.permute.xlu1 %4479  ;;  %v4893_v62 = vpop.permute.xlu2 %4504  ;;  %513 = vmatpush.msra.mxu2 %v200_v1  ;;  %582 = vmatpush.msrb.mxu1 %v216_v6  ;;  %v402_v6 = vsel %vm383_vm5, %v4412_v2, %v4411_v3 }
 0x142   :  { %v4482_v21 = vunpack.i.h.bf16 %v4891_v12  ;;  %v4481_v22 = vunpack.i.l.bf16 %v4891_v12  ;;  %v4507_v23 = vunpack.i.h.bf16 %v4893_v62  ;;  %v4506_v28 = vunpack.i.l.bf16 %v4893_v62  ;;  %v4901_v30 = vpop.permute.xlu0 %4459 }
 0x143   :  { %514 = vmatpush.msra.mxu2 %v199_v13  ;;  %583 = vmatpush.msrb.mxu1 %v215_v20  ;;  %v4462_v46 = vunpack.i.h.bf16 %v4901_v30  ;;  %v4461_v55 = vunpack.i.l.bf16 %v4901_v30  ;;  %v759_v20 = vunpack.c.h.bf16 %v5026_v43  ;;  %v365_v12 = vsel %vm346_vm8, %v4437_v5, %v4436_v9  ;;  %v708_v9 = vld [vmem:[%s6889_s7 + $0x50] sm:$0xff] }
 0x144   :  { %v350_v37 = vsel %vm346_vm8, %v4481_v22, %v4482_v21  ;;  %v461_v45 = vsel %vm457_vm7, %v4506_v28, %v4507_v23  ;;  %v477_v13 = vsel %vm457_vm7, %v4507_v23, %v4506_v28  ;;  %v400_v28 = vsel %vm383_vm5, %v4372_v10, %v4371_v11  ;;  %v5075_v11 = vld [vmem:[%s6887_s5 + $0x20] sm:$0xff] }
 0x145   :  { %515 = vmatpush.msra.mxu2 %v172_v41  ;;  %534 = vmatpush.msra.mxu3 %v350_v37  ;;  %v347_v24 = vsel %vm346_vm8, %v4461_v55, %v4462_v46  ;;  %v4466_v41 = vunpack.i.l.bf16 %v4867_v14  ;;  %v5048_v37 = vld [vmem:[%s6889_s7 + $0x68] sm:$0xff]  ;;  %v366_v8 = vsel %vm346_vm8, %v4482_v21, %v4481_v22  ;;  %v480_v21 = vld [vmem:[%s6887_s5 + $0x10] sm:$0xff]  ;;  %v760_v22 = vunpack.c.l.bf16 %v5021_v56 }
 0x146   :  { %561 = vmatpush.msrb.mxu0 %v461_v45  ;;  %584 = vmatpush.msrb.mxu1 %v173_v42  ;;  %v438_v42 = vsel %vm420_vm4, %v4382_v53, %v4381_v54  ;;  %v363_v63 = vsel %vm346_vm8, %v4462_v46, %v4461_v55  ;;  %v754_v30 = vunpack.c.l.bf16 %v710_v7  ;;  %v728_v55 = vld [vmem:[%s6889_s7 + $0xf0] sm:$0xff] }
 0x147   :  { %516 = vmatpush.msra.mxu2 %v170_v34  ;;  %535 = vmatpush.msra.mxu3 %v349_v59  ;;  %v757_v59 = vunpack.c.h.bf16 %v5048_v37 }
 0x148   :  { %585 = vmatpush.msrb.mxu1 %v171_v35 }
 0x149   :  { %v4935_v40 = vpop.permute.xlu1 %4484  ;;  %517 = vmatpush.msra.mxu2 %v168_v26  ;;  %536 = vmatpush.msra.mxu3 %v348_v39  ;;  %v4467_v26 = vunpack.i.h.bf16 %v4867_v14  ;;  %v4510_v45 = vpop.permute.xlu2 %4509  ;;  %v727_v14 = vld [vmem:[%s6889_s7 + $0xe8] sm:$0xff] }
 0x14a   :  { %v4487_v34 = vunpack.i.h.bf16 %v4935_v40  ;;  %v4486_v33 = vunpack.i.l.bf16 %v4935_v40  ;;  %v4944_v35 = vpop.permute.xlu0 %4469  ;;  %586 = vmatpush.msrb.mxu1 %v169_v27  ;;  %v4512_v15 = vunpack.i.h.bf16 %v4510_v45  ;;  %v4511_v39 = vunpack.i.l.bf16 %v4510_v45  ;;  %v483_v40 = vld [vmem:[%s6887_s5 + $0x28] sm:$0xff] }
 0x14b   :  { %518 = vmatpush.msra.mxu2 %v166_v18  ;;  %537 = vmatpush.msra.mxu3 %v347_v24  ;;  %v4472_v16 = vunpack.i.h.bf16 %v4944_v35  ;;  %v4471_v18 = vunpack.i.l.bf16 %v4944_v35  ;;  %v755_v24 = vunpack.c.h.bf16 %v710_v7  ;;  %v789_v45 = vunpack.c.h.bf16 %v727_v14 }
 0x14c   :  { %587 = vmatpush.msrb.mxu1 %v167_v19  ;;  %519 = vmatmul.f32.vlgmr.msra.gmra.mxu2 %v478_v32  ;;  %v313_v27 = vsel %vm309_vm9, %v4486_v33, %v4487_v34  ;;  %v312_v19 = vsel %vm309_vm9, %v4466_v41, %v4467_v26  ;;  %v458_v29 = vsel %vm457_vm7, %v4511_v39, %v4512_v15 }
 0x14d   :  { %588 = vmatmul.f32.vlgmr.msrb.gmra.mxu1 %v478_v32  ;;  %595 = vmatpush.msrb.mxu2 %v440_v25  ;;  %v311_v49 = vsel %vm309_vm9, %v4471_v18, %v4472_v16  ;;  %v709_v32 = vld [vmem:[%s6889_s7 + $0x58] sm:$0xff]  ;;  %v474_v5 = vsel %vm457_vm7, %v4512_v15, %v4511_v39  ;;  %v699_v39 = vld [vmem:[%s6889_s7 + $0x8] sm:$0xff] }
 0x14e   :  { %538 = vmatpush.msra.mxu3 %v313_v27  ;;  %693 = vmatpush.msra.mxu1 %v647_v60  ;;  %v5092_v25 = vld [vmem:[%s6889_s7 + $0xf8] sm:$0xff]  ;;  %v364_v27 = vsel %vm346_vm8, %v4457_v31, %v4456_v36  ;;  %v756_v31 = vunpack.c.l.bf16 %v5048_v37  ;;  %v751_v36 = vunpack.c.h.bf16 %v708_v9  ;;  %v726_v60 = vld [vmem:[%s6889_s7 + $0xe0] sm:$0xff] }
 0x14f   :  { %596 = vmatpush.msrb.mxu2 %v439_v17  ;;  %v758_v17 = vunpack.c.l.bf16 %v5026_v43  ;;  %v793_v43 = vunpack.c.h.bf16 %v5092_v25 }
 0x150   :  { %539 = vmatpush.msra.mxu3 %v312_v19  ;;  %834 = vmatpush.msrb.mxu1 %v761_v61  ;;  %v753_v19 = vunpack.c.h.bf16 %v709_v32 }
 0x151   :  { %597 = vmatpush.msrb.mxu2 %v438_v42  ;;  %v4986_v44 = vpop.permute.xlu1 %4489  ;;  %v646_v42 = vld [vmem:[%s6890_s8] sm:$0xff] }
 0x152   :  { %v4492_v50 = vunpack.i.h.bf16 %v4986_v44  ;;  %v4491_v51 = vunpack.i.l.bf16 %v4986_v44  ;;  %v4495_v4 = vpop.permute.xlu0 %4494  ;;  %540 = vmatpush.msra.mxu3 %v311_v49  ;;  %835 = vmatpush.msrb.mxu1 %v759_v20  ;;  %v707_v49 = vld [vmem:[%s6889_s7 + $0x48] sm:$0xff]  ;;  %v786_v20 = vunpack.c.l.bf16 %v726_v60 }
 0x153   :  { %v4497_v53 = vunpack.i.h.bf16 %v4495_v4  ;;  %v4496_v54 = vunpack.i.l.bf16 %v4495_v4  ;;  %598 = vmatpush.msrb.mxu2 %v437_v52  ;;  %v706_v4 = vld [vmem:[%s6889_s7 + $0x40] sm:$0xff]  ;;  %v329_v52 = vsel %vm309_vm9, %v4487_v34, %v4486_v33  ;;  %v749_v46 = vunpack.c.h.bf16 %v707_v49 }
 0x154   :  { %522 = vmatmul.f32.gmra.mxu2 %v481_v48  ;;  %v310_v1 = vsel %vm309_vm9, %v4491_v51, %v4492_v50  ;;  %836 = vmatpush.msrb.mxu1 %v757_v59  ;;  %v752_v34 = vunpack.c.l.bf16 %v709_v32  ;;  %v747_v33 = vunpack.c.h.bf16 %v706_v4  ;;  %v326_v35 = vsel %vm309_vm9, %v4492_v50, %v4491_v51  ;;  %v702_v51 = vld [vmem:[%s6889_s7 + $0x20] sm:$0xff] }
 0x155   :  { %591 = vmatmul.f32.gmra.mxu1 %v481_v48  ;;  %599 = vmatpush.msrb.mxu2 %v403_v0  ;;  %v460_v58 = vsel %vm457_vm7, %v4496_v54, %v4497_v53  ;;  %v476_v2 = vsel %vm457_vm7, %v4497_v53, %v4496_v54  ;;  %v792_v48 = vunpack.c.l.bf16 %v5092_v25  ;;  %v328_v53 = vsel %vm309_vm9, %v4467_v26, %v4466_v41  ;;  %v705_v54 = vld [vmem:[%s6889_s7 + $0x38] sm:$0xff] }
 0x156   :  { %541 = vmatpush.msra.mxu3 %v310_v1  ;;  %562 = vmatpush.msrb.mxu0 %v460_v58  ;;  %v790_v0 = vunpack.c.l.bf16 %v728_v55  ;;  %v327_v26 = vsel %vm309_vm9, %v4472_v16, %v4471_v18  ;;  %v750_v41 = vunpack.c.l.bf16 %v708_v9  ;;  %v704_v1 = vld [vmem:[%s6889_s7 + $0x30] sm:$0xff]  ;;  %v745_v56 = vunpack.c.h.bf16 %v705_v54  ;;  %v703_v18 = vld [vmem:[%s6889_s7 + $0x28] sm:$0xff]  ;;  %v3869_v25 = vld [vmem:[%s6889_s7 + $0x178] sm:$0xff] }
 0x157   :  { %542 = vmatmul.f32.vlgmr.msra.gmra.mxu3 %v5016_v57  ;;  %600 = vmatpush.msrb.mxu2 %v402_v6  ;;  %v748_v16 = vunpack.c.l.bf16 %v707_v49  ;;  %v788_v58 = vunpack.c.l.bf16 %v727_v14  ;;  %v743_v61 = vunpack.c.h.bf16 %v704_v1  ;;  %v746_v44 = vunpack.c.l.bf16 %v706_v4  ;;  %v725_v6 = vld [vmem:[%s6889_s7 + $0xd8] sm:$0xff] }
 0x158   :  { %630 = vmatpush.msrb.mxu3 %v477_v13  ;;  %837 = vmatpush.msrb.mxu1 %v755_v24  ;;  %v791_v50 = vunpack.c.h.bf16 %v728_v55  ;;  %v741_v13 = vunpack.c.h.bf16 %v703_v18  ;;  %v744_v37 = vunpack.c.l.bf16 %v705_v54  ;;  %v787_v59 = vunpack.c.h.bf16 %v726_v60  ;;  %v645_v24 = vld [vmem:[%s6903_s3] sm:$0x1]  ;;  %v721_v49 = vld [vmem:[%s6889_s7 + $0xb8] sm:$0xff]  ;;  %v3864_v60 = vld [vmem:[%s6889_s7 + $0x150] sm:$0xff]  ;;  %s4585_s3 = smov 64  }
 0x159   :  { %601 = vmatpush.msrb.mxu2 %v401_v38  ;;  %v4500_v3 = vpop.permute.xlu1 %4499  ;;  %v739_v38 = vunpack.c.h.bf16 %v702_v51  ;;  %v740_v15 = vunpack.c.l.bf16 %v703_v18  ;;  %v738_v32 = vunpack.c.l.bf16 %v702_v51  ;;  %v3866_v54 = vld [vmem:[%s6889_s7 + $0x160] sm:$0xff]  ;;  %v930_v51 = vunpack.c.h.bf16 %v3864_v60 }
 0x15a   :  { %631 = vmatpush.msrb.mxu3 %v476_v2  ;;  %v4502_v62 = vunpack.i.h.bf16 %v4500_v3  ;;  %v4501_v23 = vunpack.i.l.bf16 %v4500_v3  ;;  %838 = vmatpush.msrb.mxu1 %v753_v19  ;;  %v784_v2 = vunpack.c.l.bf16 %v725_v6  ;;  %v724_v3 = vld [vmem:[%s6889_s7 + $0xd0] sm:$0xff] }
 0x15b   :  { %602 = vmatpush.msrb.mxu2 %v400_v28  ;;  %v782_v7 = vunpack.c.l.bf16 %v724_v3 }
 0x15c   :  { %v459_v47 = vsel %vm457_vm7, %v4501_v23, %v4502_v62  ;;  %v475_v10 = vsel %vm457_vm7, %v4502_v62, %v4501_v23  ;;  %839 = vmatpush.msrb.mxu1 %v751_v36  ;;  %v742_v62 = vunpack.c.l.bf16 %v704_v1  ;;  %v700_v23 = vld [vmem:[%s6889_s7 + $0x10] sm:$0xff]  ;;  %v732_v36 = vunpack.c.l.bf16 %v699_v39  ;;  %v719_v1 = vld [vmem:[%s6889_s7 + $0xa8] sm:$0xff] }
 0x15d   :  { %603 = vmatpush.msrb.mxu2 %v366_v8  ;;  %563 = vmatpush.msrb.mxu0 %v459_v47  ;;  %v735_v8 = vunpack.c.h.bf16 %v700_v23  ;;  %v785_v47 = vunpack.c.h.bf16 %v725_v6  ;;  %v734_v19 = vunpack.c.l.bf16 %v700_v23  ;;  %v717_v6 = vld [vmem:[%s6889_s7 + $0x98] sm:$0xff] }
 0x15e   :  { %632 = vmatpush.msrb.mxu3 %v475_v10  ;;  %840 = vmatpush.msrb.mxu1 %v749_v46  ;;  %v723_v10 = vld [vmem:[%s6889_s7 + $0xc8] sm:$0xff] }
 0x15f   :  { %545 = vmatmul.f32.gmra.mxu3 %v5075_v11  ;;  %604 = vmatpush.msrb.mxu2 %v365_v12  ;;  %v698_v12 = vld [vmem:[%s6889_s7] sm:$0xff] }
 0x160   :  { %564 = vmatpush.msrb.mxu0 %v458_v29  ;;  %633 = vmatpush.msrb.mxu3 %v474_v5  ;;  %v780_v29 = vunpack.c.l.bf16 %v723_v10  ;;  %v722_v5 = vld [vmem:[%s6889_s7 + $0xc0] sm:$0xff]  ;;  %v731_v9 = vunpack.c.h.bf16 %v698_v12  ;;  %v730_v46 = vunpack.c.l.bf16 %v698_v12  ;;  %v3885_v12 = vld [vmem:[%s6889_s7 + $0x1f8] sm:$0xff] }
 0x161   :  { %3848 = vmatmul.msk.f32.vlgmr.msrb.gmra.mxu0 %vm496_vm10, %v480_v21  ;;  %605 = vmatpush.msrb.mxu2 %v364_v27  ;;  %v781_v27 = vunpack.c.h.bf16 %v723_v10  ;;  %v714_v10 = vld [vmem:[%s6889_s7 + $0x80] sm:$0xff] }
 0x162   :  { %794 = vmatpush.msra.mxu3 %v760_v22  ;;  %673 = vmatpush.msra.mxu0 %v646_v42  ;;  %v783_v22 = vunpack.c.h.bf16 %v724_v3  ;;  %v940_v42 = vunpack.c.h.bf16 %v3869_v25 }
 0x163   :  { %606 = vmatpush.msrb.mxu2 %v363_v63  ;;  %841 = vmatpush.msrb.mxu1 %v747_v33  ;;  %v779_v63 = vunpack.c.h.bf16 %v722_v5  ;;  %v720_v33 = vld [vmem:[%s6889_s7 + $0xb0] sm:$0xff] }
 0x164   :  { %795 = vmatpush.msra.mxu3 %v758_v17  ;;  %814 = vmatpush.msrb.mxu0 %v792_v48  ;;  %v3868_v17 = vld [vmem:[%s6889_s7 + $0x170] sm:$0xff]  ;;  %v778_v48 = vunpack.c.l.bf16 %v722_v5  ;;  %v775_v14 = vunpack.c.h.bf16 %v720_v33  ;;  %v3859_v5 = vld [vmem:[%s6889_s7 + $0x128] sm:$0xff] }
 0x165   :  { %607 = vmatpush.msrb.mxu2 %v329_v52  ;;  %842 = vmatpush.msrb.mxu1 %v745_v56  ;;  %v938_v4 = vunpack.c.h.bf16 %v3868_v17  ;;  %v776_v52 = vunpack.c.l.bf16 %v721_v49  ;;  %v3865_v56 = vld [vmem:[%s6889_s7 + $0x158] sm:$0xff] }
 0x166   :  { %796 = vmatpush.msra.mxu3 %v756_v31  ;;  %815 = vmatpush.msrb.mxu0 %v790_v0  ;;  %v3867_v31 = vld [vmem:[%s6889_s7 + $0x168] sm:$0xff]  ;;  %v774_v0 = vunpack.c.l.bf16 %v720_v33  ;;  %v932_v18 = vunpack.c.h.bf16 %v3865_v56 }
 0x167   :  { %608 = vmatpush.msrb.mxu2 %v328_v53  ;;  %3850 = vmatmul.msk.f32.vlgmr.msrb.gmra.mxu3 %vm496_vm10, %v480_v21  ;;  %v733_v21 = vunpack.c.h.bf16 %v699_v39  ;;  %v936_v55 = vunpack.c.h.bf16 %v3867_v31  ;;  %v939_v53 = vunpack.c.l.bf16 %v3869_v25 }
 0x168   :  { %797 = vmatpush.msra.mxu3 %v754_v30  ;;  %816 = vmatpush.msrb.mxu0 %v788_v58  ;;  %v777_v30 = vunpack.c.h.bf16 %v721_v49  ;;  %v718_v58 = vld [vmem:[%s6889_s7 + $0xa0] sm:$0xff] }
 0x169   :  { %3849 = vmatmul.msk.f32.gmra.mxu0 %vm496_vm10, %v483_v40  ;;  %609 = vmatpush.msrb.mxu2 %v327_v26  ;;  %v933_v26 = vunpack.c.l.bf16 %v3866_v54  ;;  %v3858_v49 = vld [vmem:[%s6889_s7 + $0x120] sm:$0xff] }
 0x16a   :  { %798 = vmatpush.msra.mxu3 %v752_v34  ;;  %843 = vmatpush.msrb.mxu1 %v743_v61  ;;  %v935_v34 = vunpack.c.l.bf16 %v3867_v31  ;;  %v770_v61 = vunpack.c.l.bf16 %v718_v58  ;;  %v3883_v31 = vld [vmem:[%s6889_s7 + $0x1e8] sm:$0xff] }
 0x16b   :  { %610 = vmatpush.msrb.mxu2 %v326_v35  ;;  %817 = vmatpush.msrb.mxu0 %v786_v20  ;;  %v773_v35 = vunpack.c.h.bf16 %v719_v1  ;;  %v768_v20 = vunpack.c.l.bf16 %v717_v6 }
 0x16c   :  { %611 = vmatmul.f32.vlgmr.msrb.gmra.mxu2 %v5016_v57  ;;  %799 = vmatpush.msra.mxu3 %v750_v41  ;;  %v701_v57 = vld [vmem:[%s6889_s7 + $0x18] sm:$0xff]  ;;  %v934_v41 = vunpack.c.h.bf16 %v3866_v54 }
 0x16d   :  { %854 = vmatpush.msra.mxu2 %v793_v43  ;;  %844 = vmatpush.msrb.mxu1 %v741_v13  ;;  %v737_v28 = vunpack.c.h.bf16 %v701_v57  ;;  %v772_v43 = vunpack.c.l.bf16 %v719_v1  ;;  %v3863_v13 = vld [vmem:[%s6889_s7 + $0x148] sm:$0xff] }
 0x16e   :  { %800 = vmatpush.msra.mxu3 %v748_v16  ;;  %818 = vmatpush.msrb.mxu0 %v784_v2  ;;  %v931_v16 = vunpack.c.l.bf16 %v3865_v56  ;;  %v3862_v2 = vld [vmem:[%s6889_s7 + $0x140] sm:$0xff] }
 0x16f   :  { %3851 = vmatmul.msk.f32.gmra.mxu3 %vm496_vm10, %v483_v40  ;;  %855 = vmatpush.msra.mxu2 %v791_v50  ;;  %v937_v40 = vunpack.c.l.bf16 %v3868_v17  ;;  %v929_v50 = vunpack.c.l.bf16 %v3864_v60  ;;  %v925_v23 = vunpack.c.l.bf16 %v3862_v2  ;;  %v3884_v17 = vld [vmem:[%s6889_s7 + $0x1f0] sm:$0xff] }
 0x170   :  { %801 = vmatpush.msra.mxu3 %v746_v44  ;;  %845 = vmatpush.msrb.mxu1 %v739_v38  ;;  %v771_v44 = vunpack.c.h.bf16 %v718_v58  ;;  %v716_v38 = vld [vmem:[%s6889_s7 + $0x90] sm:$0xff] }
 0x171   :  { %856 = vmatpush.msra.mxu2 %v789_v45  ;;  %819 = vmatpush.msrb.mxu0 %v782_v7  ;;  %v927_v45 = vunpack.c.l.bf16 %v3863_v13  ;;  %v766_v3 = vunpack.c.l.bf16 %v716_v38 }
 0x172   :  { %802 = vmatpush.msra.mxu3 %v744_v37  ;;  %846 = vmatpush.msrb.mxu1 %v737_v28  ;;  %v769_v37 = vunpack.c.h.bf16 %v717_v6  ;;  %v926_v28 = vunpack.c.h.bf16 %v3862_v2 }
 0x173   :  { %857 = vmatpush.msra.mxu2 %v787_v59  ;;  %3853 = vmatmul.msk.f32.vlgmr.msra.gmra.mxu1 %vm654_vm11, %v645_v24  ;;  %v715_v59 = vld [vmem:[%s6889_s7 + $0x88] sm:$0xff] }
 0x174   :  { %614 = vmatmul.f32.gmra.mxu2 %v5075_v11  ;;  %803 = vmatpush.msra.mxu3 %v742_v62  ;;  %v736_v11 = vunpack.c.l.bf16 %v701_v57  ;;  %v928_v57 = vunpack.c.h.bf16 %v3863_v13  ;;  %v767_v62 = vunpack.c.h.bf16 %v716_v38  ;;  %v764_v39 = vunpack.c.l.bf16 %v715_v59 }
 0x175   :  { %847 = vmatpush.msrb.mxu1 %v735_v8  ;;  %858 = vmatpush.msra.mxu2 %v785_v47  ;;  %v765_v7 = vunpack.c.h.bf16 %v715_v59 }
 0x176   :  { %804 = vmatpush.msra.mxu3 %v740_v15  ;;  %820 = vmatpush.msrb.mxu0 %v780_v29  ;;  %v3861_v15 = vld [vmem:[%s6889_s7 + $0x138] sm:$0xff]  ;;  %v972_v29 = vunpack.c.h.bf16 %v3885_v12 }
 0x177   :  { %848 = vmatpush.msrb.mxu1 %v733_v21  ;;  %859 = vmatpush.msra.mxu2 %v783_v22  ;;  %v923_v8 = vunpack.c.l.bf16 %v3861_v15  ;;  %v924_v47 = vunpack.c.h.bf16 %v3861_v15  ;;  %v762_v21 = vunpack.c.l.bf16 %v714_v10  ;;  %v763_v22 = vunpack.c.h.bf16 %v714_v10 }
 0x178   :  { %805 = vmatpush.msra.mxu3 %v738_v32  ;;  %821 = vmatpush.msrb.mxu0 %v778_v48  ;;  %v3860_v32 = vld [vmem:[%s6889_s7 + $0x130] sm:$0xff]  ;;  %v917_v48 = vunpack.c.l.bf16 %v3858_v49 }
 0x179   :  { %849 = vmatpush.msrb.mxu1 %v731_v9  ;;  %860 = vmatpush.msra.mxu2 %v781_v27  ;;  %v922_v25 = vunpack.c.h.bf16 %v3860_v32  ;;  %v919_v9 = vunpack.c.l.bf16 %v3859_v5  ;;  %v920_v27 = vunpack.c.h.bf16 %v3859_v5  ;;  %v489_v5 = vpop.permute.xlu0 %488 }
 0x17a   :  { %806 = vmatpush.msra.mxu3 %v736_v11  ;;  %822 = vmatpush.msrb.mxu0 %v776_v52  ;;  %v971_v11 = vunpack.c.l.bf16 %v3885_v12  ;;  %v3857_v52 = vld [vmem:[%s6889_s7 + $0x118] sm:$0xff]  ;;  %v3871_v12 = vld [vmem:[%s6889_s7 + $0x188] sm:$0xff] }
 0x17b   :  { %1019 = vmatpush.msra.mxu1 %v940_v42  ;;  %861 = vmatpush.msra.mxu2 %v779_v63  ;;  %v970_v42 = vunpack.c.h.bf16 %v3884_v17  ;;  %v918_v63 = vunpack.c.h.bf16 %v3858_v49 }
 0x17c   :  { %807 = vmatpush.msra.mxu3 %v734_v19  ;;  %3852 = vmatmul.msk.f32.vlgmr.msra.gmra.mxu0 %vm654_vm11, %v645_v24  ;;  %v921_v24 = vunpack.c.l.bf16 %v3860_v32  ;;  %v969_v19 = vunpack.c.l.bf16 %v3884_v17 }
 0x17d   :  { %1020 = vmatpush.msra.mxu1 %v938_v4  ;;  %862 = vmatpush.msra.mxu2 %v777_v30  ;;  %v968_v4 = vunpack.c.h.bf16 %v3883_v31  ;;  %v915_v30 = vunpack.c.l.bf16 %v3857_v52 }
 0x17e   :  { %808 = vmatpush.msra.mxu3 %v732_v36  ;;  %823 = vmatpush.msrb.mxu0 %v774_v0  ;;  %v967_v36 = vunpack.c.l.bf16 %v3883_v31  ;;  %v3881_v0 = vld [vmem:[%s6889_s7 + $0x1d8] sm:$0xff]  ;;  %v5328_v31 = vpop.permute.xlu1 %493 }
 0x17f   :  { %1021 = vmatpush.msra.mxu1 %v936_v55  ;;  %863 = vmatpush.msra.mxu2 %v775_v14  ;;  %v3882_v55 = vld [vmem:[%s6889_s7 + $0x1e0] sm:$0xff]  ;;  %v963_v14 = vunpack.c.l.bf16 %v3881_v0 }
 0x180   :  { %809 = vmatpush.msra.mxu3 %v730_v46  ;;  %824 = vmatpush.msrb.mxu0 %v772_v43  ;;  %v916_v46 = vunpack.c.h.bf16 %v3857_v52  ;;  %v3880_v43 = vld [vmem:[%s6889_s7 + $0x1d0] sm:$0xff] }
 0x181   :  { %1022 = vmatpush.msra.mxu1 %v934_v41  ;;  %864 = vmatpush.msra.mxu2 %v773_v35  ;;  %v3855_v41 = vld [vmem:[%s6889_s7 + $0x108] sm:$0xff]  ;;  %v961_v35 = vunpack.c.l.bf16 %v3880_v43 }
 0x182   :  { %979 = vmatpush.msrb.mxu3 %v939_v53  ;;  %825 = vmatpush.msrb.mxu0 %v770_v61  ;;  %v965_v53 = vunpack.c.l.bf16 %v3882_v55  ;;  %v911_v1 = vunpack.c.l.bf16 %v3855_v41  ;;  %v912_v56 = vunpack.c.h.bf16 %v3855_v41  ;;  %v3879_v61 = vld [vmem:[%s6889_s7 + $0x1c8] sm:$0xff] }
 0x183   :  { %1023 = vmatpush.msra.mxu1 %v932_v18  ;;  %865 = vmatpush.msra.mxu2 %v771_v44  ;;  %v3854_v18 = vld [vmem:[%s6889_s7 + $0x100] sm:$0xff]  ;;  %v959_v44 = vunpack.c.l.bf16 %v3879_v61 }
 0x184   :  { %980 = vmatpush.msrb.mxu3 %v937_v40  ;;  %826 = vmatpush.msrb.mxu0 %v768_v20  ;;  %v966_v40 = vunpack.c.h.bf16 %v3882_v55  ;;  %v909_v58 = vunpack.c.l.bf16 %v3854_v18  ;;  %v910_v60 = vunpack.c.h.bf16 %v3854_v18  ;;  %v3877_v20 = vld [vmem:[%s6889_s7 + $0x1b8] sm:$0xff] }
 0x185   :  { %1024 = vmatpush.msra.mxu1 %v930_v51  ;;  %866 = vmatpush.msra.mxu2 %v769_v37  ;;  %v3878_v51 = vld [vmem:[%s6889_s7 + $0x1c0] sm:$0xff]  ;;  %v955_v37 = vunpack.c.l.bf16 %v3877_v20 }
 0x186   :  { %981 = vmatpush.msrb.mxu3 %v935_v34  ;;  %827 = vmatpush.msrb.mxu0 %v766_v3  ;;  %v3856_v34 = vld [vmem:[%s6889_s7 + $0x110] sm:$0xff]  ;;  %v957_v6 = vunpack.c.l.bf16 %v3878_v51  ;;  %v958_v13 = vunpack.c.h.bf16 %v3878_v51  ;;  %v3875_v3 = vld [vmem:[%s6889_s7 + $0x1a8] sm:$0xff]  ;;  %v3893_v51 = vld [vmem:[%s6889_s7 + $0x238] sm:$0xff] }
 0x187   :  { %1025 = vmatpush.msra.mxu1 %v928_v57  ;;  %867 = vmatpush.msra.mxu2 %v767_v62  ;;  %v913_v33 = vunpack.c.l.bf16 %v3856_v34  ;;  %v914_v54 = vunpack.c.h.bf16 %v3856_v34  ;;  %v3876_v57 = vld [vmem:[%s6889_s7 + $0x1b0] sm:$0xff]  ;;  %v951_v62 = vunpack.c.l.bf16 %v3875_v3 }
 0x188   :  { %982 = vmatpush.msrb.mxu3 %v933_v26  ;;  %828 = vmatpush.msrb.mxu0 %v764_v39  ;;  %v964_v26 = vunpack.c.h.bf16 %v3881_v0  ;;  %v953_v38 = vunpack.c.l.bf16 %v3876_v57  ;;  %v954_v2 = vunpack.c.h.bf16 %v3876_v57  ;;  %v3873_v39 = vld [vmem:[%s6889_s7 + $0x198] sm:$0xff]  ;;  %v3892_v57 = vld [vmem:[%s6889_s7 + $0x230] sm:$0xff] }
 0x189   :  { %1026 = vmatpush.msra.mxu1 %v926_v28  ;;  %868 = vmatpush.msra.mxu2 %v765_v7  ;;  %v3874_v28 = vld [vmem:[%s6889_s7 + $0x1a0] sm:$0xff]  ;;  %v947_v7 = vunpack.c.l.bf16 %v3873_v39 }
 0x18a   :  { %983 = vmatpush.msrb.mxu3 %v931_v16  ;;  %829 = vmatpush.msrb.mxu0 %v762_v21  ;;  %v962_v16 = vunpack.c.h.bf16 %v3880_v43  ;;  %v949_v59 = vunpack.c.l.bf16 %v3874_v28  ;;  %v950_v15 = vunpack.c.h.bf16 %v3874_v28  ;;  %v943_v21 = vunpack.c.l.bf16 %v3871_v12 }
 0x18b   :  { %1027 = vmatpush.msra.mxu1 %v924_v47  ;;  %869 = vmatpush.msra.mxu2 %v763_v22  ;;  %v3872_v47 = vld [vmem:[%s6889_s7 + $0x190] sm:$0xff]  ;;  %v944_v22 = vunpack.c.h.bf16 %v3871_v12  ;;  %v1106_v28 = vunpack.c.l.bf16 %v3892_v57 }
 0x18c   :  { %984 = vmatpush.msrb.mxu3 %v929_v50  ;;  %999 = vmatpush.msra.mxu0 %v971_v11  ;;  %v960_v50 = vunpack.c.h.bf16 %v3879_v61  ;;  %v945_v10 = vunpack.c.l.bf16 %v3872_v47  ;;  %v946_v32 = vunpack.c.h.bf16 %v3872_v47  ;;  %v3894_v61 = vld [vmem:[%s6889_s7 + $0x240] sm:$0xff] }
 0x18d   :  { %1028 = vmatpush.msra.mxu1 %v922_v25  ;;  %1039 = vmatpush.msrb.mxu2 %v972_v29 }
 0x18e   :  { %985 = vmatpush.msrb.mxu3 %v927_v45  ;;  %1000 = vmatpush.msra.mxu0 %v969_v19  ;;  %v956_v45 = vunpack.c.h.bf16 %v3877_v20  ;;  %v3901_v19 = vld [vmem:[%s6889_s7 + $0x278] sm:$0xff]  ;;  %v1111_v20 = vunpack.c.h.bf16 %v3894_v61 }
 0x18f   :  { %1029 = vmatpush.msra.mxu1 %v920_v27  ;;  %1040 = vmatpush.msrb.mxu2 %v970_v42 }
 0x190   :  { %986 = vmatpush.msrb.mxu3 %v925_v23  ;;  %1001 = vmatpush.msra.mxu0 %v967_v36  ;;  %v952_v23 = vunpack.c.h.bf16 %v3875_v3  ;;  %v1124_v36 = vunpack.c.l.bf16 %v3901_v19  ;;  %v1109_v3 = vunpack.c.h.bf16 %v3893_v51 }
 0x191   :  { %1030 = vmatpush.msra.mxu1 %v918_v63  ;;  %1041 = vmatpush.msrb.mxu2 %v968_v4  ;;  %v3900_v63 = vld [vmem:[%s6889_s7 + $0x270] sm:$0xff]  ;;  %v1125_v4 = vunpack.c.h.bf16 %v3901_v19 }
 0x192   :  { %987 = vmatpush.msrb.mxu3 %v923_v8  ;;  %1002 = vmatpush.msra.mxu0 %v965_v53  ;;  %v948_v8 = vunpack.c.h.bf16 %v3873_v39  ;;  %v1122_v53 = vunpack.c.l.bf16 %v3900_v63  ;;  %v3916_v39 = vld [vmem:[%s6889_s7 + $0x2f0] sm:$0xff] }
 0x193   :  { %1031 = vmatpush.msra.mxu1 %v916_v46  ;;  %1042 = vmatpush.msrb.mxu2 %v966_v40  ;;  %v3899_v46 = vld [vmem:[%s6889_s7 + $0x268] sm:$0xff]  ;;  %v1123_v40 = vunpack.c.h.bf16 %v3900_v63  ;;  %v3913_v63 = vld [vmem:[%s6889_s7 + $0x2d8] sm:$0xff] }
 0x194   :  { %988 = vmatpush.msrb.mxu3 %v921_v24  ;;  %1003 = vmatpush.msra.mxu0 %v963_v14  ;;  %v3870_v24 = vld [vmem:[%s6889_s7 + $0x180] sm:$0xff]  ;;  %v1121_v0 = vunpack.c.h.bf16 %v3899_v46  ;;  %v3897_v14 = vld [vmem:[%s6889_s7 + $0x258] sm:$0xff] }
 0x195   :  { %1032 = vmatpush.msra.mxu1 %v914_v54  ;;  %1043 = vmatpush.msrb.mxu2 %v964_v26  ;;  %v941_v11 = vunpack.c.l.bf16 %v3870_v24  ;;  %v942_v29 = vunpack.c.h.bf16 %v3870_v24  ;;  %v1120_v54 = vunpack.c.l.bf16 %v3899_v46  ;;  %v1117_v43 = vunpack.c.h.bf16 %v3897_v14  ;;  %v3912_v46 = vld [vmem:[%s6889_s7 + $0x2d0] sm:$0xff] }
 0x196   :  { %989 = vmatpush.msrb.mxu3 %v919_v9  ;;  %1004 = vmatpush.msra.mxu0 %v961_v35  ;;  %v1155_v24 = vunpack.c.h.bf16 %v3916_v39 }
 0x197   :  { %1033 = vmatpush.msra.mxu1 %v912_v56  ;;  %1044 = vmatpush.msrb.mxu2 %v962_v16  ;;  %v1116_v56 = vunpack.c.l.bf16 %v3897_v14  ;;  %v3895_v16 = vld [vmem:[%s6889_s7 + $0x248] sm:$0xff] }
 0x198   :  { %990 = vmatpush.msrb.mxu3 %v917_v48  ;;  %1005 = vmatpush.msra.mxu0 %v959_v44  ;;  %v1112_v44 = vunpack.c.l.bf16 %v3895_v16  ;;  %v3911_v14 = vld [vmem:[%s6889_s7 + $0x2c8] sm:$0xff] }
 0x199   :  { %1034 = vmatpush.msra.mxu1 %v910_v60  ;;  %1045 = vmatpush.msrb.mxu2 %v960_v50  ;;  %v1113_v50 = vunpack.c.h.bf16 %v3895_v16  ;;  %v3910_v16 = vld [vmem:[%s6889_s7 + $0x2c0] sm:$0xff] }
 0x19a   :  { %991 = vmatpush.msrb.mxu3 %v915_v30  ;;  %1006 = vmatpush.msra.mxu0 %v957_v6 }
 0x19b   :  { %1046 = vmatpush.msrb.mxu2 %v958_v13  ;;  %v1110_v13 = vunpack.c.l.bf16 %v3894_v61 }
 0x19c   :  { %992 = vmatpush.msrb.mxu3 %v913_v33  ;;  %1007 = vmatpush.msra.mxu0 %v955_v37  ;;  %v3898_v33 = vld [vmem:[%s6889_s7 + $0x260] sm:$0xff] }
 0x19d   :  { %1047 = vmatpush.msrb.mxu2 %v956_v45  ;;  %v1118_v26 = vunpack.c.l.bf16 %v3898_v33  ;;  %v1119_v41 = vunpack.c.h.bf16 %v3898_v33 }
 0x19e   :  { %993 = vmatpush.msrb.mxu3 %v911_v1  ;;  %1008 = vmatpush.msra.mxu0 %v953_v38  ;;  %v3896_v1 = vld [vmem:[%s6889_s7 + $0x250] sm:$0xff] }
 0x19f   :  { %1048 = vmatpush.msrb.mxu2 %v954_v2  ;;  %v1114_v18 = vunpack.c.l.bf16 %v3896_v1  ;;  %v1108_v2 = vunpack.c.l.bf16 %v3893_v51  ;;  %v1142_v51 = vunpack.c.l.bf16 %v3910_v16 }
 0x1a0   :  { %994 = vmatpush.msrb.mxu3 %v909_v58  ;;  %1009 = vmatpush.msra.mxu0 %v951_v62  ;;  %v1115_v58 = vunpack.c.h.bf16 %v3896_v1  ;;  %v3917_v62 = vld [vmem:[%s6889_s7 + $0x2f8] sm:$0xff] }
 0x1a1   :  { %1049 = vmatpush.msrb.mxu2 %v952_v23  ;;  %v1157_v47 = vunpack.c.h.bf16 %v3917_v62 }
 0x1a2   :  { %1010 = vmatpush.msra.mxu0 %v949_v59  ;;  %v1107_v59 = vunpack.c.h.bf16 %v3892_v57 }
 0x1a3   :  { %1050 = vmatpush.msrb.mxu2 %v950_v15  ;;  %v3891_v15 = vld [vmem:[%s6889_s7 + $0x228] sm:$0xff] }
 0x1a4   :  { %1011 = vmatpush.msra.mxu0 %v947_v7  ;;  %v1105_v12 = vunpack.c.h.bf16 %v3891_v15 }
 0x1a5   :  { %1051 = vmatpush.msrb.mxu2 %v948_v8  ;;  %v1156_v8 = vunpack.c.l.bf16 %v3917_v62 }
 0x1a6   :  { %1012 = vmatpush.msra.mxu0 %v945_v10  ;;  %v3890_v10 = vld [vmem:[%s6889_s7 + $0x220] sm:$0xff] }
 0x1a7   :  { %1052 = vmatpush.msrb.mxu2 %v946_v32  ;;  %v1104_v32 = vunpack.c.l.bf16 %v3891_v15  ;;  %v3929_v15 = vld [vmem:[%s6889_s7 + $0x358] sm:$0xff] }
 0x1a8   :  { %1013 = vmatpush.msra.mxu0 %v943_v21  ;;  %v3915_v21 = vld [vmem:[%s6889_s7 + $0x2e8] sm:$0xff] }
 0x1a9   :  { %1053 = vmatpush.msrb.mxu2 %v944_v22  ;;  %v1154_v22 = vunpack.c.l.bf16 %v3916_v39 }
 0x1aa   :  { %1014 = vmatpush.msra.mxu0 %v941_v11  ;;  %v1102_v11 = vunpack.c.l.bf16 %v3890_v10 }
 0x1ab   :  { %1054 = vmatpush.msrb.mxu2 %v942_v29  ;;  %v1103_v29 = vunpack.c.h.bf16 %v3890_v10 }
 0x1ca   :  { %v589_v60 = vpop.f32.mrf.mxu1 }
 0x1cb   :  { %v590_v6 = vadd.f32 %v589_v60, %v489_v5 }
 0x1cf   :  { %v520_v25 = vpop.f32.mrf.mxu2 }
 0x1d0   :  { %v521_v27 = vadd.f32 %v520_v25, %v489_v5  ;;  %v3889_v25 = vld [vmem:[%s6889_s7 + $0x218] sm:$0xff]  ;;  %v3914_v5 = vld [vmem:[%s6889_s7 + $0x2e0] sm:$0xff] }
 0x1d1   :  { %v1100_v19 = vunpack.c.l.bf16 %v3889_v25 }
 0x1d7   :  { %v523_v42 = vpop.f32.mrf.mxu2 }
 0x1d8   :  { %v524_v52 = vadd.f32 %v523_v42, %v5328_v31  ;;  %v1101_v42 = vunpack.c.h.bf16 %v3889_v25 }
 0x1da   :  { %v543_v9 = vpop.f32.mrf.mxu3 }
 0x1db   :  { %v544_v17 = vadd.f32 %v543_v9, %v521_v27  ;;  %v1152_v9 = vunpack.c.l.bf16 %v3915_v21  ;;  %v1153_v27 = vunpack.c.h.bf16 %v3915_v21  ;;  %v1299_v21 = vunpack.c.l.bf16 %v3929_v15 }
 0x1de   :  { %v566_v49 = vpop.f32.mrf.mxu0 }
 0x1df   :  { %v567_v48 = vadd.f32 %v566_v49, %v544_v17  ;;  %v3888_v17 = vld [vmem:[%s6889_s7 + $0x210] sm:$0xff]  ;;  %v1150_v49 = vunpack.c.l.bf16 %v3914_v5 }
 0x1e1   :  { %v5331_v30 = vmax.f32 %v567_v48, 0.0  ;;  %v1151_v48 = vunpack.c.h.bf16 %v3914_v5 }
 0x1e2   :  { %v546_v55 = vpop.f32.mrf.mxu3 }
 0x1e3   :  { %v5336_v34 = vadd.f32 %v546_v55, %v524_v52  ;;  %810 = vmatmul.f32.vlgmr.msra.gmra.mxu3 %v5331_v30  ;;  %850 = vmatmul.f32.vlgmr.msrb.gmra.mxu1 %v5331_v30  ;;  %v975_v35 = vrot.slane %v5331_v30, 1  ;;  %v3887_v52 = vld [vmem:[%s6889_s7 + $0x208] sm:$0xff]  ;;  %v1148_v55 = vunpack.c.l.bf16 %v3913_v63  ;;  %v1158_v60 = vrot.slane %v5331_v30, 2 }
 0x1e4   :  { %1162 = vmatpush.msra.mxu3 %v1124_v36  ;;  %1202 = vmatpush.msrb.mxu1 %v1125_v4  ;;  %v1098_v36 = vunpack.c.l.bf16 %v3888_v17  ;;  %v1099_v4 = vunpack.c.h.bf16 %v3888_v17 }
 0x1e6   :  { %1163 = vmatpush.msra.mxu3 %v1122_v53  ;;  %1203 = vmatpush.msrb.mxu1 %v1123_v40  ;;  %v1149_v53 = vunpack.c.h.bf16 %v3913_v63  ;;  %v3886_v40 = vld [vmem:[%s6889_s7 + $0x200] sm:$0xff]  ;;  %v3903_v63 = vld [vmem:[%s6889_s7 + $0x288] sm:$0xff] }
 0x1e7   :  { %v1094_v1 = vunpack.c.l.bf16 %v3886_v40 }
 0x1e8   :  { %1164 = vmatpush.msra.mxu3 %v1120_v54  ;;  %1204 = vmatpush.msrb.mxu1 %v1121_v0  ;;  %v1096_v54 = vunpack.c.l.bf16 %v3887_v52  ;;  %v1097_v0 = vunpack.c.h.bf16 %v3887_v52  ;;  %v3925_v52 = vld [vmem:[%s6889_s7 + $0x338] sm:$0xff] }
 0x1ea   :  { %1165 = vmatpush.msra.mxu3 %v1118_v26  ;;  %1205 = vmatpush.msrb.mxu1 %v1119_v41  ;;  %v635_v45 = vpop.f32.mrf.mxu3  ;;  %v1146_v26 = vunpack.c.l.bf16 %v3912_v46  ;;  %v1147_v41 = vunpack.c.h.bf16 %v3912_v46 }
 0x1eb   :  { %995 = vmatmul.f32.vlgmr.msrb.gmra.mxu3 %v975_v35  ;;  %1035 = vmatmul.f32.vlgmr.msra.gmra.mxu1 %v975_v35  ;;  %v1144_v35 = vunpack.c.l.bf16 %v3911_v14 }
 0x1ec   :  { %1166 = vmatpush.msra.mxu3 %v1116_v56  ;;  %1206 = vmatpush.msrb.mxu1 %v1117_v43  ;;  %v1095_v56 = vunpack.c.h.bf16 %v3886_v40  ;;  %v3933_v43 = vld [vmem:[%s6889_s7 + $0x378] sm:$0xff]  ;;  %v1128_v40 = vunpack.c.l.bf16 %v3903_v63 }
 0x1ed   :  { %v1307_v61 = vunpack.c.l.bf16 %v3933_v43 }
 0x1ee   :  { %1167 = vmatpush.msra.mxu3 %v1114_v18  ;;  %1207 = vmatpush.msrb.mxu1 %v1115_v58  ;;  %v1145_v18 = vunpack.c.h.bf16 %v3911_v14  ;;  %v3932_v58 = vld [vmem:[%s6889_s7 + $0x370] sm:$0xff]  ;;  %v1292_v14 = vunpack.c.h.bf16 %v3925_v52 }
 0x1ef   :  { %v612_v37 = vpop.f32.mrf.mxu2 }
 0x1f0   :  { %v613_v38 = vadd.f32 %v612_v37, %v590_v6  ;;  %1168 = vmatpush.msra.mxu3 %v1112_v44  ;;  %1208 = vmatpush.msrb.mxu1 %v1113_v50  ;;  %v1308_v44 = vunpack.c.h.bf16 %v3933_v43  ;;  %v3909_v50 = vld [vmem:[%s6889_s7 + $0x2b8] sm:$0xff]  ;;  %v1143_v6 = vunpack.c.h.bf16 %v3910_v16  ;;  %v1306_v37 = vunpack.c.h.bf16 %v3932_v58  ;;  %v3948_v16 = vld [vmem:[%s6889_s7 + $0x3f0] sm:$0xff] }
 0x1f1   :  { %v1140_v57 = vunpack.c.l.bf16 %v3909_v50 }
 0x1f2   :  { %v636_v23 = vadd.f32 %v635_v45, %v613_v38  ;;  %1169 = vmatpush.msra.mxu3 %v1110_v13  ;;  %1209 = vmatpush.msrb.mxu1 %v1111_v20  ;;  %v3931_v13 = vld [vmem:[%s6889_s7 + $0x368] sm:$0xff]  ;;  %v1305_v20 = vunpack.c.l.bf16 %v3932_v58  ;;  %v3908_v45 = vld [vmem:[%s6889_s7 + $0x2b0] sm:$0xff]  ;;  %v1141_v38 = vunpack.c.h.bf16 %v3909_v50 }
 0x1f3   :  { %v1304_v62 = vunpack.c.h.bf16 %v3931_v13 }
 0x1f4   :  { %v5371_v7 = vmax.f32 %v636_v23, 0.0  ;;  %1170 = vmatpush.msra.mxu3 %v1108_v2  ;;  %1210 = vmatpush.msrb.mxu1 %v1109_v3  ;;  %v3930_v2 = vld [vmem:[%s6889_s7 + $0x360] sm:$0xff]  ;;  %v1303_v3 = vunpack.c.l.bf16 %v3931_v13  ;;  %v3907_v23 = vld [vmem:[%s6889_s7 + $0x2a8] sm:$0xff]  ;;  %v1338_v13 = vunpack.c.h.bf16 %v3948_v16 }
 0x1f5   :  { %v1301_v39 = vunpack.c.l.bf16 %v3930_v2  ;;  %v1136_v10 = vunpack.c.l.bf16 %v3907_v23 }
 0x1f6   :  { %1171 = vmatpush.msra.mxu3 %v1106_v28  ;;  %1211 = vmatpush.msrb.mxu1 %v1107_v59  ;;  %v976_v33 = vrot.slane %v5371_v7, 1  ;;  %v1138_v28 = vunpack.c.l.bf16 %v3908_v45  ;;  %v1139_v59 = vunpack.c.h.bf16 %v3908_v45 }
 0x1f7   :  { %830 = vmatmul.f32.vlgmr.msrb.gmra.mxu0 %v5371_v7  ;;  %870 = vmatmul.f32.vlgmr.msra.gmra.mxu2 %v5371_v7 }
 0x1f8   :  { %1182 = vmatpush.msrb.mxu0 %v1156_v8  ;;  %1222 = vmatpush.msra.mxu2 %v1157_v47  ;;  %v1302_v8 = vunpack.c.h.bf16 %v3930_v2  ;;  %v3906_v47 = vld [vmem:[%s6889_s7 + $0x2a0] sm:$0xff] }
 0x1f9   :  { %1172 = vmatpush.msra.mxu3 %v1104_v32  ;;  %1212 = vmatpush.msrb.mxu1 %v1105_v12  ;;  %v1137_v32 = vunpack.c.h.bf16 %v3907_v23  ;;  %v3928_v12 = vld [vmem:[%s6889_s7 + $0x350] sm:$0xff]  ;;  %v1134_v25 = vunpack.c.l.bf16 %v3906_v47 }
 0x1fa   :  { %1183 = vmatpush.msrb.mxu0 %v1154_v22  ;;  %1223 = vmatpush.msra.mxu2 %v1155_v24  ;;  %v1300_v22 = vunpack.c.h.bf16 %v3929_v15  ;;  %v3905_v24 = vld [vmem:[%s6889_s7 + $0x298] sm:$0xff]  ;;  %v1297_v5 = vunpack.c.l.bf16 %v3928_v12 }
 0x1fb   :  { %1173 = vmatpush.msra.mxu3 %v1102_v11  ;;  %1213 = vmatpush.msrb.mxu1 %v1103_v29  ;;  %v1135_v11 = vunpack.c.h.bf16 %v3906_v47  ;;  %v3927_v29 = vld [vmem:[%s6889_s7 + $0x348] sm:$0xff]  ;;  %v1132_v17 = vunpack.c.l.bf16 %v3905_v24 }
 0x1fc   :  { %1184 = vmatpush.msrb.mxu0 %v1152_v9  ;;  %1224 = vmatpush.msra.mxu2 %v1153_v27  ;;  %v1298_v9 = vunpack.c.h.bf16 %v3928_v12  ;;  %v3904_v27 = vld [vmem:[%s6889_s7 + $0x290] sm:$0xff] }
 0x1fd   :  { %1174 = vmatpush.msra.mxu3 %v1100_v19  ;;  %1214 = vmatpush.msrb.mxu1 %v1101_v42  ;;  %v1133_v19 = vunpack.c.h.bf16 %v3905_v24  ;;  %v3926_v42 = vld [vmem:[%s6889_s7 + $0x340] sm:$0xff] }
 0x1fe   :  { %1185 = vmatpush.msrb.mxu0 %v1150_v49  ;;  %1225 = vmatpush.msra.mxu2 %v1151_v48  ;;  %v1295_v49 = vunpack.c.l.bf16 %v3927_v29  ;;  %v1296_v48 = vunpack.c.h.bf16 %v3927_v29  ;;  %v1293_v46 = vunpack.c.l.bf16 %v3926_v42 }
 0x1ff   :  { %1175 = vmatpush.msra.mxu3 %v1098_v36  ;;  %1215 = vmatpush.msrb.mxu1 %v1099_v4  ;;  %v1130_v36 = vunpack.c.l.bf16 %v3904_v27  ;;  %v1131_v4 = vunpack.c.h.bf16 %v3904_v27  ;;  %v3965_v27 = vld [vmem:[%s6889_s7 + $0x478] sm:$0xff] }
 0x200   :  { %1015 = vmatmul.f32.vlgmr.msra.gmra.mxu0 %v976_v33  ;;  %1055 = vmatmul.f32.vlgmr.msrb.gmra.mxu2 %v976_v33  ;;  %v1129_v33 = vunpack.c.h.bf16 %v3903_v63  ;;  %v1490_v63 = vunpack.c.l.bf16 %v3965_v27 }
 0x201   :  { %1186 = vmatpush.msrb.mxu0 %v1148_v55  ;;  %1226 = vmatpush.msra.mxu2 %v1149_v53  ;;  %v1294_v55 = vunpack.c.h.bf16 %v3926_v42  ;;  %v3902_v53 = vld [vmem:[%s6889_s7 + $0x280] sm:$0xff] }
 0x202   :  { %1176 = vmatpush.msra.mxu3 %v1096_v54  ;;  %1216 = vmatpush.msrb.mxu1 %v1097_v0  ;;  %v3924_v54 = vld [vmem:[%s6889_s7 + $0x330] sm:$0xff]  ;;  %v1291_v0 = vunpack.c.l.bf16 %v3925_v52 }
 0x203   :  { %1187 = vmatpush.msrb.mxu0 %v1146_v26  ;;  %1227 = vmatpush.msra.mxu2 %v1147_v41  ;;  %v1126_v26 = vunpack.c.l.bf16 %v3902_v53  ;;  %v1127_v41 = vunpack.c.h.bf16 %v3902_v53  ;;  %v1290_v43 = vunpack.c.h.bf16 %v3924_v54 }
 0x204   :  { %1177 = vmatpush.msra.mxu3 %v1094_v1  ;;  %1217 = vmatpush.msrb.mxu1 %v1095_v56  ;;  %v3949_v1 = vld [vmem:[%s6889_s7 + $0x3f8] sm:$0xff]  ;;  %v1289_v56 = vunpack.c.l.bf16 %v3924_v54 }
 0x205   :  { %1178 = vmatmul.f32.vlgmr.msra.gmra.mxu3 %v1158_v60  ;;  %1188 = vmatpush.msrb.mxu0 %v1144_v35  ;;  %v3923_v35 = vld [vmem:[%s6889_s7 + $0x328] sm:$0xff]  ;;  %v1340_v58 = vunpack.c.h.bf16 %v3949_v1 }
 0x206   :  { %1218 = vmatmul.f32.vlgmr.msrb.gmra.mxu1 %v1158_v60  ;;  %1228 = vmatpush.msra.mxu2 %v1145_v18  ;;  %v1339_v18 = vunpack.c.l.bf16 %v3949_v1  ;;  %v3922_v60 = vld [vmem:[%s6889_s7 + $0x320] sm:$0xff]  ;;  %v1288_v50 = vunpack.c.h.bf16 %v3923_v35  ;;  %v3939_v1 = vld [vmem:[%s6889_s7 + $0x3a8] sm:$0xff] }
 0x207   :  { %1345 = vmatpush.msrb.mxu3 %v1307_v61  ;;  %1385 = vmatpush.msra.mxu1 %v1308_v44  ;;  %v1159_v61 = vrot.slane %v5371_v7, 2  ;;  %v1287_v44 = vunpack.c.l.bf16 %v3923_v35  ;;  %v1286_v45 = vunpack.c.h.bf16 %v3922_v60  ;;  %v3961_v35 = vld [vmem:[%s6889_s7 + $0x458] sm:$0xff] }
 0x208   :  { %1189 = vmatpush.msrb.mxu0 %v1142_v51  ;;  %1229 = vmatpush.msra.mxu2 %v1143_v6  ;;  %v3947_v51 = vld [vmem:[%s6889_s7 + $0x3e8] sm:$0xff]  ;;  %v1337_v6 = vunpack.c.l.bf16 %v3948_v16 }
 0x209   :  { %1346 = vmatpush.msrb.mxu3 %v1305_v20  ;;  %1386 = vmatpush.msra.mxu1 %v1306_v37  ;;  %v3921_v20 = vld [vmem:[%s6889_s7 + $0x318] sm:$0xff]  ;;  %v1285_v37 = vunpack.c.l.bf16 %v3922_v60  ;;  %v1336_v2 = vunpack.c.h.bf16 %v3947_v51  ;;  %v1319_v60 = vunpack.c.l.bf16 %v3939_v1 }
 0x20a   :  { %1190 = vmatpush.msrb.mxu0 %v1140_v57  ;;  %1230 = vmatpush.msra.mxu2 %v1141_v38  ;;  %v3946_v57 = vld [vmem:[%s6889_s7 + $0x3e0] sm:$0xff]  ;;  %v1335_v38 = vunpack.c.l.bf16 %v3947_v51  ;;  %v1284_v23 = vunpack.c.h.bf16 %v3921_v20  ;;  %v1483_v51 = vunpack.c.h.bf16 %v3961_v35 }
 0x20b   :  { %1347 = vmatpush.msrb.mxu3 %v1303_v3  ;;  %1387 = vmatpush.msra.mxu1 %v1304_v62  ;;  %v3920_v3 = vld [vmem:[%s6889_s7 + $0x310] sm:$0xff]  ;;  %v1283_v62 = vunpack.c.l.bf16 %v3921_v20  ;;  %v1334_v15 = vunpack.c.h.bf16 %v3946_v57 }
 0x20c   :  { %1191 = vmatpush.msrb.mxu0 %v1138_v28  ;;  %1231 = vmatpush.msra.mxu2 %v1139_v59  ;;  %v3945_v28 = vld [vmem:[%s6889_s7 + $0x3d8] sm:$0xff]  ;;  %v1333_v59 = vunpack.c.l.bf16 %v3946_v57  ;;  %v1282_v47 = vunpack.c.h.bf16 %v3920_v3 }
 0x20d   :  { %1348 = vmatpush.msrb.mxu3 %v1301_v39  ;;  %1388 = vmatpush.msra.mxu1 %v1302_v8  ;;  %v3919_v39 = vld [vmem:[%s6889_s7 + $0x308] sm:$0xff]  ;;  %v1281_v8 = vunpack.c.l.bf16 %v3920_v3  ;;  %v1332_v12 = vunpack.c.h.bf16 %v3945_v28 }
 0x20e   :  { %1192 = vmatpush.msrb.mxu0 %v1136_v10  ;;  %1232 = vmatpush.msra.mxu2 %v1137_v32  ;;  %v3944_v10 = vld [vmem:[%s6889_s7 + $0x3d0] sm:$0xff]  ;;  %v1331_v32 = vunpack.c.l.bf16 %v3945_v28  ;;  %v1280_v24 = vunpack.c.h.bf16 %v3919_v39 }
 0x20f   :  { %1349 = vmatpush.msrb.mxu3 %v1299_v21  ;;  %1389 = vmatpush.msra.mxu1 %v1300_v22  ;;  %v3918_v21 = vld [vmem:[%s6889_s7 + $0x300] sm:$0xff]  ;;  %v1279_v22 = vunpack.c.l.bf16 %v3919_v39  ;;  %v1330_v29 = vunpack.c.h.bf16 %v3944_v10 }
 0x210   :  { %1193 = vmatpush.msrb.mxu0 %v1134_v25  ;;  %1233 = vmatpush.msra.mxu2 %v1135_v11  ;;  %v3943_v25 = vld [vmem:[%s6889_s7 + $0x3c8] sm:$0xff]  ;;  %v1329_v11 = vunpack.c.l.bf16 %v3944_v10 }
 0x211   :  { %1350 = vmatpush.msrb.mxu3 %v1297_v5  ;;  %1390 = vmatpush.msra.mxu1 %v1298_v9  ;;  %v1277_v5 = vunpack.c.l.bf16 %v3918_v21  ;;  %v1278_v9 = vunpack.c.h.bf16 %v3918_v21  ;;  %v1328_v42 = vunpack.c.h.bf16 %v3943_v25 }
 0x212   :  { %1194 = vmatpush.msrb.mxu0 %v1132_v17  ;;  %1234 = vmatpush.msra.mxu2 %v1133_v19  ;;  %v1327_v17 = vunpack.c.l.bf16 %v3943_v25  ;;  %v3942_v19 = vld [vmem:[%s6889_s7 + $0x3c0] sm:$0xff] }
 0x213   :  { %1351 = vmatpush.msrb.mxu3 %v1295_v49  ;;  %1391 = vmatpush.msra.mxu1 %v1296_v48  ;;  %v3964_v49 = vld [vmem:[%s6889_s7 + $0x470] sm:$0xff]  ;;  %v1341_v48 = vrot.slane %v5331_v30, 3  ;;  %v1325_v52 = vunpack.c.l.bf16 %v3942_v19 }
 0x214   :  { %1195 = vmatpush.msrb.mxu0 %v1130_v36  ;;  %1235 = vmatpush.msra.mxu2 %v1131_v4  ;;  %v1491_v36 = vunpack.c.h.bf16 %v3965_v27  ;;  %v3941_v4 = vld [vmem:[%s6889_s7 + $0x3b8] sm:$0xff]  ;;  %v1488_v53 = vunpack.c.l.bf16 %v3964_v49 }
 0x215   :  { %1352 = vmatpush.msrb.mxu3 %v1293_v46  ;;  %1392 = vmatpush.msra.mxu1 %v1294_v55  ;;  %v1326_v46 = vunpack.c.h.bf16 %v3942_v19  ;;  %v3963_v55 = vld [vmem:[%s6889_s7 + $0x468] sm:$0xff]  ;;  %v1323_v54 = vunpack.c.l.bf16 %v3941_v4  ;;  %v3980_v19 = vld [vmem:[%s6889_s7 + $0x4f0] sm:$0xff] }
 0x216   :  { %1196 = vmatpush.msrb.mxu0 %v1128_v40  ;;  %1236 = vmatpush.msra.mxu2 %v1129_v33  ;;  %v1489_v40 = vunpack.c.h.bf16 %v3964_v49  ;;  %v3940_v33 = vld [vmem:[%s6889_s7 + $0x3b0] sm:$0xff] }
 0x217   :  { %1353 = vmatpush.msrb.mxu3 %v1291_v0  ;;  %1393 = vmatpush.msra.mxu1 %v1292_v14  ;;  %v1324_v0 = vunpack.c.h.bf16 %v3941_v4  ;;  %v3962_v14 = vld [vmem:[%s6889_s7 + $0x460] sm:$0xff] }
 0x218   :  { %1197 = vmatpush.msrb.mxu0 %v1126_v26  ;;  %1237 = vmatpush.msra.mxu2 %v1127_v41  ;;  %v1486_v26 = vunpack.c.l.bf16 %v3963_v55  ;;  %v1487_v41 = vunpack.c.h.bf16 %v3963_v55  ;;  %v1484_v16 = vunpack.c.l.bf16 %v3962_v14  ;;  %v1521_v55 = vunpack.c.h.bf16 %v3980_v19 }
 0x219   :  { %1354 = vmatpush.msrb.mxu3 %v1289_v56  ;;  %1394 = vmatpush.msra.mxu1 %v1290_v43  ;;  %v1321_v56 = vunpack.c.l.bf16 %v3940_v33  ;;  %v1322_v43 = vunpack.c.h.bf16 %v3940_v33 }
 0x21a   :  { %1198 = vmatmul.f32.vlgmr.msrb.gmra.mxu0 %v1159_v61  ;;  %1238 = vmatmul.f32.vlgmr.msra.gmra.mxu2 %v1159_v61  ;;  %v1320_v61 = vunpack.c.h.bf16 %v3939_v1 }
 0x21b   :  { %1365 = vmatpush.msra.mxu0 %v1339_v18  ;;  %1405 = vmatpush.msrb.mxu2 %v1340_v58  ;;  %v1485_v18 = vunpack.c.h.bf16 %v3962_v14  ;;  %v3938_v58 = vld [vmem:[%s6889_s7 + $0x3a0] sm:$0xff] }
 0x21c   :  { %1355 = vmatpush.msrb.mxu3 %v1287_v44  ;;  %1395 = vmatpush.msra.mxu1 %v1288_v50  ;;  %v3960_v44 = vld [vmem:[%s6889_s7 + $0x450] sm:$0xff]  ;;  %v1482_v50 = vunpack.c.l.bf16 %v3961_v35  ;;  %v1318_v20 = vunpack.c.h.bf16 %v3938_v58 }
 0x21d   :  { %1366 = vmatpush.msra.mxu0 %v1337_v6  ;;  %1406 = vmatpush.msrb.mxu2 %v1338_v13  ;;  %v3937_v6 = vld [vmem:[%s6889_s7 + $0x398] sm:$0xff]  ;;  %v1317_v13 = vunpack.c.l.bf16 %v3938_v58  ;;  %v1481_v57 = vunpack.c.h.bf16 %v3960_v44 }
 0x21e   :  { %1356 = vmatpush.msrb.mxu3 %v1285_v37  ;;  %1396 = vmatpush.msra.mxu1 %v1286_v45  ;;  %v3959_v37 = vld [vmem:[%s6889_s7 + $0x448] sm:$0xff]  ;;  %v1480_v45 = vunpack.c.l.bf16 %v3960_v44  ;;  %v1316_v3 = vunpack.c.h.bf16 %v3937_v6 }
 0x21f   :  { %1367 = vmatpush.msra.mxu0 %v1335_v38  ;;  %1407 = vmatpush.msrb.mxu2 %v1336_v2  ;;  %v3936_v38 = vld [vmem:[%s6889_s7 + $0x390] sm:$0xff]  ;;  %v1315_v2 = vunpack.c.l.bf16 %v3937_v6  ;;  %v1479_v28 = vunpack.c.h.bf16 %v3959_v37 }
 0x220   :  { %1357 = vmatpush.msrb.mxu3 %v1283_v62  ;;  %1397 = vmatpush.msra.mxu1 %v1284_v23  ;;  %v3958_v62 = vld [vmem:[%s6889_s7 + $0x440] sm:$0xff]  ;;  %v1478_v23 = vunpack.c.l.bf16 %v3959_v37  ;;  %v1314_v39 = vunpack.c.h.bf16 %v3936_v38 }
 0x221   :  { %1368 = vmatpush.msra.mxu0 %v1333_v59  ;;  %1408 = vmatpush.msrb.mxu2 %v1334_v15  ;;  %v3935_v59 = vld [vmem:[%s6889_s7 + $0x388] sm:$0xff]  ;;  %v1313_v15 = vunpack.c.l.bf16 %v3936_v38  ;;  %v1477_v10 = vunpack.c.h.bf16 %v3958_v62  ;;  %v3997_v38 = vld [vmem:[%s6889_s7 + $0x578] sm:$0xff] }
 0x222   :  { %1358 = vmatpush.msrb.mxu3 %v1281_v8  ;;  %1398 = vmatpush.msra.mxu1 %v1282_v47  ;;  %v3957_v8 = vld [vmem:[%s6889_s7 + $0x438] sm:$0xff]  ;;  %v1476_v47 = vunpack.c.l.bf16 %v3958_v62  ;;  %v1312_v21 = vunpack.c.h.bf16 %v3935_v59 }
 0x223   :  { %1369 = vmatpush.msra.mxu0 %v1331_v32  ;;  %1409 = vmatpush.msrb.mxu2 %v1332_v12  ;;  %v3934_v32 = vld [vmem:[%s6889_s7 + $0x380] sm:$0xff]  ;;  %v1311_v12 = vunpack.c.l.bf16 %v3935_v59  ;;  %v1475_v25 = vunpack.c.h.bf16 %v3957_v8  ;;  %v1673_v59 = vunpack.c.l.bf16 %v3997_v38 }
 0x224   :  { %1359 = vmatpush.msrb.mxu3 %v1279_v22  ;;  %1399 = vmatpush.msra.mxu1 %v1280_v24  ;;  %v3956_v22 = vld [vmem:[%s6889_s7 + $0x430] sm:$0xff]  ;;  %v1474_v24 = vunpack.c.l.bf16 %v3957_v8 }
 0x225   :  { %1370 = vmatpush.msra.mxu0 %v1329_v11  ;;  %1410 = vmatpush.msrb.mxu2 %v1330_v29  ;;  %v1309_v11 = vunpack.c.l.bf16 %v3934_v32  ;;  %v1310_v29 = vunpack.c.h.bf16 %v3934_v32  ;;  %v1473_v27 = vunpack.c.h.bf16 %v3956_v22 }
 0x226   :  { %1360 = vmatpush.msrb.mxu3 %v1277_v5  ;;  %1400 = vmatpush.msra.mxu1 %v1278_v9  ;;  %v3981_v5 = vld [vmem:[%s6889_s7 + $0x4f8] sm:$0xff]  ;;  %v1472_v9 = vunpack.c.l.bf16 %v3956_v22 }
 0x227   :  { %1361 = vmatmul.f32.vlgmr.msrb.gmra.mxu3 %v1341_v48  ;;  %1371 = vmatpush.msra.mxu0 %v1327_v17  ;;  %v3955_v17 = vld [vmem:[%s6889_s7 + $0x428] sm:$0xff]  ;;  %v1523_v49 = vunpack.c.h.bf16 %v3981_v5 }
 0x228   :  { %1401 = vmatmul.f32.vlgmr.msra.gmra.mxu1 %v1341_v48  ;;  %1411 = vmatpush.msrb.mxu2 %v1328_v42  ;;  %v1522_v42 = vunpack.c.l.bf16 %v3981_v5  ;;  %v3954_v48 = vld [vmem:[%s6889_s7 + $0x420] sm:$0xff]  ;;  %v1471_v4 = vunpack.c.h.bf16 %v3955_v17  ;;  %v3971_v5 = vld [vmem:[%s6889_s7 + $0x4a8] sm:$0xff] }
 0x229   :  { %1528 = vmatpush.msra.mxu3 %v1490_v63  ;;  %1568 = vmatpush.msrb.mxu1 %v1491_v36  ;;  %v1342_v63 = vrot.slane %v5371_v7, 3  ;;  %v1470_v36 = vunpack.c.l.bf16 %v3955_v17  ;;  %v1469_v33 = vunpack.c.h.bf16 %v3954_v48  ;;  %v3993_v17 = vld [vmem:[%s6889_s7 + $0x558] sm:$0xff] }
 0x22a   :  { %1372 = vmatpush.msra.mxu0 %v1325_v52  ;;  %1412 = vmatpush.msrb.mxu2 %v1326_v46  ;;  %v3979_v52 = vld [vmem:[%s6889_s7 + $0x4e8] sm:$0xff]  ;;  %v1520_v46 = vunpack.c.l.bf16 %v3980_v19 }
 0x22b   :  { %1529 = vmatpush.msra.mxu3 %v1488_v53  ;;  %1569 = vmatpush.msrb.mxu1 %v1489_v40  ;;  %v3953_v53 = vld [vmem:[%s6889_s7 + $0x418] sm:$0xff]  ;;  %v1468_v40 = vunpack.c.l.bf16 %v3954_v48  ;;  %v1519_v14 = vunpack.c.h.bf16 %v3979_v52  ;;  %v1502_v48 = vunpack.c.l.bf16 %v3971_v5 }
 0x22c   :  { %1373 = vmatpush.msra.mxu0 %v1323_v54  ;;  %1413 = vmatpush.msrb.mxu2 %v1324_v0  ;;  %v3978_v54 = vld [vmem:[%s6889_s7 + $0x4e0] sm:$0xff]  ;;  %v1518_v0 = vunpack.c.l.bf16 %v3979_v52  ;;  %v1467_v1 = vunpack.c.h.bf16 %v3953_v53  ;;  %v1666_v52 = vunpack.c.h.bf16 %v3993_v17 }
 0x22d   :  { %1530 = vmatpush.msra.mxu3 %v1486_v26  ;;  %1570 = vmatpush.msrb.mxu1 %v1487_v41  ;;  %v3952_v26 = vld [vmem:[%s6889_s7 + $0x410] sm:$0xff]  ;;  %v1466_v41 = vunpack.c.l.bf16 %v3953_v53  ;;  %v1517_v35 = vunpack.c.h.bf16 %v3978_v54 }
 0x22e   :  { %1374 = vmatpush.msra.mxu0 %v1321_v56  ;;  %1414 = vmatpush.msrb.mxu2 %v1322_v43  ;;  %v3977_v56 = vld [vmem:[%s6889_s7 + $0x4d8] sm:$0xff]  ;;  %v1516_v43 = vunpack.c.l.bf16 %v3978_v54  ;;  %v1465_v58 = vunpack.c.h.bf16 %v3952_v26 }
 0x22f   :  { %1531 = vmatpush.msra.mxu3 %v1484_v16  ;;  %1571 = vmatpush.msrb.mxu1 %v1485_v18  ;;  %v3951_v16 = vld [vmem:[%s6889_s7 + $0x408] sm:$0xff]  ;;  %v1464_v18 = vunpack.c.l.bf16 %v3952_v26  ;;  %v1515_v44 = vunpack.c.h.bf16 %v3977_v56 }
 0x230   :  { %1375 = vmatpush.msra.mxu0 %v1319_v60  ;;  %1415 = vmatpush.msrb.mxu2 %v1320_v61  ;;  %v3976_v60 = vld [vmem:[%s6889_s7 + $0x4d0] sm:$0xff]  ;;  %v1514_v61 = vunpack.c.l.bf16 %v3977_v56  ;;  %v1463_v6 = vunpack.c.h.bf16 %v3951_v16 }
 0x231   :  { %1532 = vmatpush.msra.mxu3 %v1482_v50  ;;  %1572 = vmatpush.msrb.mxu1 %v1483_v51  ;;  %v3950_v50 = vld [vmem:[%s6889_s7 + $0x400] sm:$0xff]  ;;  %v1462_v51 = vunpack.c.l.bf16 %v3951_v16  ;;  %v1513_v37 = vunpack.c.h.bf16 %v3976_v60 }
 0x232   :  { %1376 = vmatpush.msra.mxu0 %v1317_v13  ;;  %1416 = vmatpush.msrb.mxu2 %v1318_v20  ;;  %v3975_v13 = vld [vmem:[%s6889_s7 + $0x4c8] sm:$0xff]  ;;  %v1512_v20 = vunpack.c.l.bf16 %v3976_v60 }
 0x233   :  { %1533 = vmatpush.msra.mxu3 %v1480_v45  ;;  %1573 = vmatpush.msrb.mxu1 %v1481_v57  ;;  %v1460_v45 = vunpack.c.l.bf16 %v3950_v50  ;;  %v1461_v57 = vunpack.c.h.bf16 %v3950_v50  ;;  %v1511_v62 = vunpack.c.h.bf16 %v3975_v13 }
 0x234   :  { %1377 = vmatpush.msra.mxu0 %v1315_v2  ;;  %1417 = vmatpush.msrb.mxu2 %v1316_v3  ;;  %v1510_v2 = vunpack.c.l.bf16 %v3975_v13  ;;  %v3974_v3 = vld [vmem:[%s6889_s7 + $0x4c0] sm:$0xff] }
 0x235   :  { %1534 = vmatpush.msra.mxu3 %v1478_v23  ;;  %1574 = vmatpush.msrb.mxu1 %v1479_v28  ;;  %v3996_v23 = vld [vmem:[%s6889_s7 + $0x570] sm:$0xff]  ;;  %v1524_v28 = vrot.slane %v5331_v30, 4  ;;  %v1508_v8 = vunpack.c.l.bf16 %v3974_v3 }
 0x236   :  { %1378 = vmatpush.msra.mxu0 %v1313_v15  ;;  %1418 = vmatpush.msrb.mxu2 %v1314_v39  ;;  %v1674_v15 = vunpack.c.h.bf16 %v3997_v38  ;;  %v3973_v39 = vld [vmem:[%s6889_s7 + $0x4b8] sm:$0xff]  ;;  %v1671_v32 = vunpack.c.l.bf16 %v3996_v23 }
 0x237   :  { %1535 = vmatpush.msra.mxu3 %v1476_v47  ;;  %1575 = vmatpush.msrb.mxu1 %v1477_v10  ;;  %v1509_v47 = vunpack.c.h.bf16 %v3974_v3  ;;  %v3995_v10 = vld [vmem:[%s6889_s7 + $0x568] sm:$0xff]  ;;  %v1506_v22 = vunpack.c.l.bf16 %v3973_v39  ;;  %v4012_v3 = vld [vmem:[%s6889_s7 + $0x5f0] sm:$0xff] }
 0x238   :  { %1379 = vmatpush.msra.mxu0 %v1311_v12  ;;  %1419 = vmatpush.msrb.mxu2 %v1312_v21  ;;  %v1672_v12 = vunpack.c.h.bf16 %v3996_v23  ;;  %v3972_v21 = vld [vmem:[%s6889_s7 + $0x4b0] sm:$0xff] }
 0x239   :  { %1536 = vmatpush.msra.mxu3 %v1474_v24  ;;  %1576 = vmatpush.msrb.mxu1 %v1475_v25  ;;  %v1507_v24 = vunpack.c.h.bf16 %v3973_v39  ;;  %v3994_v25 = vld [vmem:[%s6889_s7 + $0x560] sm:$0xff] }
 0x23a   :  { %1380 = vmatpush.msra.mxu0 %v1309_v11  ;;  %1420 = vmatpush.msrb.mxu2 %v1310_v29  ;;  %v1669_v11 = vunpack.c.l.bf16 %v3995_v10  ;;  %v1670_v29 = vunpack.c.h.bf16 %v3995_v10  ;;  %v1667_v19 = vunpack.c.l.bf16 %v3994_v25  ;;  %v1704_v10 = vunpack.c.h.bf16 %v4012_v3 }
 0x23b   :  { %1537 = vmatpush.msra.mxu3 %v1472_v9  ;;  %1577 = vmatpush.msrb.mxu1 %v1473_v27  ;;  %v1504_v9 = vunpack.c.l.bf16 %v3972_v21  ;;  %v1505_v27 = vunpack.c.h.bf16 %v3972_v21 }
 0x23c   :  { %1381 = vmatmul.f32.vlgmr.msra.gmra.mxu0 %v1342_v63  ;;  %1421 = vmatmul.f32.vlgmr.msrb.gmra.mxu2 %v1342_v63  ;;  %v1503_v63 = vunpack.c.h.bf16 %v3971_v5 }
 0x23d   :  { %1548 = vmatpush.msrb.mxu0 %v1522_v42  ;;  %1588 = vmatpush.msra.mxu2 %v1523_v49  ;;  %v1668_v42 = vunpack.c.h.bf16 %v3994_v25  ;;  %v3970_v49 = vld [vmem:[%s6889_s7 + $0x4a0] sm:$0xff] }
 0x23e   :  { %1538 = vmatpush.msra.mxu3 %v1470_v36  ;;  %1578 = vmatpush.msrb.mxu1 %v1471_v4  ;;  %v3992_v36 = vld [vmem:[%s6889_s7 + $0x550] sm:$0xff]  ;;  %v1665_v4 = vunpack.c.l.bf16 %v3993_v17  ;;  %v1501_v53 = vunpack.c.h.bf16 %v3970_v49 }
 0x23f   :  { %1549 = vmatpush.msrb.mxu0 %v1520_v46  ;;  %1589 = vmatpush.msra.mxu2 %v1521_v55  ;;  %v3969_v46 = vld [vmem:[%s6889_s7 + $0x498] sm:$0xff]  ;;  %v1500_v55 = vunpack.c.l.bf16 %v3970_v49  ;;  %v1664_v54 = vunpack.c.h.bf16 %v3992_v36 }
 0x240   :  { %1539 = vmatpush.msra.mxu3 %v1468_v40  ;;  %1579 = vmatpush.msrb.mxu1 %v1469_v33  ;;  %v3991_v40 = vld [vmem:[%s6889_s7 + $0x548] sm:$0xff]  ;;  %v1663_v33 = vunpack.c.l.bf16 %v3992_v36  ;;  %v1499_v26 = vunpack.c.h.bf16 %v3969_v46 }
 0x241   :  { %1550 = vmatpush.msrb.mxu0 %v1518_v0  ;;  %1590 = vmatpush.msra.mxu2 %v1519_v14  ;;  %v3968_v0 = vld [vmem:[%s6889_s7 + $0x490] sm:$0xff]  ;;  %v1498_v14 = vunpack.c.l.bf16 %v3969_v46  ;;  %v1662_v56 = vunpack.c.h.bf16 %v3991_v40 }
 0x242   :  { %1540 = vmatpush.msra.mxu3 %v1466_v41  ;;  %1580 = vmatpush.msrb.mxu1 %v1467_v1  ;;  %v3990_v41 = vld [vmem:[%s6889_s7 + $0x540] sm:$0xff]  ;;  %v1661_v1 = vunpack.c.l.bf16 %v3991_v40  ;;  %v1497_v16 = vunpack.c.h.bf16 %v3968_v0 }
 0x243   :  { %1551 = vmatpush.msrb.mxu0 %v1516_v43  ;;  %1591 = vmatpush.msra.mxu2 %v1517_v35  ;;  %v3967_v43 = vld [vmem:[%s6889_s7 + $0x488] sm:$0xff]  ;;  %v1496_v35 = vunpack.c.l.bf16 %v3968_v0  ;;  %v1660_v60 = vunpack.c.h.bf16 %v3990_v41 }
 0x244   :  { %1541 = vmatpush.msra.mxu3 %v1464_v18  ;;  %1581 = vmatpush.msrb.mxu1 %v1465_v58  ;;  %v3989_v18 = vld [vmem:[%s6889_s7 + $0x538] sm:$0xff]  ;;  %v1659_v58 = vunpack.c.l.bf16 %v3990_v41  ;;  %v1495_v50 = vunpack.c.h.bf16 %v3967_v43 }
 0x245   :  { %1552 = vmatpush.msrb.mxu0 %v1514_v61  ;;  %1592 = vmatpush.msra.mxu2 %v1515_v44  ;;  %v3966_v61 = vld [vmem:[%s6889_s7 + $0x480] sm:$0xff]  ;;  %v1494_v44 = vunpack.c.l.bf16 %v3967_v43  ;;  %v1658_v13 = vunpack.c.h.bf16 %v3989_v18  ;;  %v4028_v43 = vld [vmem:[%s6889_s7 + $0x670] sm:$0xff] }
 0x246   :  { %1542 = vmatpush.msra.mxu3 %v1462_v51  ;;  %1582 = vmatpush.msrb.mxu1 %v1463_v6  ;;  %v3988_v51 = vld [vmem:[%s6889_s7 + $0x530] sm:$0xff]  ;;  %v1657_v6 = vunpack.c.l.bf16 %v3989_v18 }
 0x247   :  { %1553 = vmatpush.msrb.mxu0 %v1512_v20  ;;  %1593 = vmatpush.msra.mxu2 %v1513_v37  ;;  %v1492_v20 = vunpack.c.l.bf16 %v3966_v61  ;;  %v1493_v37 = vunpack.c.h.bf16 %v3966_v61  ;;  %v1656_v38 = vunpack.c.h.bf16 %v3988_v51 }
 0x248   :  { %1543 = vmatpush.msra.mxu3 %v1460_v45  ;;  %1583 = vmatpush.msrb.mxu1 %v1461_v57  ;;  %v4013_v45 = vld [vmem:[%s6889_s7 + $0x5f8] sm:$0xff]  ;;  %v1655_v57 = vunpack.c.l.bf16 %v3988_v51  ;;  %v1854_v51 = vunpack.c.l.bf16 %v4028_v43 }
 0x249   :  { %1544 = vmatmul.f32.vlgmr.msra.gmra.mxu3 %v1524_v28  ;;  %1554 = vmatpush.msrb.mxu0 %v1510_v2  ;;  %v3987_v2 = vld [vmem:[%s6889_s7 + $0x528] sm:$0xff]  ;;  %v1706_v23 = vunpack.c.h.bf16 %v4013_v45 }
 0x24a   :  { %1584 = vmatmul.f32.vlgmr.msrb.gmra.mxu1 %v1524_v28  ;;  %1594 = vmatpush.msra.mxu2 %v1511_v62  ;;  %v1705_v62 = vunpack.c.l.bf16 %v4013_v45  ;;  %v3986_v28 = vld [vmem:[%s6889_s7 + $0x520] sm:$0xff]  ;;  %v1654_v39 = vunpack.c.h.bf16 %v3987_v2 }
 0x24b   :  { %1711 = vmatpush.msrb.mxu3 %v1673_v59  ;;  %1751 = vmatpush.msra.mxu1 %v1674_v15  ;;  %v1525_v59 = vrot.slane %v5371_v7, 4  ;;  %v1653_v15 = vunpack.c.l.bf16 %v3987_v2  ;;  %v1652_v21 = vunpack.c.h.bf16 %v3986_v28 }
 0x24c   :  { %1555 = vmatpush.msrb.mxu0 %v1508_v8  ;;  %1595 = vmatpush.msra.mxu2 %v1509_v47  ;;  %v4011_v8 = vld [vmem:[%s6889_s7 + $0x5e8] sm:$0xff]  ;;  %v1703_v47 = vunpack.c.l.bf16 %v4012_v3 }
 0x24d   :  { %1712 = vmatpush.msrb.mxu3 %v1671_v32  ;;  %1752 = vmatpush.msra.mxu1 %v1672_v12  ;;  %v3985_v32 = vld [vmem:[%s6889_s7 + $0x518] sm:$0xff]  ;;  %v1651_v12 = vunpack.c.l.bf16 %v3986_v28  ;;  %v1702_v25 = vunpack.c.h.bf16 %v4011_v8  ;;  %v4003_v3 = vld [vmem:[%s6889_s7 + $0x5a8] sm:$0xff] }
 0x24e   :  { %1556 = vmatpush.msrb.mxu0 %v1506_v22  ;;  %1596 = vmatpush.msra.mxu2 %v1507_v24  ;;  %v4010_v22 = vld [vmem:[%s6889_s7 + $0x5e0] sm:$0xff]  ;;  %v1701_v24 = vunpack.c.l.bf16 %v4011_v8  ;;  %v1650_v5 = vunpack.c.h.bf16 %v3985_v32 }
 0x24f   :  { %1713 = vmatpush.msrb.mxu3 %v1669_v11  ;;  %1753 = vmatpush.msra.mxu1 %v1670_v29  ;;  %v3984_v11 = vld [vmem:[%s6889_s7 + $0x510] sm:$0xff]  ;;  %v1649_v29 = vunpack.c.l.bf16 %v3985_v32  ;;  %v1700_v17 = vunpack.c.h.bf16 %v4010_v22  ;;  %v1686_v32 = vunpack.c.h.bf16 %v4003_v3 }
 0x250   :  { %1557 = vmatpush.msrb.mxu0 %v1504_v9  ;;  %1597 = vmatpush.msra.mxu2 %v1505_v27  ;;  %v4009_v9 = vld [vmem:[%s6889_s7 + $0x5d8] sm:$0xff]  ;;  %v1699_v27 = vunpack.c.l.bf16 %v4010_v22  ;;  %v1648_v49 = vunpack.c.h.bf16 %v3984_v11 }
 0x251   :  { %1714 = vmatpush.msrb.mxu3 %v1667_v19  ;;  %1754 = vmatpush.msra.mxu1 %v1668_v42  ;;  %v3983_v19 = vld [vmem:[%s6889_s7 + $0x508] sm:$0xff]  ;;  %v1647_v42 = vunpack.c.l.bf16 %v3984_v11  ;;  %v1698_v36 = vunpack.c.h.bf16 %v4009_v9  ;;  %v5751_v11 = vpop.f32.mrf.mxu2 }
 0x252   :  { %1558 = vmatpush.msrb.mxu0 %v1502_v48  ;;  %1598 = vmatpush.msra.mxu2 %v1503_v63  ;;  %v4008_v48 = vld [vmem:[%s6889_s7 + $0x5d0] sm:$0xff]  ;;  %v1697_v63 = vunpack.c.l.bf16 %v4009_v9  ;;  %v1645_v46 = vunpack.c.l.bf16 %v3983_v19  ;;  %v4023_v9 = vld [vmem:[%s6889_s7 + $0x648] sm:$0xff] }
 0x253   :  { %1715 = vmatpush.msrb.mxu3 %v1665_v4  ;;  %1755 = vmatpush.msra.mxu1 %v1666_v52  ;;  %v3982_v4 = vld [vmem:[%s6889_s7 + $0x500] sm:$0xff]  ;;  %v5697_v52 = vpop.f32.mrf.mxu0  ;;  %v1695_v40 = vunpack.c.l.bf16 %v4008_v48 }
 0x254   :  { %1559 = vmatpush.msrb.mxu0 %v1500_v55  ;;  %1599 = vmatpush.msra.mxu2 %v1501_v53  ;;  %v1646_v55 = vunpack.c.h.bf16 %v3983_v19  ;;  %v4007_v53 = vld [vmem:[%s6889_s7 + $0x5c8] sm:$0xff]  ;;  %v1644_v0 = vunpack.c.h.bf16 %v3982_v4 }
 0x255   :  { %1716 = vmatpush.msrb.mxu3 %v1663_v33  ;;  %1756 = vmatpush.msra.mxu1 %v1664_v54  ;;  %v1696_v33 = vunpack.c.h.bf16 %v4008_v48  ;;  %v1643_v54 = vunpack.c.l.bf16 %v3982_v4  ;;  %v1693_v41 = vunpack.c.l.bf16 %v4007_v53 }
 0x256   :  { %1560 = vmatpush.msrb.mxu0 %v1498_v14  ;;  %1600 = vmatpush.msra.mxu2 %v1499_v26  ;;  %v4029_v14 = vld [vmem:[%s6889_s7 + $0x678] sm:$0xff]  ;;  %v5705_v26 = vpop.f32.mrf.mxu1 }
 0x257   :  { %1717 = vmatpush.msrb.mxu3 %v1661_v1  ;;  %1757 = vmatpush.msra.mxu1 %v1662_v56  ;;  %v4006_v1 = vld [vmem:[%s6889_s7 + $0x5c0] sm:$0xff]  ;;  %v1694_v56 = vunpack.c.h.bf16 %v4007_v53  ;;  %v1857_v18 = vunpack.c.h.bf16 %v4029_v14  ;;  %v3999_v53 = vld [vmem:[%s6889_s7 + $0x588] sm:$0xff] }
 0x258   :  { %1561 = vmatpush.msrb.mxu0 %v1496_v35  ;;  %1601 = vmatpush.msra.mxu2 %v1497_v16  ;;  %v1707_v35 = vrot.slane %v5331_v30, 5  ;;  %v1856_v16 = vunpack.c.l.bf16 %v4029_v14  ;;  %v1692_v61 = vunpack.c.h.bf16 %v4006_v1 }
 0x259   :  { %1718 = vmatpush.msrb.mxu3 %v1659_v58  ;;  %1758 = vmatpush.msra.mxu1 %v1660_v60  ;;  %v4005_v58 = vld [vmem:[%s6889_s7 + $0x5b8] sm:$0xff]  ;;  %v1691_v60 = vunpack.c.l.bf16 %v4006_v1 }
 0x25a   :  { %1562 = vmatpush.msrb.mxu0 %v1494_v44  ;;  %1602 = vmatpush.msra.mxu2 %v1495_v50  ;;  %v4027_v44 = vld [vmem:[%s6889_s7 + $0x668] sm:$0xff]  ;;  %v5720_v50 = vpop.f32.mrf.mxu3  ;;  %v1690_v45 = vunpack.c.h.bf16 %v4005_v58 }
 0x25b   :  { %1719 = vmatpush.msrb.mxu3 %v1657_v6  ;;  %1759 = vmatpush.msra.mxu1 %v1658_v13  ;;  %v1855_v6 = vunpack.c.h.bf16 %v4028_v43  ;;  %v4004_v13 = vld [vmem:[%s6889_s7 + $0x5b0] sm:$0xff]  ;;  %v1853_v2 = vunpack.c.h.bf16 %v4027_v44 }
 0x25c   :  { %1563 = vmatpush.msrb.mxu0 %v1492_v20  ;;  %1603 = vmatpush.msra.mxu2 %v1493_v37  ;;  %v675_v20 = vpop.f32.mrf.mxu0  ;;  %v1689_v37 = vunpack.c.l.bf16 %v4005_v58  ;;  %v1688_v28 = vunpack.c.h.bf16 %v4004_v13 }
 0x25d   :  { %1720 = vmatpush.msrb.mxu3 %v1655_v57  ;;  %1760 = vmatpush.msra.mxu1 %v1656_v38  ;;  %v4026_v57 = vld [vmem:[%s6889_s7 + $0x660] sm:$0xff]  ;;  %v1852_v38 = vunpack.c.l.bf16 %v4027_v44 }
 0x25e   :  { %1564 = vmatmul.f32.vlgmr.msrb.gmra.mxu0 %v1525_v59  ;;  %1604 = vmatmul.f32.vlgmr.msra.gmra.mxu2 %v1525_v59  ;;  %v4025_v59 = vld [vmem:[%s6889_s7 + $0x658] sm:$0xff]  ;;  %v1851_v8 = vunpack.c.h.bf16 %v4026_v57 }
 0x25f   :  { %1731 = vmatpush.msra.mxu0 %v1705_v62  ;;  %1771 = vmatpush.msrb.mxu2 %v1706_v23  ;;  %v5734_v62 = vld [vmem:[%s6892_s10] sm:$0x3]  ;;  %v1687_v23 = vunpack.c.l.bf16 %v4004_v13  ;;  %v1848_v22 = vunpack.c.l.bf16 %v4025_v59 }
 0x260   :  { %1721 = vmatpush.msrb.mxu3 %v1653_v15  ;;  %1761 = vmatpush.msra.mxu1 %v1654_v39  ;;  %v5739_v15 = vpop.f32.mrf.mxu1  ;;  %v1850_v39 = vunpack.c.l.bf16 %v4026_v57  ;;  %v651_v14 = vperm.slane %v5734_v62, 1  ;;  %v4019_v57 = vld [vmem:[%s6889_s7 + $0x628] sm:$0xff] }
 0x261   :  { %1732 = vmatpush.msra.mxu0 %v1703_v47  ;;  %1772 = vmatpush.msrb.mxu2 %v1704_v10  ;;  %v4002_v47 = vld [vmem:[%s6889_s7 + $0x5a0] sm:$0xff]  ;;  %v1685_v10 = vunpack.c.l.bf16 %v4003_v3 }
 0x262   :  { %1722 = vmatpush.msrb.mxu3 %v1651_v12  ;;  %1762 = vmatpush.msra.mxu1 %v1652_v21  ;;  %v4024_v12 = vld [vmem:[%s6889_s7 + $0x650] sm:$0xff]  ;;  %v650_v21 = vperm.slane %v5734_v62, 0 }
 0x263   :  { %1733 = vmatpush.msra.mxu0 %v1701_v24  ;;  %1773 = vmatpush.msrb.mxu2 %v1702_v25  ;;  %v1849_v24 = vunpack.c.h.bf16 %v4025_v59  ;;  %v4001_v25 = vld [vmem:[%s6889_s7 + $0x598] sm:$0xff]  ;;  %v1847_v19 = vunpack.c.h.bf16 %v4024_v12 }
 0x264   :  { %1723 = vmatpush.msrb.mxu3 %v1649_v29  ;;  %1763 = vmatpush.msra.mxu1 %v1650_v5  ;;  %v1683_v29 = vunpack.c.l.bf16 %v4002_v47  ;;  %v1684_v5 = vunpack.c.h.bf16 %v4002_v47  ;;  %v1682_v48 = vunpack.c.h.bf16 %v4001_v25  ;;  %v676_v4 = vadd.f32 %v675_v20, %v650_v21 }
 0x265   :  { %1734 = vmatpush.msra.mxu0 %v1699_v27  ;;  %1774 = vmatpush.msrb.mxu2 %v1700_v17  ;;  %v1846_v17 = vunpack.c.l.bf16 %v4024_v12  ;;  %v696_v20 = vadd.f32 %v5739_v15, %v651_v14  ;;  %v1837_v47 = vunpack.c.h.bf16 %v4019_v57  ;;  %v4014_v14 = vld [vmem:[%s6889_s7 + $0x600] sm:$0xff] }
 0x266   :  { %1724 = vmatpush.msrb.mxu3 %v1647_v42  ;;  %1764 = vmatpush.msra.mxu1 %v1648_v49  ;;  %v811_v27 = vpop.f32.mrf.mxu3  ;;  %v4000_v42 = vld [vmem:[%s6889_s7 + $0x590] sm:$0xff]  ;;  %v1681_v49 = vunpack.c.l.bf16 %v4001_v25 }
 0x267   :  { %1735 = vmatpush.msra.mxu0 %v1697_v63  ;;  %1775 = vmatpush.msrb.mxu2 %v1698_v36  ;;  %v4022_v63 = vld [vmem:[%s6889_s7 + $0x640] sm:$0xff] }
 0x268   :  { %1725 = vmatpush.msrb.mxu3 %v1645_v46  ;;  %1765 = vmatpush.msra.mxu1 %v1646_v55  ;;  %v1844_v46 = vunpack.c.l.bf16 %v4023_v9  ;;  %v1845_v55 = vunpack.c.h.bf16 %v4023_v9  ;;  %v1843_v1 = vunpack.c.h.bf16 %v4022_v63  ;;  %v851_v58 = vpop.f32.mrf.mxu1 }
 0x269   :  { %1736 = vmatpush.msra.mxu0 %v1695_v40  ;;  %1776 = vmatpush.msrb.mxu2 %v1696_v33  ;;  %v1679_v33 = vunpack.c.l.bf16 %v4000_v42 }
 0x26a   :  { %1726 = vmatpush.msrb.mxu3 %v1643_v54  ;;  %1766 = vmatpush.msra.mxu1 %v1644_v0  ;;  %v1680_v54 = vunpack.c.h.bf16 %v4000_v42  ;;  %v4021_v0 = vld [vmem:[%s6889_s7 + $0x638] sm:$0xff] }
 0x26b   :  { %1727 = vmatmul.f32.vlgmr.msrb.gmra.mxu3 %v1707_v35  ;;  %1737 = vmatpush.msra.mxu0 %v1693_v41  ;;  %v1842_v41 = vunpack.c.l.bf16 %v4022_v63 }
 0x26c   :  { %1767 = vmatmul.f32.vlgmr.msra.gmra.mxu1 %v1707_v35  ;;  %1777 = vmatpush.msrb.mxu2 %v1694_v56  ;;  %v3998_v56 = vld [vmem:[%s6889_s7 + $0x580] sm:$0xff]  ;;  %v1677_v35 = vunpack.c.l.bf16 %v3999_v53 }
 0x26d   :  { %1894 = vmatpush.msra.mxu3 %v1856_v16  ;;  %1934 = vmatpush.msrb.mxu1 %v1857_v18  ;;  %v1678_v16 = vunpack.c.h.bf16 %v3999_v53  ;;  %v4020_v18 = vld [vmem:[%s6889_s7 + $0x630] sm:$0xff]  ;;  %v1675_v44 = vunpack.c.l.bf16 %v3998_v56 }
 0x26e   :  { %1738 = vmatpush.msra.mxu0 %v1691_v60  ;;  %1778 = vmatpush.msrb.mxu2 %v1692_v61  ;;  %v1840_v60 = vunpack.c.l.bf16 %v4021_v0  ;;  %v1841_v61 = vunpack.c.h.bf16 %v4021_v0  ;;  %v996_v3 = vpop.f32.mrf.mxu3 }
 0x26f   :  { %1895 = vmatpush.msra.mxu3 %v1854_v51  ;;  %1935 = vmatpush.msrb.mxu1 %v1855_v6  ;;  %v1676_v51 = vunpack.c.h.bf16 %v3998_v56  ;;  %v4045_v6 = vld [vmem:[%s6889_s7 + $0x6f8] sm:$0xff]  ;;  %v4039_v56 = vld [vmem:[%s6889_s7 + $0x6c8] sm:$0xff] }
 0x270   :  { %1739 = vmatpush.msra.mxu0 %v1689_v37  ;;  %1779 = vmatpush.msrb.mxu2 %v1690_v45  ;;  %v1838_v37 = vunpack.c.l.bf16 %v4020_v18  ;;  %v1839_v45 = vunpack.c.h.bf16 %v4020_v18  ;;  %v1888_v62 = vunpack.c.l.bf16 %v4045_v6  ;;  %v1826_v18 = vunpack.c.l.bf16 %v4014_v14 }
 0x271   :  { %1896 = vmatpush.msra.mxu3 %v1852_v38  ;;  %1936 = vmatpush.msrb.mxu1 %v1853_v2  ;;  %v4044_v2 = vld [vmem:[%s6889_s7 + $0x6f0] sm:$0xff] }
 0x272   :  { %1740 = vmatpush.msra.mxu0 %v1687_v23  ;;  %1780 = vmatpush.msrb.mxu2 %v1688_v28  ;;  %v1889_v23 = vunpack.c.h.bf16 %v4045_v6  ;;  %v4018_v28 = vld [vmem:[%s6889_s7 + $0x620] sm:$0xff]  ;;  %v1886_v12 = vunpack.c.l.bf16 %v4044_v2  ;;  %v1887_v21 = vunpack.c.h.bf16 %v4044_v2  ;;  %v4060_v6 = vld [vmem:[%s6889_s7 + $0x770] sm:$0xff]  ;;  %v4059_v2 = vld [vmem:[%s6889_s7 + $0x768] sm:$0xff] }
 0x273   :  { %1897 = vmatpush.msra.mxu3 %v1850_v39  ;;  %1937 = vmatpush.msrb.mxu1 %v1851_v8  ;;  %v1708_v39 = vrot.slane %v5371_v7, 5  ;;  %v1836_v8 = vunpack.c.l.bf16 %v4019_v57  ;;  %v1835_v25 = vunpack.c.h.bf16 %v4018_v28 }
 0x274   :  { %1741 = vmatpush.msra.mxu0 %v1685_v10  ;;  %1781 = vmatpush.msrb.mxu2 %v1686_v32  ;;  %v831_v36 = vpop.f32.mrf.mxu0  ;;  %v4043_v10 = vld [vmem:[%s6889_s7 + $0x6e8] sm:$0xff] }
 0x275   :  { %1898 = vmatpush.msra.mxu3 %v1848_v22  ;;  %1938 = vmatpush.msrb.mxu1 %v1849_v24  ;;  %v832_v40 = vadd.f32 %v831_v36, %v811_v27  ;;  %v4017_v22 = vld [vmem:[%s6889_s7 + $0x618] sm:$0xff]  ;;  %v1834_v24 = vunpack.c.l.bf16 %v4018_v28  ;;  %v1884_v9 = vunpack.c.l.bf16 %v4043_v10  ;;  %v1885_v27 = vunpack.c.h.bf16 %v4043_v10 }
 0x276   :  { %1742 = vmatpush.msra.mxu0 %v1683_v29  ;;  %1782 = vmatpush.msrb.mxu2 %v1684_v5  ;;  %v4042_v29 = vld [vmem:[%s6889_s7 + $0x6e0] sm:$0xff]  ;;  %v1833_v42 = vunpack.c.h.bf16 %v4017_v22 }
 0x277   :  { %1899 = vmatpush.msra.mxu3 %v1846_v17  ;;  %1939 = vmatpush.msrb.mxu1 %v1847_v19  ;;  %v874_v43 = vadd.f32 %v832_v40, %v676_v4  ;;  %v4016_v17 = vld [vmem:[%s6889_s7 + $0x610] sm:$0xff]  ;;  %v1832_v19 = vunpack.c.l.bf16 %v4017_v22  ;;  %v1882_v63 = vunpack.c.l.bf16 %v4042_v29  ;;  %v1883_v36 = vunpack.c.h.bf16 %v4042_v29  ;;  %v4015_v4 = vld [vmem:[%s6889_s7 + $0x608] sm:$0xff] }
 0x278   :  { %1743 = vmatpush.msra.mxu0 %v1681_v49  ;;  %1783 = vmatpush.msrb.mxu2 %v1682_v48  ;;  %v4041_v49 = vld [vmem:[%s6889_s7 + $0x6d8] sm:$0xff]  ;;  %v1036_v48 = vpop.f32.mrf.mxu1  ;;  %v1831_v53 = vunpack.c.h.bf16 %v4016_v17  ;;  %v4040_v40 = vld [vmem:[%s6889_s7 + $0x6d0] sm:$0xff] }
 0x279   :  { %1900 = vmatpush.msra.mxu3 %v1844_v46  ;;  %1940 = vmatpush.msrb.mxu1 %v1845_v55  ;;  %v1830_v55 = vunpack.c.l.bf16 %v4016_v17  ;;  %v1881_v0 = vunpack.c.h.bf16 %v4041_v49 }
 0x27a   :  { %1744 = vmatpush.msra.mxu0 %v1679_v33  ;;  %1784 = vmatpush.msrb.mxu2 %v1680_v54  ;;  %v871_v13 = vpop.f32.mrf.mxu2  ;;  %v1880_v54 = vunpack.c.l.bf16 %v4041_v49 }
 0x27b   :  { %1901 = vmatpush.msra.mxu3 %v1842_v41  ;;  %1941 = vmatpush.msrb.mxu1 %v1843_v1  ;;  %v872_v38 = vadd.f32 %v871_v13, %v851_v58  ;;  %v1828_v41 = vunpack.c.l.bf16 %v4015_v4  ;;  %v1829_v1 = vunpack.c.h.bf16 %v4015_v4  ;;  %v1827_v58 = vunpack.c.h.bf16 %v4014_v14  ;;  %v4032_v4 = vld [vmem:[%s6889_s7 + $0x690] sm:$0xff] }
 0x27c   :  { %1745 = vmatpush.msra.mxu0 %v1677_v35  ;;  %1785 = vmatpush.msrb.mxu2 %v1678_v16  ;;  %v1878_v35 = vunpack.c.l.bf16 %v4040_v40  ;;  %v1879_v16 = vunpack.c.h.bf16 %v4040_v40  ;;  %v1890_v13 = vrot.slane %v5331_v30, 6 }
 0x27d   :  { %1902 = vmatpush.msra.mxu3 %v1840_v60  ;;  %1942 = vmatpush.msrb.mxu1 %v1841_v61  ;;  %v875_v59 = vadd.f32 %v872_v38, %v696_v20  ;;  %v1016_v15 = vpop.f32.mrf.mxu0  ;;  %v4061_v60 = vld [vmem:[%s6889_s7 + $0x778] sm:$0xff]  ;;  %v1876_v61 = vunpack.c.l.bf16 %v4039_v56 }
 0x27e   :  { %1746 = vmatpush.msra.mxu0 %v1675_v44  ;;  %1786 = vmatpush.msrb.mxu2 %v1676_v51  ;;  %v1017_v32 = vadd.f32 %v1016_v15, %v996_v3  ;;  %v4038_v44 = vld [vmem:[%s6889_s7 + $0x6c0] sm:$0xff]  ;;  %v1877_v51 = vunpack.c.h.bf16 %v4039_v56  ;;  %v2039_v20 = vunpack.c.l.bf16 %v4061_v60  ;;  %v2037_v3 = vunpack.c.l.bf16 %v4060_v6  ;;  %v4053_v56 = vld [vmem:[%s6889_s7 + $0x738] sm:$0xff] }
 0x27f   :  { %1903 = vmatpush.msra.mxu3 %v1838_v37  ;;  %1943 = vmatpush.msrb.mxu1 %v1839_v45  ;;  %v2040_v37 = vunpack.c.h.bf16 %v4061_v60  ;;  %v4037_v45 = vld [vmem:[%s6889_s7 + $0x6b8] sm:$0xff]  ;;  %v1874_v57 = vunpack.c.l.bf16 %v4038_v44  ;;  %v1875_v38 = vunpack.c.h.bf16 %v4038_v44  ;;  %v4058_v15 = vld [vmem:[%s6889_s7 + $0x760] sm:$0xff]  ;;  %v4052_v44 = vld [vmem:[%s6889_s7 + $0x730] sm:$0xff] }
 0x280   :  { %1747 = vmatmul.f32.vlgmr.msra.gmra.mxu0 %v1708_v39  ;;  %1787 = vmatmul.f32.vlgmr.msrb.gmra.mxu2 %v1708_v39  ;;  %v5798_v5 = vadd.f32 %v1017_v32, %v874_v43  ;;  %v1872_v28 = vunpack.c.l.bf16 %v4037_v45  ;;  %v2035_v39 = vunpack.c.l.bf16 %v4059_v2  ;;  %v2034_v22 = vunpack.c.h.bf16 %v4058_v15 }
 0x281   :  { %1914 = vmatpush.msrb.mxu0 %v1888_v62  ;;  %1954 = vmatpush.msra.mxu2 %v1889_v23  ;;  %v2038_v62 = vunpack.c.h.bf16 %v4060_v6  ;;  %v4036_v23 = vld [vmem:[%s6889_s7 + $0x6b0] sm:$0xff]  ;;  %v2023_v6 = vunpack.c.l.bf16 %v4053_v56 }
 0x282   :  { %1904 = vmatpush.msra.mxu3 %v1836_v8  ;;  %1944 = vmatpush.msrb.mxu1 %v1837_v47  ;;  %v2036_v8 = vunpack.c.h.bf16 %v4059_v2  ;;  %v4035_v47 = vld [vmem:[%s6889_s7 + $0x6a8] sm:$0xff]  ;;  %v1870_v10 = vunpack.c.l.bf16 %v4036_v23  ;;  %v1871_v32 = vunpack.c.h.bf16 %v4036_v23  ;;  %v2022_v2 = vunpack.c.h.bf16 %v4052_v44 }
 0x283   :  { %1915 = vmatpush.msrb.mxu0 %v1886_v12  ;;  %1955 = vmatpush.msra.mxu2 %v1887_v21  ;;  %v1056_v46 = vpop.f32.mrf.mxu2  ;;  %v4057_v12 = vld [vmem:[%s6889_s7 + $0x758] sm:$0xff]  ;;  %v2033_v21 = vunpack.c.l.bf16 %v4058_v15  ;;  %v1869_v29 = vunpack.c.h.bf16 %v4035_v47  ;;  %v4050_v15 = vld [vmem:[%s6889_s7 + $0x720] sm:$0xff] }
 0x284   :  { %1905 = vmatpush.msra.mxu3 %v1834_v24  ;;  %1945 = vmatpush.msrb.mxu1 %v1835_v25  ;;  %v1057_v33 = vadd.f32 %v1056_v46, %v1036_v48  ;;  %v4034_v24 = vld [vmem:[%s6889_s7 + $0x6a0] sm:$0xff]  ;;  %v1868_v25 = vunpack.c.l.bf16 %v4035_v47  ;;  %v2032_v17 = vunpack.c.h.bf16 %v4057_v12  ;;  %v4055_v48 = vld [vmem:[%s6889_s7 + $0x748] sm:$0xff] }
 0x285   :  { %1916 = vmatpush.msrb.mxu0 %v1884_v9  ;;  %1956 = vmatpush.msra.mxu2 %v1885_v27  ;;  %v4056_v9 = vld [vmem:[%s6889_s7 + $0x750] sm:$0xff]  ;;  %v2031_v27 = vunpack.c.l.bf16 %v4057_v12  ;;  %v1867_v49 = vunpack.c.h.bf16 %v4034_v24 }
 0x286   :  { %1906 = vmatpush.msra.mxu3 %v1832_v19  ;;  %1946 = vmatpush.msrb.mxu1 %v1833_v42  ;;  %v5818_v43 = vadd.f32 %v1057_v33, %v875_v59  ;;  %v1873_v59 = vunpack.c.h.bf16 %v4037_v45  ;;  %v4033_v19 = vld [vmem:[%s6889_s7 + $0x698] sm:$0xff]  ;;  %v1866_v42 = vunpack.c.l.bf16 %v4034_v24  ;;  %v2027_v33 = vunpack.c.l.bf16 %v4055_v48 }
 0x287   :  { %1917 = vmatpush.msrb.mxu0 %v1882_v63  ;;  %1957 = vmatpush.msra.mxu2 %v1883_v36  ;;  %v2029_v63 = vunpack.c.l.bf16 %v4056_v9  ;;  %v2030_v36 = vunpack.c.h.bf16 %v4056_v9  ;;  %v1864_v46 = vunpack.c.l.bf16 %v4033_v19  ;;  %v4077_v45 = vld [vmem:[%s6889_s7 + $0x7f8] sm:$0xff]  ;;  %v2017_v24 = vunpack.c.l.bf16 %v4050_v15 }
 0x288   :  { %1907 = vmatpush.msra.mxu3 %v1830_v55  ;;  %1947 = vmatpush.msrb.mxu1 %v1831_v53  ;;  %v1865_v55 = vunpack.c.h.bf16 %v4033_v19  ;;  %v4054_v53 = vld [vmem:[%s6889_s7 + $0x740] sm:$0xff]  ;;  %v1179_v40 = vpop.f32.mrf.mxu3 }
 0x289   :  { %1918 = vmatpush.msrb.mxu0 %v1880_v54  ;;  %1958 = vmatpush.msra.mxu2 %v1881_v0  ;;  %v2028_v54 = vunpack.c.h.bf16 %v4055_v48  ;;  %v4031_v0 = vld [vmem:[%s6889_s7 + $0x688] sm:$0xff] }
 0x28a   :  { %1908 = vmatpush.msra.mxu3 %v1828_v41  ;;  %1948 = vmatpush.msrb.mxu1 %v1829_v1  ;;  %v1862_v41 = vunpack.c.l.bf16 %v4032_v4  ;;  %v1863_v1 = vunpack.c.h.bf16 %v4032_v4  ;;  %v1860_v60 = vunpack.c.l.bf16 %v4031_v0 }
 0x28b   :  { %1919 = vmatpush.msrb.mxu0 %v1878_v35  ;;  %1959 = vmatpush.msra.mxu2 %v1879_v16  ;;  %v2025_v16 = vunpack.c.l.bf16 %v4054_v53 }
 0x28c   :  { %1909 = vmatpush.msra.mxu3 %v1826_v18  ;;  %1949 = vmatpush.msrb.mxu1 %v1827_v58  ;;  %v2026_v18 = vunpack.c.h.bf16 %v4054_v53  ;;  %v4030_v58 = vld [vmem:[%s6889_s7 + $0x680] sm:$0xff] }
 0x28d   :  { %1910 = vmatmul.f32.vlgmr.msra.gmra.mxu3 %v1890_v13  ;;  %1920 = vmatpush.msrb.mxu0 %v1876_v61  ;;  %v1861_v61 = vunpack.c.h.bf16 %v4031_v0  ;;  %v4071_v0 = vld [vmem:[%s6889_s7 + $0x7c8] sm:$0xff] }
 0x28e   :  { %1950 = vmatmul.f32.vlgmr.msrb.gmra.mxu1 %v1890_v13  ;;  %1960 = vmatpush.msra.mxu2 %v1877_v51  ;;  %v2024_v13 = vunpack.c.h.bf16 %v4053_v56 }
 0x28f   :  { %2077 = vmatpush.msrb.mxu3 %v2039_v20  ;;  %2117 = vmatpush.msra.mxu1 %v2040_v37  ;;  %v1858_v20 = vunpack.c.l.bf16 %v4030_v58  ;;  %v1859_v37 = vunpack.c.h.bf16 %v4030_v58  ;;  %v2060_v58 = vunpack.c.h.bf16 %v4071_v0 }
 0x290   :  { %1921 = vmatpush.msrb.mxu0 %v1874_v57  ;;  %1961 = vmatpush.msra.mxu2 %v1875_v38  ;;  %v1219_v57 = vpop.f32.mrf.mxu1  ;;  %v2021_v38 = vunpack.c.l.bf16 %v4052_v44 }
 0x291   :  { %2078 = vmatpush.msrb.mxu3 %v2037_v3  ;;  %2118 = vmatpush.msra.mxu1 %v2038_v62  ;;  %v4076_v62 = vld [vmem:[%s6889_s7 + $0x7f0] sm:$0xff] }
 0x292   :  { %1922 = vmatpush.msrb.mxu0 %v1872_v28  ;;  %1962 = vmatpush.msra.mxu2 %v1873_v59  ;;  %v2071_v28 = vunpack.c.l.bf16 %v4077_v45  ;;  %v2072_v59 = vunpack.c.h.bf16 %v4077_v45  ;;  %v2069_v12 = vunpack.c.l.bf16 %v4076_v62  ;;  %v4091_v45 = vld [vmem:[%s6889_s7 + $0x868] sm:$0xff] }
 0x293   :  { %2079 = vmatpush.msrb.mxu3 %v2035_v39  ;;  %2119 = vmatpush.msra.mxu1 %v2036_v8  ;;  %v1891_v39 = vrot.slane %v5371_v7, 6 }
 0x294   :  { %1923 = vmatpush.msrb.mxu0 %v1870_v10  ;;  %1963 = vmatpush.msra.mxu2 %v1871_v32  ;;  %v4075_v10 = vld [vmem:[%s6889_s7 + $0x7e8] sm:$0xff] }
 0x295   :  { %2080 = vmatpush.msrb.mxu3 %v2033_v21  ;;  %2120 = vmatpush.msra.mxu1 %v2034_v22  ;;  %v2070_v21 = vunpack.c.h.bf16 %v4076_v62  ;;  %v4049_v22 = vld [vmem:[%s6889_s7 + $0x718] sm:$0xff]  ;;  %v2068_v9 = vunpack.c.h.bf16 %v4075_v10  ;;  %v2218_v62 = vunpack.c.l.bf16 %v4091_v45 }
 0x296   :  { %1924 = vmatpush.msrb.mxu0 %v1868_v25  ;;  %1964 = vmatpush.msra.mxu2 %v1869_v29  ;;  %v2018_v25 = vunpack.c.h.bf16 %v4050_v15  ;;  %v4074_v29 = vld [vmem:[%s6889_s7 + $0x7e0] sm:$0xff]  ;;  %v2016_v19 = vunpack.c.h.bf16 %v4049_v22 }
 0x297   :  { %2081 = vmatpush.msrb.mxu3 %v2031_v27  ;;  %2121 = vmatpush.msra.mxu1 %v2032_v17  ;;  %v1199_v14 = vpop.f32.mrf.mxu0  ;;  %v4048_v27 = vld [vmem:[%s6889_s7 + $0x710] sm:$0xff]  ;;  %v2015_v17 = vunpack.c.l.bf16 %v4049_v22  ;;  %v2066_v48 = vunpack.c.h.bf16 %v4074_v29 }
 0x298   :  { %1925 = vmatpush.msrb.mxu0 %v1866_v42  ;;  %1965 = vmatpush.msra.mxu2 %v1867_v49  ;;  %v1200_v35 = vadd.f32 %v1199_v14, %v1179_v40  ;;  %v4073_v42 = vld [vmem:[%s6889_s7 + $0x7d8] sm:$0xff]  ;;  %v2065_v49 = vunpack.c.l.bf16 %v4074_v29  ;;  %v2014_v4 = vunpack.c.h.bf16 %v4048_v27  ;;  %v4046_v40 = vld [vmem:[%s6889_s7 + $0x700] sm:$0xff]  ;;  %v4088_v22 = vld [vmem:[%s6889_s7 + $0x850] sm:$0xff] }
 0x299   :  { %2082 = vmatpush.msrb.mxu3 %v2029_v63  ;;  %2122 = vmatpush.msra.mxu1 %v2030_v36  ;;  %v4047_v63 = vld [vmem:[%s6889_s7 + $0x708] sm:$0xff]  ;;  %v2013_v36 = vunpack.c.l.bf16 %v4048_v27  ;;  %v2064_v53 = vunpack.c.h.bf16 %v4073_v42  ;;  %v2010_v56 = vunpack.c.h.bf16 %v4046_v40  ;;  %v4065_v29 = vld [vmem:[%s6889_s7 + $0x798] sm:$0xff] }
 0x29a   :  { %1926 = vmatpush.msrb.mxu0 %v1864_v46  ;;  %1966 = vmatpush.msra.mxu2 %v1865_v55  ;;  %v5879_v51 = vadd.f32 %v1200_v35, %v5798_v5  ;;  %v4051_v5 = vld [vmem:[%s6889_s7 + $0x728] sm:$0xff]  ;;  %v4072_v46 = vld [vmem:[%s6889_s7 + $0x7d0] sm:$0xff]  ;;  %v2063_v55 = vunpack.c.l.bf16 %v4073_v42  ;;  %v4093_v35 = vld [vmem:[%s6889_s7 + $0x878] sm:$0xff] }
 0x29b   :  { %2083 = vmatpush.msrb.mxu3 %v2027_v33  ;;  %2123 = vmatpush.msra.mxu1 %v2028_v54  ;;  %v2019_v8 = vunpack.c.l.bf16 %v4051_v5  ;;  %v2020_v47 = vunpack.c.h.bf16 %v4051_v5  ;;  %v2011_v33 = vunpack.c.l.bf16 %v4047_v63  ;;  %v2012_v54 = vunpack.c.h.bf16 %v4047_v63  ;;  %v4087_v27 = vld [vmem:[%s6889_s7 + $0x848] sm:$0xff]  ;;  %v4064_v42 = vld [vmem:[%s6889_s7 + $0x790] sm:$0xff]  ;;  %v4086_v63 = vld [vmem:[%s6889_s7 + $0x840] sm:$0xff] }
 0x29c   :  { %1927 = vmatpush.msrb.mxu0 %v1862_v41  ;;  %1967 = vmatpush.msra.mxu2 %v1863_v1  ;;  %v2061_v14 = vunpack.c.l.bf16 %v4072_v46  ;;  %v2062_v41 = vunpack.c.h.bf16 %v4072_v46  ;;  %v2009_v1 = vunpack.c.l.bf16 %v4046_v40  ;;  %v2222_v44 = vunpack.c.l.bf16 %v4093_v35 }
 0x29d   :  { %2084 = vmatpush.msrb.mxu3 %v2025_v16  ;;  %2124 = vmatpush.msra.mxu1 %v2026_v18  ;;  %v1239_v3 = vpop.f32.mrf.mxu2  ;;  %v2059_v16 = vunpack.c.l.bf16 %v4071_v0  ;;  %v4070_v18 = vld [vmem:[%s6889_s7 + $0x7c0] sm:$0xff]  ;;  %v2211_v46 = vunpack.c.h.bf16 %v4087_v27  ;;  %v2045_v40 = vunpack.c.l.bf16 %v4064_v42 }
 0x29e   :  { %1928 = vmatpush.msrb.mxu0 %v1860_v60  ;;  %1968 = vmatpush.msra.mxu2 %v1861_v61  ;;  %v1240_v23 = vadd.f32 %v1239_v3, %v1219_v57  ;;  %v4092_v60 = vld [vmem:[%s6889_s7 + $0x870] sm:$0xff]  ;;  %v2073_v61 = vrot.slane %v5331_v30, 7  ;;  %v4090_v3 = vld [vmem:[%s6889_s7 + $0x860] sm:$0xff] }
 0x29f   :  { %2085 = vmatpush.msrb.mxu3 %v2023_v6  ;;  %2125 = vmatpush.msra.mxu1 %v2024_v13  ;;  %v2223_v6 = vunpack.c.h.bf16 %v4093_v35  ;;  %v4069_v13 = vld [vmem:[%s6889_s7 + $0x7b8] sm:$0xff]  ;;  %v2220_v57 = vunpack.c.l.bf16 %v4092_v60  ;;  %v4068_v30 = vld [vmem:[%s6889_s7 + $0x7b0] sm:$0xff] }
 0x2a0   :  { %1929 = vmatpush.msrb.mxu0 %v1858_v20  ;;  %1969 = vmatpush.msra.mxu2 %v1859_v37  ;;  %v5898_v32 = vadd.f32 %v1240_v23, %v5818_v43  ;;  %v2067_v43 = vunpack.c.l.bf16 %v4075_v10  ;;  %v2057_v20 = vunpack.c.l.bf16 %v4070_v18  ;;  %v2058_v37 = vunpack.c.h.bf16 %v4070_v18  ;;  %v4066_v10 = vld [vmem:[%s6889_s7 + $0x7a0] sm:$0xff] }
 0x2a1   :  { %2086 = vmatpush.msrb.mxu3 %v2021_v38  ;;  %2126 = vmatpush.msra.mxu1 %v2022_v2  ;;  %v2221_v38 = vunpack.c.h.bf16 %v4092_v60  ;;  %v2055_v2 = vunpack.c.l.bf16 %v4069_v13  ;;  %v2056_v5 = vunpack.c.h.bf16 %v4069_v13  ;;  %v2219_v23 = vunpack.c.h.bf16 %v4091_v45 }
 0x2a2   :  { %1930 = vmatmul.f32.vlgmr.msrb.gmra.mxu0 %v1891_v39  ;;  %1970 = vmatmul.f32.vlgmr.msra.gmra.mxu2 %v1891_v39  ;;  %v2054_v15 = vunpack.c.h.bf16 %v4068_v30  ;;  %v4089_v39 = vld [vmem:[%s6889_s7 + $0x858] sm:$0xff] }
 0x2a3   :  { %2097 = vmatpush.msra.mxu0 %v2071_v28  ;;  %2137 = vmatpush.msrb.mxu2 %v2072_v59  ;;  %v4067_v28 = vld [vmem:[%s6889_s7 + $0x7a8] sm:$0xff]  ;;  %v2053_v59 = vunpack.c.l.bf16 %v4068_v30 }
 0x2a4   :  { %2087 = vmatpush.msrb.mxu3 %v2019_v8  ;;  %2127 = vmatpush.msra.mxu1 %v2020_v47  ;;  %v2216_v8 = vunpack.c.l.bf16 %v4090_v3  ;;  %v2217_v47 = vunpack.c.h.bf16 %v4090_v3  ;;  %v2074_v3 = vrot.slane %v5371_v7, 7 }
 0x2a5   :  { %2098 = vmatpush.msra.mxu0 %v2069_v12  ;;  %2138 = vmatpush.msrb.mxu2 %v2070_v21  ;;  %v2051_v12 = vunpack.c.l.bf16 %v4067_v28  ;;  %v2052_v21 = vunpack.c.h.bf16 %v4067_v28  ;;  %v1402_v13 = vpop.f32.mrf.mxu1  ;;  %v4107_v28 = vld [vmem:[%s6889_s7 + $0x8e8] sm:$0xff] }
 0x2a6   :  { %2088 = vmatpush.msrb.mxu3 %v2017_v24  ;;  %2128 = vmatpush.msra.mxu1 %v2018_v25  ;;  %v2214_v24 = vunpack.c.l.bf16 %v4089_v39  ;;  %v2215_v25 = vunpack.c.h.bf16 %v4089_v39 }
 0x2a7   :  { %2099 = vmatpush.msra.mxu0 %v2067_v43  ;;  %2139 = vmatpush.msrb.mxu2 %v2068_v9  ;;  %v2049_v43 = vunpack.c.l.bf16 %v4066_v10  ;;  %v2050_v9 = vunpack.c.h.bf16 %v4066_v10  ;;  %v4106_v10 = vld [vmem:[%s6889_s7 + $0x8e0] sm:$0xff] }
 0x2a8   :  { %2089 = vmatpush.msrb.mxu3 %v2015_v17  ;;  %2129 = vmatpush.msra.mxu1 %v2016_v19  ;;  %v2212_v17 = vunpack.c.l.bf16 %v4088_v22  ;;  %v2213_v19 = vunpack.c.h.bf16 %v4088_v22 }
 0x2a9   :  { %2100 = vmatpush.msra.mxu0 %v2065_v49  ;;  %2140 = vmatpush.msrb.mxu2 %v2066_v48  ;;  %v2047_v49 = vunpack.c.l.bf16 %v4065_v29  ;;  %v2048_v48 = vunpack.c.h.bf16 %v4065_v29  ;;  %v2248_v29 = vunpack.c.l.bf16 %v4106_v10 }
 0x2aa   :  { %2090 = vmatpush.msrb.mxu3 %v2013_v36  ;;  %2130 = vmatpush.msra.mxu1 %v2014_v4  ;;  %v1362_v36 = vpop.f32.mrf.mxu3  ;;  %v2210_v4 = vunpack.c.l.bf16 %v4087_v27 }
 0x2ab   :  { %2101 = vmatpush.msra.mxu0 %v2063_v55  ;;  %2141 = vmatpush.msrb.mxu2 %v2064_v53  ;;  %v4063_v55 = vld [vmem:[%s6889_s7 + $0x788] sm:$0xff] }
 0x2ac   :  { %2091 = vmatpush.msrb.mxu3 %v2011_v33  ;;  %2131 = vmatpush.msra.mxu1 %v2012_v54  ;;  %v2046_v33 = vunpack.c.h.bf16 %v4064_v42  ;;  %v4085_v54 = vld [vmem:[%s6889_s7 + $0x838] sm:$0xff]  ;;  %v2044_v35 = vunpack.c.h.bf16 %v4063_v55 }
 0x2ad   :  { %2102 = vmatpush.msra.mxu0 %v2061_v14  ;;  %2142 = vmatpush.msrb.mxu2 %v2062_v41  ;;  %v2208_v14 = vunpack.c.l.bf16 %v4086_v63  ;;  %v2209_v41 = vunpack.c.h.bf16 %v4086_v63  ;;  %v2207_v60 = vunpack.c.h.bf16 %v4085_v54 }
 0x2ae   :  { %2092 = vmatpush.msrb.mxu3 %v2009_v1  ;;  %2132 = vmatpush.msra.mxu1 %v2010_v56  ;;  %v4062_v1 = vld [vmem:[%s6889_s7 + $0x780] sm:$0xff]  ;;  %v2043_v56 = vunpack.c.l.bf16 %v4063_v55 }
 0x2af   :  { %2093 = vmatmul.f32.vlgmr.msrb.gmra.mxu3 %v2073_v61  ;;  %2103 = vmatpush.msra.mxu0 %v2059_v16  ;;  %v4084_v16 = vld [vmem:[%s6889_s7 + $0x830] sm:$0xff] }
 0x2b0   :  { %2133 = vmatmul.f32.vlgmr.msra.gmra.mxu1 %v2073_v61  ;;  %2143 = vmatpush.msrb.mxu2 %v2060_v58  ;;  %v2206_v58 = vunpack.c.l.bf16 %v4085_v54  ;;  %v2041_v61 = vunpack.c.l.bf16 %v4062_v1  ;;  %v4125_v54 = vld [vmem:[%s6889_s7 + $0x978] sm:$0xff] }
 0x2b1   :  { %2256 = vmatpush.msra.mxu3 %v2222_v44  ;;  %2296 = vmatpush.msrb.mxu1 %v2223_v6  ;;  %v2042_v44 = vunpack.c.h.bf16 %v4062_v1  ;;  %v4109_v6 = vld [vmem:[%s6889_s7 + $0x8f8] sm:$0xff]  ;;  %v2401_v1 = vunpack.c.l.bf16 %v4125_v54 }
 0x2b2   :  { %2104 = vmatpush.msra.mxu0 %v2057_v20  ;;  %2144 = vmatpush.msrb.mxu2 %v2058_v37  ;;  %v2204_v20 = vunpack.c.l.bf16 %v4084_v16  ;;  %v2205_v37 = vunpack.c.h.bf16 %v4084_v16  ;;  %v2254_v30 = vunpack.c.l.bf16 %v4109_v6 }
 0x2b3   :  { %2257 = vmatpush.msra.mxu3 %v2220_v57  ;;  %2297 = vmatpush.msrb.mxu1 %v2221_v38  ;;  %v4108_v57 = vld [vmem:[%s6889_s7 + $0x8f0] sm:$0xff] }
 0x2b4   :  { %2105 = vmatpush.msra.mxu0 %v2055_v2  ;;  %2145 = vmatpush.msrb.mxu2 %v2056_v5  ;;  %v2255_v2 = vunpack.c.h.bf16 %v4109_v6  ;;  %v4082_v5 = vld [vmem:[%s6889_s7 + $0x820] sm:$0xff]  ;;  %v2253_v39 = vunpack.c.h.bf16 %v4108_v57  ;;  %v4100_v6 = vld [vmem:[%s6889_s7 + $0x8b0] sm:$0xff] }
 0x2b5   :  { %2258 = vmatpush.msra.mxu3 %v2218_v62  ;;  %2298 = vmatpush.msrb.mxu1 %v2219_v23  ;;  %v2200_v7 = vunpack.c.l.bf16 %v4082_v5 }
 0x2b6   :  { %2106 = vmatpush.msra.mxu0 %v2053_v59  ;;  %2146 = vmatpush.msrb.mxu2 %v2054_v15  ;;  %v2252_v15 = vunpack.c.l.bf16 %v4108_v57  ;;  %v4099_v57 = vld [vmem:[%s6889_s7 + $0x8a8] sm:$0xff] }
 0x2b7   :  { %2259 = vmatpush.msra.mxu3 %v2216_v8  ;;  %2299 = vmatpush.msrb.mxu1 %v2217_v47  ;;  %v4081_v8 = vld [vmem:[%s6889_s7 + $0x818] sm:$0xff]  ;;  %v2201_v47 = vunpack.c.h.bf16 %v4082_v5 }
 0x2b8   :  { %2107 = vmatpush.msra.mxu0 %v2051_v12  ;;  %2147 = vmatpush.msrb.mxu2 %v2052_v21  ;;  %v2251_v12 = vunpack.c.h.bf16 %v4107_v28  ;;  %v4080_v21 = vld [vmem:[%s6889_s7 + $0x810] sm:$0xff]  ;;  %v2198_v22 = vunpack.c.l.bf16 %v4081_v8 }
 0x2b9   :  { %2260 = vmatpush.msra.mxu3 %v2214_v24  ;;  %2300 = vmatpush.msrb.mxu1 %v2215_v25  ;;  %v1382_v53 = vpop.f32.mrf.mxu0  ;;  %v2199_v24 = vunpack.c.h.bf16 %v4081_v8  ;;  %v4105_v25 = vld [vmem:[%s6889_s7 + $0x8d8] sm:$0xff]  ;;  %v2196_v27 = vunpack.c.l.bf16 %v4080_v21 }
 0x2ba   :  { %2108 = vmatpush.msra.mxu0 %v2049_v43  ;;  %2148 = vmatpush.msrb.mxu2 %v2050_v9  ;;  %v1383_v0 = vadd.f32 %v1382_v53, %v1362_v36  ;;  %v2249_v43 = vunpack.c.h.bf16 %v4106_v10  ;;  %v4079_v9 = vld [vmem:[%s6889_s7 + $0x808] sm:$0xff]  ;;  %v2246_v42 = vunpack.c.l.bf16 %v4105_v25 }
 0x2bb   :  { %2261 = vmatpush.msra.mxu3 %v2212_v17  ;;  %2301 = vmatpush.msrb.mxu1 %v2213_v19  ;;  %v2197_v17 = vunpack.c.h.bf16 %v4080_v21  ;;  %v4104_v19 = vld [vmem:[%s6889_s7 + $0x8d0] sm:$0xff]  ;;  %v2194_v63 = vunpack.c.l.bf16 %v4079_v9  ;;  %v2195_v36 = vunpack.c.h.bf16 %v4079_v9 }
 0x2bc   :  { %2109 = vmatpush.msra.mxu0 %v2047_v49  ;;  %2149 = vmatpush.msrb.mxu2 %v2048_v48  ;;  %v5983_v18 = vadd.f32 %v1383_v0, %v5879_v51  ;;  %v4083_v51 = vld [vmem:[%s6889_s7 + $0x828] sm:$0xff]  ;;  %v2247_v49 = vunpack.c.h.bf16 %v4105_v25  ;;  %v4078_v48 = vld [vmem:[%s6889_s7 + $0x800] sm:$0xff]  ;;  %v2244_v55 = vunpack.c.l.bf16 %v4104_v19  ;;  %v2245_v53 = vunpack.c.h.bf16 %v4104_v19 }
 0x2bd   :  { %2262 = vmatpush.msra.mxu3 %v2210_v4  ;;  %2302 = vmatpush.msrb.mxu1 %v2211_v46  ;;  %v2202_v62 = vunpack.c.l.bf16 %v4083_v51  ;;  %v2203_v23 = vunpack.c.h.bf16 %v4083_v51  ;;  %v4103_v4 = vld [vmem:[%s6889_s7 + $0x8c8] sm:$0xff]  ;;  %v570_v46 = vadd.f32 %v5697_v52, %v5336_v34  ;;  %v4124_v52 = vld [vmem:[%s6889_s7 + $0x970] sm:$0xff] }
 0x2be   :  { %2110 = vmatpush.msra.mxu0 %v2045_v40  ;;  %2150 = vmatpush.msrb.mxu2 %v2046_v33  ;;  %v2192_v40 = vunpack.c.l.bf16 %v4078_v48  ;;  %v2193_v33 = vunpack.c.h.bf16 %v4078_v48  ;;  %v2242_v0 = vunpack.c.l.bf16 %v4103_v4  ;;  %v2243_v34 = vunpack.c.h.bf16 %v4103_v4  ;;  %v4095_v19 = vld [vmem:[%s6889_s7 + $0x888] sm:$0xff]  ;;  %v4117_v48 = vld [vmem:[%s6889_s7 + $0x938] sm:$0xff] }
 0x2bf   :  { %2263 = vmatpush.msra.mxu3 %v2208_v14  ;;  %2303 = vmatpush.msrb.mxu1 %v2209_v41  ;;  %v1422_v45 = vpop.f32.mrf.mxu2  ;;  %v4102_v14 = vld [vmem:[%s6889_s7 + $0x8c0] sm:$0xff]  ;;  %v6039_v41 = vmax.f32 %v570_v46, 0.0 }
 0x2c0   :  { %2111 = vmatpush.msra.mxu0 %v2043_v56  ;;  %2151 = vmatpush.msrb.mxu2 %v2044_v35  ;;  %v1423_v38 = vadd.f32 %v1422_v45, %v1402_v13  ;;  %v2402_v56 = vunpack.c.h.bf16 %v4125_v54  ;;  %v4101_v35 = vld [vmem:[%s6889_s7 + $0x8b8] sm:$0xff]  ;;  %v2240_v16 = vunpack.c.l.bf16 %v4102_v14  ;;  %v4094_v46 = vld [vmem:[%s6889_s7 + $0x880] sm:$0xff]  ;;  %v2386_v54 = vunpack.c.h.bf16 %v4117_v48 }
 0x2c1   :  { %2264 = vmatpush.msra.mxu3 %v2206_v58  ;;  %2304 = vmatpush.msrb.mxu1 %v2207_v60  ;;  %v2241_v58 = vunpack.c.h.bf16 %v4102_v14  ;;  %v4123_v60 = vld [vmem:[%s6889_s7 + $0x968] sm:$0xff]  ;;  %v2238_v13 = vunpack.c.l.bf16 %v4101_v35  ;;  %v2224_v14 = vunpack.c.l.bf16 %v4094_v46 }
 0x2c2   :  { %2112 = vmatpush.msra.mxu0 %v2041_v61  ;;  %2152 = vmatpush.msrb.mxu2 %v2042_v44  ;;  %v6002_v59 = vadd.f32 %v1423_v38, %v5898_v32  ;;  %v2250_v32 = vunpack.c.l.bf16 %v4107_v28  ;;  %v2399_v61 = vunpack.c.l.bf16 %v4124_v52  ;;  %v2400_v44 = vunpack.c.h.bf16 %v4124_v52  ;;  %v4141_v52 = vld [vmem:[%s6889_s7 + $0x9f8] sm:$0xff] }
 0x2c3   :  { %2265 = vmatpush.msra.mxu3 %v2204_v20  ;;  %2305 = vmatpush.msrb.mxu1 %v2205_v37  ;;  %v2239_v20 = vunpack.c.h.bf16 %v4101_v35  ;;  %v4122_v37 = vld [vmem:[%s6889_s7 + $0x960] sm:$0xff]  ;;  %v2397_v51 = vunpack.c.l.bf16 %v4123_v60  ;;  %v2398_v45 = vunpack.c.h.bf16 %v4123_v60  ;;  %v2236_v38 = vunpack.c.l.bf16 %v4100_v6  ;;  %v4115_v35 = vld [vmem:[%s6889_s7 + $0x928] sm:$0xff] }
 0x2c4   :  { %2113 = vmatmul.f32.vlgmr.msra.gmra.mxu0 %v2074_v3  ;;  %2153 = vmatmul.f32.vlgmr.msrb.gmra.mxu2 %v2074_v3  ;;  %v2395_v5 = vunpack.c.l.bf16 %v4122_v37  ;;  %v2396_v3 = vunpack.c.h.bf16 %v4122_v37  ;;  %v2235_v28 = vunpack.c.h.bf16 %v4099_v57  ;;  %v2433_v60 = vunpack.c.l.bf16 %v4141_v52  ;;  %v4139_v37 = vld [vmem:[%s6889_s7 + $0x9e8] sm:$0xff] }
 0x2c5   :  { %2276 = vmatpush.msrb.mxu0 %v2254_v30  ;;  %2316 = vmatpush.msra.mxu2 %v2255_v2  ;;  %v2237_v30 = vunpack.c.h.bf16 %v4100_v6  ;;  %v4121_v2 = vld [vmem:[%s6889_s7 + $0x958] sm:$0xff] }
 0x2c6   :  { %2266 = vmatpush.msra.mxu3 %v2202_v62  ;;  %2306 = vmatpush.msrb.mxu1 %v2203_v23  ;;  %v4098_v62 = vld [vmem:[%s6889_s7 + $0x8a0] sm:$0xff]  ;;  %v2234_v23 = vunpack.c.l.bf16 %v4099_v57  ;;  %v2394_v8 = vunpack.c.h.bf16 %v4121_v2 }
 0x2c7   :  { %2277 = vmatpush.msrb.mxu0 %v2252_v15  ;;  %2317 = vmatpush.msra.mxu2 %v2253_v39  ;;  %v4120_v15 = vld [vmem:[%s6889_s7 + $0x950] sm:$0xff]  ;;  %v2393_v39 = vunpack.c.l.bf16 %v4121_v2  ;;  %v2233_v10 = vunpack.c.h.bf16 %v4098_v62 }
 0x2c8   :  { %2267 = vmatpush.msra.mxu3 %v2200_v7  ;;  %2307 = vmatpush.msrb.mxu1 %v2201_v47  ;;  %v4097_v7 = vld [vmem:[%s6889_s7 + $0x898] sm:$0xff]  ;;  %v2232_v47 = vunpack.c.l.bf16 %v4098_v62  ;;  %v2392_v21 = vunpack.c.h.bf16 %v4120_v15  ;;  %v4112_v62 = vld [vmem:[%s6889_s7 + $0x910] sm:$0xff] }
 0x2c9   :  { %2278 = vmatpush.msrb.mxu0 %v2250_v32  ;;  %2318 = vmatpush.msra.mxu2 %v2251_v12  ;;  %v4119_v32 = vld [vmem:[%s6889_s7 + $0x948] sm:$0xff]  ;;  %v2391_v12 = vunpack.c.l.bf16 %v4120_v15  ;;  %v2230_v25 = vunpack.c.l.bf16 %v4097_v7  ;;  %v4137_v15 = vld [vmem:[%s6889_s7 + $0x9d8] sm:$0xff] }
 0x2ca   :  { %2268 = vmatpush.msra.mxu3 %v2198_v22  ;;  %2308 = vmatpush.msrb.mxu1 %v2199_v24  ;;  %v4096_v22 = vld [vmem:[%s6889_s7 + $0x890] sm:$0xff]  ;;  %v593_v24 = vadd.f32 %v5705_v26, %v5328_v31 }
 0x2cb   :  { %2279 = vmatpush.msrb.mxu0 %v2248_v29  ;;  %2319 = vmatpush.msra.mxu2 %v2249_v43  ;;  %v2231_v29 = vunpack.c.h.bf16 %v4097_v7  ;;  %v4118_v43 = vld [vmem:[%s6889_s7 + $0x940] sm:$0xff]  ;;  %v2228_v26 = vunpack.c.l.bf16 %v4096_v22  ;;  %v4111_v7 = vld [vmem:[%s6889_s7 + $0x908] sm:$0xff] }
 0x2cc   :  { %2269 = vmatpush.msra.mxu3 %v2196_v27  ;;  %2309 = vmatpush.msrb.mxu1 %v2197_v17  ;;  %v1545_v9 = vpop.f32.mrf.mxu3  ;;  %v2389_v27 = vunpack.c.l.bf16 %v4119_v32  ;;  %v2390_v17 = vunpack.c.h.bf16 %v4119_v32  ;;  %v616_v31 = vadd.f32 %v5751_v11, %v593_v24  ;;  %v2388_v4 = vunpack.c.h.bf16 %v4118_v43  ;;  %v4136_v32 = vld [vmem:[%s6889_s7 + $0x9d0] sm:$0xff] }
 0x2cd   :  { %2280 = vmatpush.msrb.mxu0 %v2246_v42  ;;  %2320 = vmatpush.msra.mxu2 %v2247_v49  ;;  %v2229_v49 = vunpack.c.h.bf16 %v4096_v22  ;;  %v2226_v11 = vunpack.c.l.bf16 %v4095_v19  ;;  %v4110_v22 = vld [vmem:[%s6889_s7 + $0x900] sm:$0xff]  ;;  %v2373_v24 = vunpack.c.l.bf16 %v4111_v7 }
 0x2ce   :  { %2270 = vmatpush.msra.mxu3 %v2194_v63  ;;  %2310 = vmatpush.msrb.mxu1 %v2195_v36  ;;  %v2387_v36 = vunpack.c.l.bf16 %v4118_v43  ;;  %v2423_v43 = vunpack.c.l.bf16 %v4136_v32 }
 0x2cf   :  { %2281 = vmatpush.msrb.mxu0 %v2244_v55  ;;  %2321 = vmatpush.msra.mxu2 %v2245_v53  ;;  %v2227_v55 = vunpack.c.h.bf16 %v4095_v19  ;;  %v4116_v53 = vld [vmem:[%s6889_s7 + $0x930] sm:$0xff]  ;;  %v4157_v19 = vld [vmem:[%s6889_s7 + $0xa78] sm:$0xff] }
 0x2d0   :  { %2271 = vmatpush.msra.mxu3 %v2192_v40  ;;  %2311 = vmatpush.msrb.mxu1 %v2193_v33  ;;  %v2385_v33 = vunpack.c.l.bf16 %v4117_v48  ;;  %v2437_v48 = vrot.slane %v6039_v41, 1 }
 0x2d1   :  { %2272 = vmatmul.f32.vlgmr.msra.gmra.mxu3 %v6039_v41  ;;  %2282 = vmatpush.msrb.mxu0 %v2242_v0  ;;  %v639_v0 = vadd.f32 %v5720_v50, %v616_v31  ;;  %v4140_v50 = vld [vmem:[%s6889_s7 + $0x9f0] sm:$0xff]  ;;  %v4134_v31 = vld [vmem:[%s6889_s7 + $0x9c0] sm:$0xff] }
 0x2d2   :  { %2312 = vmatmul.f32.vlgmr.msrb.gmra.mxu1 %v6039_v41  ;;  %2322 = vmatpush.msra.mxu2 %v2243_v34  ;;  %v2225_v34 = vunpack.c.h.bf16 %v4094_v46  ;;  %v2432_v57 = vunpack.c.h.bf16 %v4140_v50  ;;  %v2419_v46 = vunpack.c.l.bf16 %v4134_v31 }
 0x2d3   :  { %2441 = vmatpush.msrb.mxu3 %v2401_v1  ;;  %2481 = vmatpush.msra.mxu1 %v2402_v56  ;;  %v1585_v1 = vpop.f32.mrf.mxu1  ;;  %v2383_v56 = vunpack.c.l.bf16 %v4116_v53  ;;  %v6110_v6 = vmax.f32 %v639_v0, 0.0 }
 0x2d4   :  { %2283 = vmatpush.msrb.mxu0 %v2240_v16  ;;  %2323 = vmatpush.msra.mxu2 %v2241_v58 }
 0x2d5   :  { %2442 = vmatpush.msrb.mxu3 %v2399_v61  ;;  %2482 = vmatpush.msra.mxu1 %v2400_v44  ;;  %v2434_v61 = vunpack.c.h.bf16 %v4141_v52  ;;  %v4114_v44 = vld [vmem:[%s6889_s7 + $0x920] sm:$0xff] }
 0x2d6   :  { %2284 = vmatpush.msrb.mxu0 %v2238_v13  ;;  %2324 = vmatpush.msra.mxu2 %v2239_v20  ;;  %v2381_v13 = vunpack.c.l.bf16 %v4115_v35  ;;  %v2382_v20 = vunpack.c.h.bf16 %v4115_v35  ;;  %v2380_v2 = vunpack.c.h.bf16 %v4114_v44 }
 0x2d7   :  { %2443 = vmatpush.msrb.mxu3 %v2397_v51  ;;  %2483 = vmatpush.msra.mxu1 %v2398_v45  ;;  %v2431_v45 = vunpack.c.l.bf16 %v4140_v50 }
 0x2d8   :  { %2285 = vmatpush.msrb.mxu0 %v2236_v38  ;;  %2325 = vmatpush.msra.mxu2 %v2237_v30  ;;  %v4113_v38 = vld [vmem:[%s6889_s7 + $0x918] sm:$0xff]  ;;  %v2379_v30 = vunpack.c.l.bf16 %v4114_v44 }
 0x2d9   :  { %2444 = vmatpush.msrb.mxu3 %v2395_v5  ;;  %2484 = vmatpush.msra.mxu1 %v2396_v3  ;;  %v4138_v5 = vld [vmem:[%s6889_s7 + $0x9e0] sm:$0xff]  ;;  %v2430_v3 = vunpack.c.h.bf16 %v4139_v37 }
 0x2da   :  { %2286 = vmatpush.msrb.mxu0 %v2234_v23  ;;  %2326 = vmatpush.msra.mxu2 %v2235_v28  ;;  %v2377_v23 = vunpack.c.l.bf16 %v4113_v38  ;;  %v2378_v28 = vunpack.c.h.bf16 %v4113_v38 }
 0x2db   :  { %2445 = vmatpush.msrb.mxu3 %v2393_v39  ;;  %2485 = vmatpush.msra.mxu1 %v2394_v8  ;;  %v1565_v42 = vpop.f32.mrf.mxu0  ;;  %v2427_v39 = vunpack.c.l.bf16 %v4138_v5  ;;  %v2428_v8 = vunpack.c.h.bf16 %v4138_v5 }
 0x2dc   :  { %2287 = vmatpush.msrb.mxu0 %v2232_v47  ;;  %2327 = vmatpush.msra.mxu2 %v2233_v10  ;;  %v1566_v63 = vadd.f32 %v1565_v42, %v1545_v9  ;;  %v2375_v47 = vunpack.c.l.bf16 %v4112_v62  ;;  %v2376_v10 = vunpack.c.h.bf16 %v4112_v62  ;;  %v2424_v9 = vunpack.c.h.bf16 %v4136_v32  ;;  %v4149_v32 = vld [vmem:[%s6889_s7 + $0xa38] sm:$0xff] }
 0x2dd   :  { %2446 = vmatpush.msrb.mxu3 %v2391_v12  ;;  %2486 = vmatpush.msra.mxu1 %v2392_v21  ;;  %v2425_v12 = vunpack.c.l.bf16 %v4137_v15  ;;  %v2426_v21 = vunpack.c.h.bf16 %v4137_v15 }
 0x2de   :  { %2288 = vmatpush.msrb.mxu0 %v2230_v25  ;;  %2328 = vmatpush.msra.mxu2 %v2231_v29  ;;  %v6095_v40 = vadd.f32 %v1566_v63, %v5983_v18  ;;  %v2384_v18 = vunpack.c.h.bf16 %v4116_v53  ;;  %v2374_v25 = vunpack.c.h.bf16 %v4111_v7  ;;  %v4135_v29 = vld [vmem:[%s6889_s7 + $0x9c8] sm:$0xff]  ;;  %v2586_v63 = vunpack.c.l.bf16 %v4157_v19 }
 0x2df   :  { %2447 = vmatpush.msrb.mxu3 %v2389_v27  ;;  %2487 = vmatpush.msra.mxu1 %v2390_v17  ;;  %v2371_v27 = vunpack.c.l.bf16 %v4110_v22  ;;  %v2372_v17 = vunpack.c.h.bf16 %v4110_v22  ;;  %v2421_v42 = vunpack.c.l.bf16 %v4135_v29 }
 0x2e0   :  { %2289 = vmatpush.msrb.mxu0 %v2228_v26  ;;  %2329 = vmatpush.msra.mxu2 %v2229_v49  ;;  %v2422_v26 = vunpack.c.h.bf16 %v4135_v29  ;;  %v4156_v49 = vld [vmem:[%s6889_s7 + $0xa70] sm:$0xff] }
 0x2e1   :  { %2448 = vmatpush.msrb.mxu3 %v2387_v36  ;;  %2488 = vmatpush.msra.mxu1 %v2388_v4  ;;  %v1605_v16 = vpop.f32.mrf.mxu2  ;;  %v2587_v36 = vunpack.c.h.bf16 %v4157_v19  ;;  %v4133_v4 = vld [vmem:[%s6889_s7 + $0x9b8] sm:$0xff]  ;;  %v2584_v53 = vunpack.c.l.bf16 %v4156_v49 }
 0x2e2   :  { %2290 = vmatpush.msrb.mxu0 %v2226_v11  ;;  %2330 = vmatpush.msra.mxu2 %v2227_v55  ;;  %v1606_v58 = vadd.f32 %v1605_v16, %v1585_v1  ;;  %v2420_v11 = vunpack.c.h.bf16 %v4134_v31  ;;  %v4155_v55 = vld [vmem:[%s6889_s7 + $0xa68] sm:$0xff]  ;;  %v2417_v0 = vunpack.c.l.bf16 %v4133_v4  ;;  %v4153_v16 = vld [vmem:[%s6889_s7 + $0xa58] sm:$0xff] }
 0x2e3   :  { %2449 = vmatpush.msrb.mxu3 %v2385_v33  ;;  %2489 = vmatpush.msra.mxu1 %v2386_v54  ;;  %v2585_v33 = vunpack.c.h.bf16 %v4156_v49  ;;  %v4132_v54 = vld [vmem:[%s6889_s7 + $0x9b0] sm:$0xff]  ;;  %v2582_v52 = vunpack.c.l.bf16 %v4155_v55  ;;  %v2583_v1 = vunpack.c.h.bf16 %v4155_v55  ;;  %v4173_v31 = vld [vmem:[%s6889_s7 + $0xaf8] sm:$0xff] }
 0x2e4   :  { %2291 = vmatpush.msrb.mxu0 %v2224_v14  ;;  %2331 = vmatpush.msra.mxu2 %v2225_v34  ;;  %v6116_v51 = vadd.f32 %v1606_v58, %v6002_v59  ;;  %v2429_v59 = vunpack.c.l.bf16 %v4139_v37  ;;  %v2418_v14 = vunpack.c.h.bf16 %v4133_v4  ;;  %v4154_v34 = vld [vmem:[%s6889_s7 + $0xa60] sm:$0xff]  ;;  %v2416_v35 = vunpack.c.h.bf16 %v4132_v54 }
 0x2e5   :  { %2450 = vmatpush.msrb.mxu3 %v2383_v56  ;;  %2490 = vmatpush.msra.mxu1 %v2384_v18  ;;  %v4131_v56 = vld [vmem:[%s6889_s7 + $0x9a8] sm:$0xff]  ;;  %v2415_v18 = vunpack.c.l.bf16 %v4132_v54  ;;  %v2580_v50 = vunpack.c.l.bf16 %v4154_v34  ;;  %v2581_v58 = vunpack.c.h.bf16 %v4154_v34  ;;  %v2579_v37 = vunpack.c.h.bf16 %v4153_v16  ;;  %v4146_v4 = vld [vmem:[%s6889_s7 + $0xa20] sm:$0xff] }
 0x2e6   :  { %2292 = vmatmul.f32.vlgmr.msrb.gmra.mxu0 %v6110_v6  ;;  %2332 = vmatmul.f32.vlgmr.msra.gmra.mxu2 %v6110_v6  ;;  %v2414_v44 = vunpack.c.h.bf16 %v4131_v56  ;;  %v2565_v34 = vunpack.c.h.bf16 %v4146_v4 }
 0x2e7   :  { %2461 = vmatpush.msra.mxu0 %v2433_v60  ;;  %2501 = vmatpush.msrb.mxu2 %v2434_v61  ;;  %v4130_v60 = vld [vmem:[%s6889_s7 + $0x9a0] sm:$0xff]  ;;  %v2413_v61 = vunpack.c.l.bf16 %v4131_v56 }
 0x2e8   :  { %2451 = vmatpush.msrb.mxu3 %v2381_v13  ;;  %2491 = vmatpush.msra.mxu1 %v2382_v20  ;;  %v4152_v13 = vld [vmem:[%s6889_s7 + $0xa50] sm:$0xff]  ;;  %v2578_v20 = vunpack.c.l.bf16 %v4153_v16  ;;  %v2412_v38 = vunpack.c.h.bf16 %v4130_v60 }
 0x2e9   :  { %2462 = vmatpush.msra.mxu0 %v2431_v45  ;;  %2502 = vmatpush.msrb.mxu2 %v2432_v57  ;;  %v4129_v45 = vld [vmem:[%s6889_s7 + $0x998] sm:$0xff]  ;;  %v2411_v57 = vunpack.c.l.bf16 %v4130_v60  ;;  %v2577_v5 = vunpack.c.h.bf16 %v4152_v13 }
 0x2ea   :  { %2452 = vmatpush.msrb.mxu3 %v2379_v30  ;;  %2492 = vmatpush.msra.mxu1 %v2380_v2  ;;  %v4151_v30 = vld [vmem:[%s6889_s7 + $0xa48] sm:$0xff]  ;;  %v2576_v2 = vunpack.c.l.bf16 %v4152_v13  ;;  %v2410_v62 = vunpack.c.h.bf16 %v4129_v45 }
 0x2eb   :  { %2463 = vmatpush.msra.mxu0 %v2429_v59  ;;  %2503 = vmatpush.msrb.mxu2 %v2430_v3  ;;  %v4128_v59 = vld [vmem:[%s6889_s7 + $0x990] sm:$0xff]  ;;  %v2409_v3 = vunpack.c.l.bf16 %v4129_v45  ;;  %v2574_v15 = vunpack.c.l.bf16 %v4151_v30 }
 0x2ec   :  { %2453 = vmatpush.msrb.mxu3 %v2377_v23  ;;  %2493 = vmatpush.msra.mxu1 %v2378_v28  ;;  %v4150_v23 = vld [vmem:[%s6889_s7 + $0xa40] sm:$0xff] }
 0x2ed   :  { %2464 = vmatpush.msra.mxu0 %v2427_v39  ;;  %2504 = vmatpush.msrb.mxu2 %v2428_v8  ;;  %v2575_v39 = vunpack.c.h.bf16 %v4151_v30  ;;  %v4127_v8 = vld [vmem:[%s6889_s7 + $0x988] sm:$0xff]  ;;  %v2573_v22 = vunpack.c.h.bf16 %v4150_v23 }
 0x2ee   :  { %2454 = vmatpush.msrb.mxu3 %v2375_v47  ;;  %2494 = vmatpush.msra.mxu1 %v2376_v10  ;;  %v1728_v28 = vpop.f32.mrf.mxu3  ;;  %v2407_v47 = vunpack.c.l.bf16 %v4128_v59  ;;  %v2408_v10 = vunpack.c.h.bf16 %v4128_v59  ;;  %v2406_v29 = vunpack.c.h.bf16 %v4127_v8 }
 0x2ef   :  { %2465 = vmatpush.msra.mxu0 %v2425_v12  ;;  %2505 = vmatpush.msrb.mxu2 %v2426_v21  ;;  %v2572_v21 = vunpack.c.l.bf16 %v4150_v23  ;;  %v4189_v23 = vld [vmem:[%s6889_s7 + $0xb78] sm:$0xff] }
 0x2f0   :  { %2455 = vmatpush.msrb.mxu3 %v2373_v24  ;;  %2495 = vmatpush.msra.mxu1 %v2374_v25  ;;  %v4126_v24 = vld [vmem:[%s6889_s7 + $0x980] sm:$0xff]  ;;  %v2405_v25 = vunpack.c.l.bf16 %v4127_v8  ;;  %v4188_v8 = vld [vmem:[%s6889_s7 + $0xb70] sm:$0xff] }
 0x2f1   :  { %2466 = vmatpush.msra.mxu0 %v2423_v43  ;;  %2506 = vmatpush.msrb.mxu2 %v2424_v9  ;;  %v4148_v43 = vld [vmem:[%s6889_s7 + $0xa30] sm:$0xff]  ;;  %v2403_v19 = vunpack.c.l.bf16 %v4126_v24 }
 0x2f2   :  { %2456 = vmatpush.msrb.mxu3 %v2371_v27  ;;  %2496 = vmatpush.msra.mxu1 %v2372_v17  ;;  %v2570_v27 = vunpack.c.l.bf16 %v4149_v32  ;;  %v2571_v17 = vunpack.c.h.bf16 %v4149_v32  ;;  %v2569_v49 = vunpack.c.h.bf16 %v4148_v43  ;;  %v4165_v32 = vld [vmem:[%s6889_s7 + $0xab8] sm:$0xff] }
 0x2f3   :  { %2457 = vmatmul.f32.vlgmr.msrb.gmra.mxu3 %v2437_v48  ;;  %2467 = vmatpush.msra.mxu0 %v2421_v42  ;;  %v2404_v42 = vunpack.c.h.bf16 %v4126_v24  ;;  %v2767_v24 = vunpack.c.l.bf16 %v4188_v8 }
 0x2f4   :  { %2497 = vmatmul.f32.vlgmr.msra.gmra.mxu1 %v2437_v48  ;;  %2507 = vmatpush.msrb.mxu2 %v2422_v26  ;;  %v2568_v26 = vunpack.c.l.bf16 %v4148_v43  ;;  %v4172_v48 = vld [vmem:[%s6889_s7 + $0xaf0] sm:$0xff]  ;;  %v2602_v43 = vunpack.c.l.bf16 %v4165_v32 }
 0x2f5   :  { %2624 = vmatpush.msra.mxu3 %v2586_v63  ;;  %2664 = vmatpush.msrb.mxu1 %v2587_v36  ;;  %v2618_v63 = vunpack.c.l.bf16 %v4173_v31  ;;  %v2619_v36 = vunpack.c.h.bf16 %v4173_v31  ;;  %v2617_v54 = vunpack.c.h.bf16 %v4172_v48  ;;  %v4163_v31 = vld [vmem:[%s6889_s7 + $0xaa8] sm:$0xff] }
 0x2f6   :  { %2468 = vmatpush.msra.mxu0 %v2419_v46  ;;  %2508 = vmatpush.msrb.mxu2 %v2420_v11  ;;  %v2438_v46 = vrot.slane %v6110_v6, 1 }
 0x2f7   :  { %2625 = vmatpush.msra.mxu3 %v2584_v53  ;;  %2665 = vmatpush.msrb.mxu1 %v2585_v33  ;;  %v4171_v53 = vld [vmem:[%s6889_s7 + $0xae8] sm:$0xff]  ;;  %v2616_v33 = vunpack.c.l.bf16 %v4172_v48 }
 0x2f8   :  { %2469 = vmatpush.msra.mxu0 %v2417_v0  ;;  %2509 = vmatpush.msrb.mxu2 %v2418_v14  ;;  %v4145_v0 = vld [vmem:[%s6889_s7 + $0xa18] sm:$0xff]  ;;  %v2564_v14 = vunpack.c.l.bf16 %v4146_v4  ;;  %v2615_v56 = vunpack.c.h.bf16 %v4171_v53  ;;  %v2598_v4 = vunpack.c.l.bf16 %v4163_v31 }
 0x2f9   :  { %2626 = vmatpush.msra.mxu3 %v2582_v52  ;;  %2666 = vmatpush.msrb.mxu1 %v2583_v1  ;;  %v4170_v52 = vld [vmem:[%s6889_s7 + $0xae0] sm:$0xff]  ;;  %v2614_v1 = vunpack.c.l.bf16 %v4171_v53  ;;  %v2563_v16 = vunpack.c.h.bf16 %v4145_v0 }
 0x2fa   :  { %2470 = vmatpush.msra.mxu0 %v2415_v18  ;;  %2510 = vmatpush.msrb.mxu2 %v2416_v35  ;;  %v4144_v18 = vld [vmem:[%s6889_s7 + $0xa10] sm:$0xff]  ;;  %v2562_v35 = vunpack.c.l.bf16 %v4145_v0  ;;  %v2613_v60 = vunpack.c.h.bf16 %v4170_v52 }
 0x2fb   :  { %2627 = vmatpush.msra.mxu3 %v2580_v50  ;;  %2667 = vmatpush.msrb.mxu1 %v2581_v58  ;;  %v4169_v50 = vld [vmem:[%s6889_s7 + $0xad8] sm:$0xff]  ;;  %v2612_v58 = vunpack.c.l.bf16 %v4170_v52  ;;  %v2561_v13 = vunpack.c.h.bf16 %v4144_v18 }
 0x2fc   :  { %2471 = vmatpush.msra.mxu0 %v2413_v61  ;;  %2511 = vmatpush.msrb.mxu2 %v2414_v44  ;;  %v4143_v61 = vld [vmem:[%s6889_s7 + $0xa08] sm:$0xff]  ;;  %v2560_v44 = vunpack.c.l.bf16 %v4144_v18  ;;  %v2611_v45 = vunpack.c.h.bf16 %v4169_v50 }
 0x2fd   :  { %2628 = vmatpush.msra.mxu3 %v2578_v20  ;;  %2668 = vmatpush.msrb.mxu1 %v2579_v37  ;;  %v1748_v7 = vpop.f32.mrf.mxu0  ;;  %v4168_v20 = vld [vmem:[%s6889_s7 + $0xad0] sm:$0xff]  ;;  %v2610_v37 = vunpack.c.l.bf16 %v4169_v50  ;;  %v2559_v30 = vunpack.c.h.bf16 %v4143_v61 }
 0x2fe   :  { %2472 = vmatpush.msra.mxu0 %v2411_v57  ;;  %2512 = vmatpush.msrb.mxu2 %v2412_v38  ;;  %v1749_v12 = vadd.f32 %v1748_v7, %v1728_v28  ;;  %v4142_v57 = vld [vmem:[%s6889_s7 + $0xa00] sm:$0xff]  ;;  %v2558_v38 = vunpack.c.l.bf16 %v4143_v61  ;;  %v2609_v59 = vunpack.c.h.bf16 %v4168_v20  ;;  %v2620_v7 = vrot.slane %v6039_v41, 2 }
 0x2ff   :  { %2629 = vmatpush.msra.mxu3 %v2576_v2  ;;  %2669 = vmatpush.msrb.mxu1 %v2577_v5  ;;  %v4167_v2 = vld [vmem:[%s6889_s7 + $0xac8] sm:$0xff]  ;;  %v2608_v5 = vunpack.c.l.bf16 %v4168_v20 }
 0x300   :  { %2473 = vmatpush.msra.mxu0 %v2409_v3  ;;  %2513 = vmatpush.msrb.mxu2 %v2410_v62  ;;  %v6203_v9 = vadd.f32 %v1749_v12, %v6095_v40  ;;  %v4147_v40 = vld [vmem:[%s6889_s7 + $0xa28] sm:$0xff]  ;;  %v2556_v3 = vunpack.c.l.bf16 %v4142_v57  ;;  %v2557_v62 = vunpack.c.h.bf16 %v4142_v57  ;;  %v2606_v28 = vunpack.c.l.bf16 %v4167_v2 }
 0x301   :  { %2630 = vmatpush.msra.mxu3 %v2574_v15  ;;  %2670 = vmatpush.msrb.mxu1 %v2575_v39  ;;  %v2566_v11 = vunpack.c.l.bf16 %v4147_v40  ;;  %v2567_v55 = vunpack.c.h.bf16 %v4147_v40  ;;  %v4166_v15 = vld [vmem:[%s6889_s7 + $0xac0] sm:$0xff]  ;;  %v2607_v39 = vunpack.c.h.bf16 %v4167_v2  ;;  %v4185_v40 = vld [vmem:[%s6889_s7 + $0xb58] sm:$0xff] }
 0x302   :  { %2474 = vmatpush.msra.mxu0 %v2407_v47  ;;  %2514 = vmatpush.msrb.mxu2 %v2408_v10  ;;  %v2769_v47 = vunpack.c.l.bf16 %v4189_v23  ;;  %v2770_v10 = vunpack.c.h.bf16 %v4189_v23  ;;  %v2604_v12 = vunpack.c.l.bf16 %v4166_v15  ;;  %v2762_v53 = vunpack.c.h.bf16 %v4185_v40 }
 0x303   :  { %2631 = vmatpush.msra.mxu3 %v2572_v21  ;;  %2671 = vmatpush.msrb.mxu1 %v2573_v22  ;;  %v2605_v21 = vunpack.c.h.bf16 %v4166_v15  ;;  %v4187_v22 = vld [vmem:[%s6889_s7 + $0xb68] sm:$0xff]  ;;  %v4204_v15 = vld [vmem:[%s6889_s7 + $0xbf0] sm:$0xff] }
 0x304   :  { %2475 = vmatpush.msra.mxu0 %v2405_v25  ;;  %2515 = vmatpush.msrb.mxu2 %v2406_v29  ;;  %v2768_v25 = vunpack.c.h.bf16 %v4188_v8  ;;  %v4164_v29 = vld [vmem:[%s6889_s7 + $0xab0] sm:$0xff] }
 0x305   :  { %2632 = vmatpush.msra.mxu3 %v2570_v27  ;;  %2672 = vmatpush.msrb.mxu1 %v2571_v17  ;;  %v2603_v27 = vunpack.c.h.bf16 %v4165_v32  ;;  %v4186_v17 = vld [vmem:[%s6889_s7 + $0xb60] sm:$0xff] }
 0x306   :  { %2476 = vmatpush.msra.mxu0 %v2403_v19  ;;  %2516 = vmatpush.msrb.mxu2 %v2404_v42  ;;  %v2765_v19 = vunpack.c.l.bf16 %v4187_v22  ;;  %v2766_v42 = vunpack.c.h.bf16 %v4187_v22  ;;  %v2763_v48 = vunpack.c.l.bf16 %v4186_v17  ;;  %v2800_v22 = vunpack.c.h.bf16 %v4204_v15 }
 0x307   :  { %2633 = vmatpush.msra.mxu3 %v2568_v26  ;;  %2673 = vmatpush.msrb.mxu1 %v2569_v49  ;;  %v2600_v26 = vunpack.c.l.bf16 %v4164_v29  ;;  %v2601_v49 = vunpack.c.h.bf16 %v4164_v29 }
 0x308   :  { %2477 = vmatmul.f32.vlgmr.msra.gmra.mxu0 %v2438_v46  ;;  %2517 = vmatmul.f32.vlgmr.msrb.gmra.mxu2 %v2438_v46  ;;  %v2599_v46 = vunpack.c.h.bf16 %v4163_v31 }
 0x309   :  { %2644 = vmatpush.msrb.mxu0 %v2618_v63  ;;  %2684 = vmatpush.msra.mxu2 %v2619_v36  ;;  %v2764_v63 = vunpack.c.h.bf16 %v4186_v17  ;;  %v4162_v36 = vld [vmem:[%s6889_s7 + $0xaa0] sm:$0xff] }
 0x30a   :  { %2634 = vmatpush.msra.mxu3 %v2566_v11  ;;  %2674 = vmatpush.msrb.mxu1 %v2567_v55  ;;  %v4184_v11 = vld [vmem:[%s6889_s7 + $0xb50] sm:$0xff]  ;;  %v2761_v55 = vunpack.c.l.bf16 %v4185_v40  ;;  %v2597_v0 = vunpack.c.h.bf16 %v4162_v36 }
 0x30b   :  { %2645 = vmatpush.msrb.mxu0 %v2616_v33  ;;  %2685 = vmatpush.msra.mxu2 %v2617_v54  ;;  %v4161_v33 = vld [vmem:[%s6889_s7 + $0xa98] sm:$0xff]  ;;  %v2596_v54 = vunpack.c.l.bf16 %v4162_v36  ;;  %v2760_v52 = vunpack.c.h.bf16 %v4184_v11 }
 0x30c   :  { %2635 = vmatpush.msra.mxu3 %v2564_v14  ;;  %2675 = vmatpush.msrb.mxu1 %v2565_v34  ;;  %v4183_v14 = vld [vmem:[%s6889_s7 + $0xb48] sm:$0xff]  ;;  %v2759_v34 = vunpack.c.l.bf16 %v4184_v11  ;;  %v2595_v18 = vunpack.c.h.bf16 %v4161_v33 }
 0x30d   :  { %2646 = vmatpush.msrb.mxu0 %v2614_v1  ;;  %2686 = vmatpush.msra.mxu2 %v2615_v56  ;;  %v4160_v1 = vld [vmem:[%s6889_s7 + $0xa90] sm:$0xff]  ;;  %v2594_v56 = vunpack.c.l.bf16 %v4161_v33  ;;  %v2758_v50 = vunpack.c.h.bf16 %v4183_v14 }
 0x30e   :  { %2636 = vmatpush.msra.mxu3 %v2562_v35  ;;  %2676 = vmatpush.msrb.mxu1 %v2563_v16  ;;  %v4182_v35 = vld [vmem:[%s6889_s7 + $0xb40] sm:$0xff]  ;;  %v2757_v16 = vunpack.c.l.bf16 %v4183_v14  ;;  %v2593_v61 = vunpack.c.h.bf16 %v4160_v1 }
 0x30f   :  { %2647 = vmatpush.msrb.mxu0 %v2612_v58  ;;  %2687 = vmatpush.msra.mxu2 %v2613_v60  ;;  %v4159_v58 = vld [vmem:[%s6889_s7 + $0xa88] sm:$0xff]  ;;  %v2592_v60 = vunpack.c.l.bf16 %v4160_v1  ;;  %v2756_v20 = vunpack.c.h.bf16 %v4182_v35  ;;  %v4221_v1 = vld [vmem:[%s6889_s7 + $0xc78] sm:$0xff] }
 0x310   :  { %2637 = vmatpush.msra.mxu3 %v2560_v44  ;;  %2677 = vmatpush.msrb.mxu1 %v2561_v13  ;;  %v4181_v44 = vld [vmem:[%s6889_s7 + $0xb38] sm:$0xff]  ;;  %v2755_v13 = vunpack.c.l.bf16 %v4182_v35  ;;  %v2591_v57 = vunpack.c.h.bf16 %v4159_v58 }
 0x311   :  { %2648 = vmatpush.msrb.mxu0 %v2610_v37  ;;  %2688 = vmatpush.msra.mxu2 %v2611_v45  ;;  %v4158_v37 = vld [vmem:[%s6889_s7 + $0xa80] sm:$0xff]  ;;  %v2590_v45 = vunpack.c.l.bf16 %v4159_v58  ;;  %v2754_v2 = vunpack.c.h.bf16 %v4181_v44  ;;  %v2952_v58 = vunpack.c.l.bf16 %v4221_v1 }
 0x312   :  { %2638 = vmatpush.msra.mxu3 %v2558_v38  ;;  %2678 = vmatpush.msrb.mxu1 %v2559_v30  ;;  %v4180_v38 = vld [vmem:[%s6889_s7 + $0xb30] sm:$0xff]  ;;  %v2753_v30 = vunpack.c.l.bf16 %v4181_v44 }
 0x313   :  { %2649 = vmatpush.msrb.mxu0 %v2608_v5  ;;  %2689 = vmatpush.msra.mxu2 %v2609_v59  ;;  %v2588_v5 = vunpack.c.l.bf16 %v4158_v37  ;;  %v2589_v59 = vunpack.c.h.bf16 %v4158_v37  ;;  %v2752_v23 = vunpack.c.h.bf16 %v4180_v38 }
 0x314   :  { %2639 = vmatpush.msra.mxu3 %v2556_v3  ;;  %2679 = vmatpush.msrb.mxu1 %v2557_v62  ;;  %v4205_v3 = vld [vmem:[%s6889_s7 + $0xbf8] sm:$0xff]  ;;  %v2751_v62 = vunpack.c.l.bf16 %v4180_v38 }
 0x315   :  { %2640 = vmatmul.f32.vlgmr.msra.gmra.mxu3 %v2620_v7  ;;  %2650 = vmatpush.msrb.mxu0 %v2606_v28  ;;  %v4179_v28 = vld [vmem:[%s6889_s7 + $0xb28] sm:$0xff]  ;;  %v2802_v8 = vunpack.c.h.bf16 %v4205_v3 }
 0x316   :  { %2680 = vmatmul.f32.vlgmr.msrb.gmra.mxu1 %v2620_v7  ;;  %2690 = vmatpush.msra.mxu2 %v2607_v39  ;;  %v2801_v39 = vunpack.c.l.bf16 %v4205_v3  ;;  %v4178_v7 = vld [vmem:[%s6889_s7 + $0xb20] sm:$0xff]  ;;  %v2750_v32 = vunpack.c.h.bf16 %v4179_v28  ;;  %v4195_v3 = vld [vmem:[%s6889_s7 + $0xba8] sm:$0xff] }
 0x317   :  { %2807 = vmatpush.msrb.mxu3 %v2769_v47  ;;  %2847 = vmatpush.msra.mxu1 %v2770_v10  ;;  %v2621_v47 = vrot.slane %v6110_v6, 2  ;;  %v2749_v10 = vunpack.c.l.bf16 %v4179_v28  ;;  %v2748_v29 = vunpack.c.h.bf16 %v4178_v7  ;;  %v4217_v28 = vld [vmem:[%s6889_s7 + $0xc58] sm:$0xff] }
 0x318   :  { %2651 = vmatpush.msrb.mxu0 %v2604_v12  ;;  %2691 = vmatpush.msra.mxu2 %v2605_v21  ;;  %v4203_v12 = vld [vmem:[%s6889_s7 + $0xbe8] sm:$0xff]  ;;  %v2799_v21 = vunpack.c.l.bf16 %v4204_v15 }
 0x319   :  { %2808 = vmatpush.msrb.mxu3 %v2767_v24  ;;  %2848 = vmatpush.msra.mxu1 %v2768_v25  ;;  %v4177_v24 = vld [vmem:[%s6889_s7 + $0xb18] sm:$0xff]  ;;  %v2747_v25 = vunpack.c.l.bf16 %v4178_v7  ;;  %v2798_v17 = vunpack.c.h.bf16 %v4203_v12  ;;  %v2781_v7 = vunpack.c.l.bf16 %v4195_v3 }
 0x31a   :  { %2652 = vmatpush.msrb.mxu0 %v2602_v43  ;;  %2692 = vmatpush.msra.mxu2 %v2603_v27  ;;  %v4202_v43 = vld [vmem:[%s6889_s7 + $0xbe0] sm:$0xff]  ;;  %v2797_v27 = vunpack.c.l.bf16 %v4203_v12  ;;  %v2746_v31 = vunpack.c.h.bf16 %v4177_v24  ;;  %v2945_v12 = vunpack.c.h.bf16 %v4217_v28 }
 0x31b   :  { %2809 = vmatpush.msrb.mxu3 %v2765_v19  ;;  %2849 = vmatpush.msra.mxu1 %v2766_v42  ;;  %v4176_v19 = vld [vmem:[%s6889_s7 + $0xb10] sm:$0xff]  ;;  %v2745_v42 = vunpack.c.l.bf16 %v4177_v24  ;;  %v2796_v40 = vunpack.c.h.bf16 %v4202_v43 }
 0x31c   :  { %2653 = vmatpush.msrb.mxu0 %v2600_v26  ;;  %2693 = vmatpush.msra.mxu2 %v2601_v49  ;;  %v4201_v26 = vld [vmem:[%s6889_s7 + $0xbd8] sm:$0xff]  ;;  %v2795_v49 = vunpack.c.l.bf16 %v4202_v43  ;;  %v2744_v36 = vunpack.c.h.bf16 %v4176_v19 }
 0x31d   :  { %2810 = vmatpush.msrb.mxu3 %v2763_v48  ;;  %2850 = vmatpush.msra.mxu1 %v2764_v63  ;;  %v4175_v48 = vld [vmem:[%s6889_s7 + $0xb08] sm:$0xff]  ;;  %v2743_v63 = vunpack.c.l.bf16 %v4176_v19  ;;  %v2794_v11 = vunpack.c.h.bf16 %v4201_v26 }
 0x31e   :  { %2654 = vmatpush.msrb.mxu0 %v2598_v4  ;;  %2694 = vmatpush.msra.mxu2 %v2599_v46  ;;  %v4200_v4 = vld [vmem:[%s6889_s7 + $0xbd0] sm:$0xff]  ;;  %v2793_v46 = vunpack.c.l.bf16 %v4201_v26  ;;  %v2742_v33 = vunpack.c.h.bf16 %v4175_v48 }
 0x31f   :  { %2811 = vmatpush.msrb.mxu3 %v2761_v55  ;;  %2851 = vmatpush.msra.mxu1 %v2762_v53  ;;  %v4174_v55 = vld [vmem:[%s6889_s7 + $0xb00] sm:$0xff]  ;;  %v2741_v53 = vunpack.c.l.bf16 %v4175_v48  ;;  %v2792_v14 = vunpack.c.h.bf16 %v4200_v4 }
 0x320   :  { %2655 = vmatpush.msrb.mxu0 %v2596_v54  ;;  %2695 = vmatpush.msra.mxu2 %v2597_v0  ;;  %v4199_v54 = vld [vmem:[%s6889_s7 + $0xbc8] sm:$0xff]  ;;  %v2791_v0 = vunpack.c.l.bf16 %v4200_v4 }
 0x321   :  { %2812 = vmatpush.msrb.mxu3 %v2759_v34  ;;  %2852 = vmatpush.msra.mxu1 %v2760_v52  ;;  %v2739_v34 = vunpack.c.l.bf16 %v4174_v55  ;;  %v2740_v52 = vunpack.c.h.bf16 %v4174_v55  ;;  %v2790_v35 = vunpack.c.h.bf16 %v4199_v54 }
 0x322   :  { %2656 = vmatpush.msrb.mxu0 %v2594_v56  ;;  %2696 = vmatpush.msra.mxu2 %v2595_v18  ;;  %v2789_v56 = vunpack.c.l.bf16 %v4199_v54  ;;  %v4198_v18 = vld [vmem:[%s6889_s7 + $0xbc0] sm:$0xff] }
 0x323   :  { %2813 = vmatpush.msrb.mxu3 %v2757_v16  ;;  %2853 = vmatpush.msra.mxu1 %v2758_v50  ;;  %v4220_v16 = vld [vmem:[%s6889_s7 + $0xc70] sm:$0xff]  ;;  %v2803_v50 = vrot.slane %v6039_v41, 3  ;;  %v2787_v44 = vunpack.c.l.bf16 %v4198_v18 }
 0x324   :  { %2657 = vmatpush.msrb.mxu0 %v2592_v60  ;;  %2697 = vmatpush.msra.mxu2 %v2593_v61  ;;  %v2953_v60 = vunpack.c.h.bf16 %v4221_v1  ;;  %v4197_v61 = vld [vmem:[%s6889_s7 + $0xbb8] sm:$0xff]  ;;  %v2950_v37 = vunpack.c.l.bf16 %v4220_v16 }
 0x325   :  { %2814 = vmatpush.msrb.mxu3 %v2755_v13  ;;  %2854 = vmatpush.msra.mxu1 %v2756_v20  ;;  %v2788_v13 = vunpack.c.h.bf16 %v4198_v18  ;;  %v4219_v20 = vld [vmem:[%s6889_s7 + $0xc68] sm:$0xff]  ;;  %v2785_v38 = vunpack.c.l.bf16 %v4197_v61  ;;  %v4236_v18 = vld [vmem:[%s6889_s7 + $0xcf0] sm:$0xff] }
 0x326   :  { %2658 = vmatpush.msrb.mxu0 %v2590_v45  ;;  %2698 = vmatpush.msra.mxu2 %v2591_v57  ;;  %v2951_v45 = vunpack.c.h.bf16 %v4220_v16  ;;  %v4196_v57 = vld [vmem:[%s6889_s7 + $0xbb0] sm:$0xff] }
 0x327   :  { %2815 = vmatpush.msrb.mxu3 %v2753_v30  ;;  %2855 = vmatpush.msra.mxu1 %v2754_v2  ;;  %v2786_v30 = vunpack.c.h.bf16 %v4197_v61  ;;  %v4218_v2 = vld [vmem:[%s6889_s7 + $0xc60] sm:$0xff] }
 0x328   :  { %2659 = vmatpush.msrb.mxu0 %v2588_v5  ;;  %2699 = vmatpush.msra.mxu2 %v2589_v59  ;;  %v2948_v5 = vunpack.c.l.bf16 %v4219_v20  ;;  %v2949_v59 = vunpack.c.h.bf16 %v4219_v20  ;;  %v2946_v15 = vunpack.c.l.bf16 %v4218_v2  ;;  %v2983_v20 = vunpack.c.h.bf16 %v4236_v18 }
 0x329   :  { %2816 = vmatpush.msrb.mxu3 %v2751_v62  ;;  %2856 = vmatpush.msra.mxu1 %v2752_v23  ;;  %v2783_v62 = vunpack.c.l.bf16 %v4196_v57  ;;  %v2784_v23 = vunpack.c.h.bf16 %v4196_v57 }
 0x32a   :  { %2660 = vmatmul.f32.vlgmr.msrb.gmra.mxu0 %v2621_v47  ;;  %2700 = vmatmul.f32.vlgmr.msra.gmra.mxu2 %v2621_v47  ;;  %v2782_v47 = vunpack.c.h.bf16 %v4195_v3 }
 0x32b   :  { %2827 = vmatpush.msra.mxu0 %v2801_v39  ;;  %2867 = vmatpush.msrb.mxu2 %v2802_v8  ;;  %v2947_v39 = vunpack.c.h.bf16 %v4218_v2  ;;  %v4194_v8 = vld [vmem:[%s6889_s7 + $0xba0] sm:$0xff] }
 0x32c   :  { %2817 = vmatpush.msrb.mxu3 %v2749_v10  ;;  %2857 = vmatpush.msra.mxu1 %v2750_v32  ;;  %v4216_v10 = vld [vmem:[%s6889_s7 + $0xc50] sm:$0xff]  ;;  %v2944_v32 = vunpack.c.l.bf16 %v4217_v28  ;;  %v2780_v24 = vunpack.c.h.bf16 %v4194_v8 }
 0x32d   :  { %2828 = vmatpush.msra.mxu0 %v2799_v21  ;;  %2868 = vmatpush.msrb.mxu2 %v2800_v22  ;;  %v4193_v21 = vld [vmem:[%s6889_s7 + $0xb98] sm:$0xff]  ;;  %v2779_v22 = vunpack.c.l.bf16 %v4194_v8  ;;  %v2943_v43 = vunpack.c.h.bf16 %v4216_v10 }
 0x32e   :  { %2818 = vmatpush.msrb.mxu3 %v2747_v25  ;;  %2858 = vmatpush.msra.mxu1 %v2748_v29  ;;  %v4215_v25 = vld [vmem:[%s6889_s7 + $0xc48] sm:$0xff]  ;;  %v2942_v29 = vunpack.c.l.bf16 %v4216_v10  ;;  %v2778_v19 = vunpack.c.h.bf16 %v4193_v21 }
 0x32f   :  { %2829 = vmatpush.msra.mxu0 %v2797_v27  ;;  %2869 = vmatpush.msrb.mxu2 %v2798_v17  ;;  %v4192_v27 = vld [vmem:[%s6889_s7 + $0xb90] sm:$0xff]  ;;  %v2777_v17 = vunpack.c.l.bf16 %v4193_v21  ;;  %v2941_v26 = vunpack.c.h.bf16 %v4215_v25 }
 0x330   :  { %2819 = vmatpush.msrb.mxu3 %v2745_v42  ;;  %2859 = vmatpush.msra.mxu1 %v2746_v31  ;;  %v4214_v42 = vld [vmem:[%s6889_s7 + $0xc40] sm:$0xff]  ;;  %v2940_v31 = vunpack.c.l.bf16 %v4215_v25  ;;  %v2776_v48 = vunpack.c.h.bf16 %v4192_v27 }
 0x331   :  { %2830 = vmatpush.msra.mxu0 %v2795_v49  ;;  %2870 = vmatpush.msrb.mxu2 %v2796_v40  ;;  %v4191_v49 = vld [vmem:[%s6889_s7 + $0xb88] sm:$0xff]  ;;  %v2775_v40 = vunpack.c.l.bf16 %v4192_v27  ;;  %v2939_v4 = vunpack.c.h.bf16 %v4214_v42  ;;  %v4253_v27 = vld [vmem:[%s6889_s7 + $0xd78] sm:$0xff] }
 0x332   :  { %2820 = vmatpush.msrb.mxu3 %v2743_v63  ;;  %2860 = vmatpush.msra.mxu1 %v2744_v36  ;;  %v4213_v63 = vld [vmem:[%s6889_s7 + $0xc38] sm:$0xff]  ;;  %v2938_v36 = vunpack.c.l.bf16 %v4214_v42  ;;  %v2774_v55 = vunpack.c.h.bf16 %v4191_v49 }
 0x333   :  { %2831 = vmatpush.msra.mxu0 %v2793_v46  ;;  %2871 = vmatpush.msrb.mxu2 %v2794_v11  ;;  %v4190_v46 = vld [vmem:[%s6889_s7 + $0xb80] sm:$0xff]  ;;  %v2773_v11 = vunpack.c.l.bf16 %v4191_v49  ;;  %v2937_v54 = vunpack.c.h.bf16 %v4213_v63  ;;  %v3135_v49 = vunpack.c.l.bf16 %v4253_v27 }
 0x334   :  { %2821 = vmatpush.msrb.mxu3 %v2741_v53  ;;  %2861 = vmatpush.msra.mxu1 %v2742_v33  ;;  %v4212_v53 = vld [vmem:[%s6889_s7 + $0xc30] sm:$0xff]  ;;  %v2936_v33 = vunpack.c.l.bf16 %v4213_v63 }
 0x335   :  { %2832 = vmatpush.msra.mxu0 %v2791_v0  ;;  %2872 = vmatpush.msrb.mxu2 %v2792_v14  ;;  %v2771_v0 = vunpack.c.l.bf16 %v4190_v46  ;;  %v2772_v14 = vunpack.c.h.bf16 %v4190_v46  ;;  %v2935_v1 = vunpack.c.h.bf16 %v4212_v53 }
 0x336   :  { %2822 = vmatpush.msrb.mxu3 %v2739_v34  ;;  %2862 = vmatpush.msra.mxu1 %v2740_v52  ;;  %v4237_v34 = vld [vmem:[%s6889_s7 + $0xcf8] sm:$0xff]  ;;  %v2934_v52 = vunpack.c.l.bf16 %v4212_v53 }
 0x337   :  { %2823 = vmatmul.f32.vlgmr.msrb.gmra.mxu3 %v2803_v50  ;;  %2833 = vmatpush.msra.mxu0 %v2789_v56  ;;  %v4211_v56 = vld [vmem:[%s6889_s7 + $0xc28] sm:$0xff]  ;;  %v2985_v16 = vunpack.c.h.bf16 %v4237_v34 }
 0x338   :  { %2863 = vmatmul.f32.vlgmr.msra.gmra.mxu1 %v2803_v50  ;;  %2873 = vmatpush.msrb.mxu2 %v2790_v35  ;;  %v2984_v35 = vunpack.c.l.bf16 %v4237_v34  ;;  %v4210_v50 = vld [vmem:[%s6889_s7 + $0xc20] sm:$0xff]  ;;  %v2933_v61 = vunpack.c.h.bf16 %v4211_v56  ;;  %v4227_v34 = vld [vmem:[%s6889_s7 + $0xca8] sm:$0xff] }
 0x339   :  { %2990 = vmatpush.msra.mxu3 %v2952_v58  ;;  %3030 = vmatpush.msrb.mxu1 %v2953_v60  ;;  %v2804_v58 = vrot.slane %v6110_v6, 3  ;;  %v2932_v60 = vunpack.c.l.bf16 %v4211_v56  ;;  %v2931_v57 = vunpack.c.h.bf16 %v4210_v50  ;;  %v4249_v56 = vld [vmem:[%s6889_s7 + $0xd58] sm:$0xff] }
 0x33a   :  { %2834 = vmatpush.msra.mxu0 %v2787_v44  ;;  %2874 = vmatpush.msrb.mxu2 %v2788_v13  ;;  %v4235_v44 = vld [vmem:[%s6889_s7 + $0xce8] sm:$0xff]  ;;  %v2982_v13 = vunpack.c.l.bf16 %v4236_v18 }
 0x33b   :  { %2991 = vmatpush.msra.mxu3 %v2950_v37  ;;  %3031 = vmatpush.msrb.mxu1 %v2951_v45  ;;  %v4209_v37 = vld [vmem:[%s6889_s7 + $0xc18] sm:$0xff]  ;;  %v2930_v45 = vunpack.c.l.bf16 %v4210_v50  ;;  %v2981_v2 = vunpack.c.h.bf16 %v4235_v44  ;;  %v2964_v50 = vunpack.c.l.bf16 %v4227_v34 }
 0x33c   :  { %2835 = vmatpush.msra.mxu0 %v2785_v38  ;;  %2875 = vmatpush.msrb.mxu2 %v2786_v30  ;;  %v4234_v38 = vld [vmem:[%s6889_s7 + $0xce0] sm:$0xff]  ;;  %v2980_v30 = vunpack.c.l.bf16 %v4235_v44  ;;  %v2929_v3 = vunpack.c.h.bf16 %v4209_v37  ;;  %v3128_v44 = vunpack.c.h.bf16 %v4249_v56 }
 0x33d   :  { %2992 = vmatpush.msra.mxu3 %v2948_v5  ;;  %3032 = vmatpush.msrb.mxu1 %v2949_v59  ;;  %v4208_v5 = vld [vmem:[%s6889_s7 + $0xc10] sm:$0xff]  ;;  %v2928_v59 = vunpack.c.l.bf16 %v4209_v37  ;;  %v2979_v28 = vunpack.c.h.bf16 %v4234_v38 }
 0x33e   :  { %2836 = vmatpush.msra.mxu0 %v2783_v62  ;;  %2876 = vmatpush.msrb.mxu2 %v2784_v23  ;;  %v4233_v62 = vld [vmem:[%s6889_s7 + $0xcd8] sm:$0xff]  ;;  %v2978_v23 = vunpack.c.l.bf16 %v4234_v38  ;;  %v2927_v8 = vunpack.c.h.bf16 %v4208_v5 }
 0x33f   :  { %2993 = vmatpush.msra.mxu3 %v2946_v15  ;;  %3033 = vmatpush.msrb.mxu1 %v2947_v39  ;;  %v4207_v15 = vld [vmem:[%s6889_s7 + $0xc08] sm:$0xff]  ;;  %v2926_v39 = vunpack.c.l.bf16 %v4208_v5  ;;  %v2977_v10 = vunpack.c.h.bf16 %v4233_v62 }
 0x340   :  { %2837 = vmatpush.msra.mxu0 %v2781_v7  ;;  %2877 = vmatpush.msrb.mxu2 %v2782_v47  ;;  %v4232_v7 = vld [vmem:[%s6889_s7 + $0xcd0] sm:$0xff]  ;;  %v2976_v47 = vunpack.c.l.bf16 %v4233_v62  ;;  %v2925_v21 = vunpack.c.h.bf16 %v4207_v15 }
 0x341   :  { %2994 = vmatpush.msra.mxu3 %v2944_v32  ;;  %3034 = vmatpush.msrb.mxu1 %v2945_v12  ;;  %v4206_v32 = vld [vmem:[%s6889_s7 + $0xc00] sm:$0xff]  ;;  %v2924_v12 = vunpack.c.l.bf16 %v4207_v15  ;;  %v2975_v25 = vunpack.c.h.bf16 %v4232_v7 }
 0x342   :  { %2838 = vmatpush.msra.mxu0 %v2779_v22  ;;  %2878 = vmatpush.msrb.mxu2 %v2780_v24  ;;  %v4231_v22 = vld [vmem:[%s6889_s7 + $0xcc8] sm:$0xff]  ;;  %v2974_v24 = vunpack.c.l.bf16 %v4232_v7 }
 0x343   :  { %2995 = vmatpush.msra.mxu3 %v2942_v29  ;;  %3035 = vmatpush.msrb.mxu1 %v2943_v43  ;;  %v2922_v29 = vunpack.c.l.bf16 %v4206_v32  ;;  %v2923_v43 = vunpack.c.h.bf16 %v4206_v32  ;;  %v2973_v42 = vunpack.c.h.bf16 %v4231_v22 }
 0x344   :  { %2839 = vmatpush.msra.mxu0 %v2777_v17  ;;  %2879 = vmatpush.msrb.mxu2 %v2778_v19  ;;  %v2972_v17 = vunpack.c.l.bf16 %v4231_v22  ;;  %v4230_v19 = vld [vmem:[%s6889_s7 + $0xcc0] sm:$0xff] }
 0x345   :  { %2996 = vmatpush.msra.mxu3 %v2940_v31  ;;  %3036 = vmatpush.msrb.mxu1 %v2941_v26  ;;  %v4252_v31 = vld [vmem:[%s6889_s7 + $0xd70] sm:$0xff]  ;;  %v2986_v26 = vrot.slane %v6039_v41, 4  ;;  %v2970_v63 = vunpack.c.l.bf16 %v4230_v19 }
 0x346   :  { %2840 = vmatpush.msra.mxu0 %v2775_v40  ;;  %2880 = vmatpush.msrb.mxu2 %v2776_v48  ;;  %v3136_v40 = vunpack.c.h.bf16 %v4253_v27  ;;  %v4229_v48 = vld [vmem:[%s6889_s7 + $0xcb8] sm:$0xff]  ;;  %v3133_v46 = vunpack.c.l.bf16 %v4252_v31 }
 0x347   :  { %2997 = vmatpush.msra.mxu3 %v2938_v36  ;;  %3037 = vmatpush.msrb.mxu1 %v2939_v4  ;;  %v2971_v36 = vunpack.c.h.bf16 %v4230_v19  ;;  %v4251_v4 = vld [vmem:[%s6889_s7 + $0xd68] sm:$0xff]  ;;  %v2968_v53 = vunpack.c.l.bf16 %v4229_v48  ;;  %v4268_v19 = vld [vmem:[%s6889_s7 + $0xdf0] sm:$0xff] }
 0x348   :  { %2841 = vmatpush.msra.mxu0 %v2773_v11  ;;  %2881 = vmatpush.msrb.mxu2 %v2774_v55  ;;  %v3134_v11 = vunpack.c.h.bf16 %v4252_v31  ;;  %v4228_v55 = vld [vmem:[%s6889_s7 + $0xcb0] sm:$0xff] }
 0x349   :  { %2998 = vmatpush.msra.mxu3 %v2936_v33  ;;  %3038 = vmatpush.msrb.mxu1 %v2937_v54  ;;  %v2969_v33 = vunpack.c.h.bf16 %v4229_v48  ;;  %v4250_v54 = vld [vmem:[%s6889_s7 + $0xd60] sm:$0xff] }
 0x34a   :  { %2842 = vmatpush.msra.mxu0 %v2771_v0  ;;  %2882 = vmatpush.msrb.mxu2 %v2772_v14  ;;  %v3131_v0 = vunpack.c.l.bf16 %v4251_v4  ;;  %v3132_v14 = vunpack.c.h.bf16 %v4251_v4  ;;  %v3129_v18 = vunpack.c.l.bf16 %v4250_v54  ;;  %v3166_v4 = vunpack.c.h.bf16 %v4268_v19 }
 0x34b   :  { %2999 = vmatpush.msra.mxu3 %v2934_v52  ;;  %3039 = vmatpush.msrb.mxu1 %v2935_v1  ;;  %v2966_v52 = vunpack.c.l.bf16 %v4228_v55  ;;  %v2967_v1 = vunpack.c.h.bf16 %v4228_v55 }
 0x34c   :  { %2843 = vmatmul.f32.vlgmr.msra.gmra.mxu0 %v2804_v58  ;;  %2883 = vmatmul.f32.vlgmr.msrb.gmra.mxu2 %v2804_v58  ;;  %v2965_v58 = vunpack.c.h.bf16 %v4227_v34 }
 0x34d   :  { %3010 = vmatpush.msrb.mxu0 %v2984_v35  ;;  %3050 = vmatpush.msra.mxu2 %v2985_v16  ;;  %v3130_v35 = vunpack.c.h.bf16 %v4250_v54  ;;  %v4226_v16 = vld [vmem:[%s6889_s7 + $0xca0] sm:$0xff] }
 0x34e   :  { %3000 = vmatpush.msra.mxu3 %v2932_v60  ;;  %3040 = vmatpush.msrb.mxu1 %v2933_v61  ;;  %v4248_v60 = vld [vmem:[%s6889_s7 + $0xd50] sm:$0xff]  ;;  %v3127_v61 = vunpack.c.l.bf16 %v4249_v56  ;;  %v2963_v37 = vunpack.c.h.bf16 %v4226_v16 }
 0x34f   :  { %3011 = vmatpush.msrb.mxu0 %v2982_v13  ;;  %3051 = vmatpush.msra.mxu2 %v2983_v20  ;;  %v4225_v13 = vld [vmem:[%s6889_s7 + $0xc98] sm:$0xff]  ;;  %v2962_v20 = vunpack.c.l.bf16 %v4226_v16  ;;  %v3126_v38 = vunpack.c.h.bf16 %v4248_v60 }
 0x350   :  { %3001 = vmatpush.msra.mxu3 %v2930_v45  ;;  %3041 = vmatpush.msrb.mxu1 %v2931_v57  ;;  %v4247_v45 = vld [vmem:[%s6889_s7 + $0xd48] sm:$0xff]  ;;  %v3125_v57 = vunpack.c.l.bf16 %v4248_v60  ;;  %v2961_v5 = vunpack.c.h.bf16 %v4225_v13 }
 0x351   :  { %3012 = vmatpush.msrb.mxu0 %v2980_v30  ;;  %3052 = vmatpush.msra.mxu2 %v2981_v2  ;;  %v4224_v30 = vld [vmem:[%s6889_s7 + $0xc90] sm:$0xff]  ;;  %v2960_v2 = vunpack.c.l.bf16 %v4225_v13  ;;  %v3124_v62 = vunpack.c.h.bf16 %v4247_v45 }
 0x352   :  { %3002 = vmatpush.msra.mxu3 %v2928_v59  ;;  %3042 = vmatpush.msrb.mxu1 %v2929_v3  ;;  %v4246_v59 = vld [vmem:[%s6889_s7 + $0xd40] sm:$0xff]  ;;  %v3123_v3 = vunpack.c.l.bf16 %v4247_v45  ;;  %v2959_v15 = vunpack.c.h.bf16 %v4224_v30 }
 0x353   :  { %3013 = vmatpush.msrb.mxu0 %v2978_v23  ;;  %3053 = vmatpush.msra.mxu2 %v2979_v28  ;;  %v4223_v23 = vld [vmem:[%s6889_s7 + $0xc88] sm:$0xff]  ;;  %v2958_v28 = vunpack.c.l.bf16 %v4224_v30  ;;  %v3122_v7 = vunpack.c.h.bf16 %v4246_v59  ;;  %v4285_v30 = vld [vmem:[%s6889_s7 + $0xe78] sm:$0xff] }
 0x354   :  { %3003 = vmatpush.msra.mxu3 %v2926_v39  ;;  %3043 = vmatpush.msrb.mxu1 %v2927_v8  ;;  %v4245_v39 = vld [vmem:[%s6889_s7 + $0xd38] sm:$0xff]  ;;  %v3121_v8 = vunpack.c.l.bf16 %v4246_v59  ;;  %v2957_v32 = vunpack.c.h.bf16 %v4223_v23 }
 0x355   :  { %3014 = vmatpush.msrb.mxu0 %v2976_v47  ;;  %3054 = vmatpush.msra.mxu2 %v2977_v10  ;;  %v4222_v47 = vld [vmem:[%s6889_s7 + $0xc80] sm:$0xff]  ;;  %v2956_v10 = vunpack.c.l.bf16 %v4223_v23  ;;  %v3120_v22 = vunpack.c.h.bf16 %v4245_v39  ;;  %v3318_v23 = vunpack.c.l.bf16 %v4285_v30 }
 0x356   :  { %3004 = vmatpush.msra.mxu3 %v2924_v12  ;;  %3044 = vmatpush.msrb.mxu1 %v2925_v21  ;;  %v4244_v12 = vld [vmem:[%s6889_s7 + $0xd30] sm:$0xff]  ;;  %v3119_v21 = vunpack.c.l.bf16 %v4245_v39 }
 0x357   :  { %3015 = vmatpush.msrb.mxu0 %v2974_v24  ;;  %3055 = vmatpush.msra.mxu2 %v2975_v25  ;;  %v2954_v24 = vunpack.c.l.bf16 %v4222_v47  ;;  %v2955_v25 = vunpack.c.h.bf16 %v4222_v47  ;;  %v3118_v27 = vunpack.c.h.bf16 %v4244_v12 }
 0x358   :  { %3005 = vmatpush.msra.mxu3 %v2922_v29  ;;  %3045 = vmatpush.msrb.mxu1 %v2923_v43  ;;  %v4269_v29 = vld [vmem:[%s6889_s7 + $0xdf8] sm:$0xff]  ;;  %v3117_v43 = vunpack.c.l.bf16 %v4244_v12 }
 0x359   :  { %3006 = vmatmul.f32.vlgmr.msra.gmra.mxu3 %v2986_v26  ;;  %3016 = vmatpush.msrb.mxu0 %v2972_v17  ;;  %v4243_v17 = vld [vmem:[%s6889_s7 + $0xd28] sm:$0xff]  ;;  %v3168_v31 = vunpack.c.h.bf16 %v4269_v29 }
 0x35a   :  { %3046 = vmatmul.f32.vlgmr.msrb.gmra.mxu1 %v2986_v26  ;;  %3056 = vmatpush.msra.mxu2 %v2973_v42  ;;  %v3167_v42 = vunpack.c.l.bf16 %v4269_v29  ;;  %v4242_v26 = vld [vmem:[%s6889_s7 + $0xd20] sm:$0xff]  ;;  %v3116_v48 = vunpack.c.h.bf16 %v4243_v17  ;;  %v4259_v29 = vld [vmem:[%s6889_s7 + $0xda8] sm:$0xff] }
 0x35b   :  { %3173 = vmatpush.msrb.mxu3 %v3135_v49  ;;  %3213 = vmatpush.msra.mxu1 %v3136_v40  ;;  %v2987_v49 = vrot.slane %v6110_v6, 4  ;;  %v3115_v40 = vunpack.c.l.bf16 %v4243_v17  ;;  %v3114_v55 = vunpack.c.h.bf16 %v4242_v26  ;;  %v4281_v17 = vld [vmem:[%s6889_s7 + $0xe58] sm:$0xff] }
 0x35c   :  { %3017 = vmatpush.msrb.mxu0 %v2970_v63  ;;  %3057 = vmatpush.msra.mxu2 %v2971_v36  ;;  %v4267_v63 = vld [vmem:[%s6889_s7 + $0xde8] sm:$0xff]  ;;  %v3165_v36 = vunpack.c.l.bf16 %v4268_v19 }
 0x35d   :  { %3174 = vmatpush.msrb.mxu3 %v3133_v46  ;;  %3214 = vmatpush.msra.mxu1 %v3134_v11  ;;  %v4241_v46 = vld [vmem:[%s6889_s7 + $0xd18] sm:$0xff]  ;;  %v3113_v11 = vunpack.c.l.bf16 %v4242_v26  ;;  %v3164_v54 = vunpack.c.h.bf16 %v4267_v63  ;;  %v3147_v26 = vunpack.c.l.bf16 %v4259_v29 }
 0x35e   :  { %3018 = vmatpush.msrb.mxu0 %v2968_v53  ;;  %3058 = vmatpush.msra.mxu2 %v2969_v33  ;;  %v4266_v53 = vld [vmem:[%s6889_s7 + $0xde0] sm:$0xff]  ;;  %v3163_v33 = vunpack.c.l.bf16 %v4267_v63  ;;  %v3112_v34 = vunpack.c.h.bf16 %v4241_v46  ;;  %v3311_v63 = vunpack.c.h.bf16 %v4281_v17 }
 0x35f   :  { %3175 = vmatpush.msrb.mxu3 %v3131_v0  ;;  %3215 = vmatpush.msra.mxu1 %v3132_v14  ;;  %v4240_v0 = vld [vmem:[%s6889_s7 + $0xd10] sm:$0xff]  ;;  %v3111_v14 = vunpack.c.l.bf16 %v4241_v46  ;;  %v3162_v56 = vunpack.c.h.bf16 %v4266_v53 }
 0x360   :  { %3019 = vmatpush.msrb.mxu0 %v2966_v52  ;;  %3059 = vmatpush.msra.mxu2 %v2967_v1  ;;  %v4265_v52 = vld [vmem:[%s6889_s7 + $0xdd8] sm:$0xff]  ;;  %v3161_v1 = vunpack.c.l.bf16 %v4266_v53  ;;  %v3110_v16 = vunpack.c.h.bf16 %v4240_v0 }
 0x361   :  { %3176 = vmatpush.msrb.mxu3 %v3129_v18  ;;  %3216 = vmatpush.msra.mxu1 %v3130_v35  ;;  %v4239_v18 = vld [vmem:[%s6889_s7 + $0xd08] sm:$0xff]  ;;  %v3109_v35 = vunpack.c.l.bf16 %v4240_v0  ;;  %v3160_v60 = vunpack.c.h.bf16 %v4265_v52 }
 0x362   :  { %3020 = vmatpush.msrb.mxu0 %v2964_v50  ;;  %3060 = vmatpush.msra.mxu2 %v2965_v58  ;;  %v4264_v50 = vld [vmem:[%s6889_s7 + $0xdd0] sm:$0xff]  ;;  %v3159_v58 = vunpack.c.l.bf16 %v4265_v52  ;;  %v3108_v13 = vunpack.c.h.bf16 %v4239_v18 }
 0x363   :  { %3177 = vmatpush.msrb.mxu3 %v3127_v61  ;;  %3217 = vmatpush.msra.mxu1 %v3128_v44  ;;  %v4238_v61 = vld [vmem:[%s6889_s7 + $0xd00] sm:$0xff]  ;;  %v3107_v44 = vunpack.c.l.bf16 %v4239_v18  ;;  %v3158_v45 = vunpack.c.h.bf16 %v4264_v50 }
 0x364   :  { %3021 = vmatpush.msrb.mxu0 %v2962_v20  ;;  %3061 = vmatpush.msra.mxu2 %v2963_v37  ;;  %v4263_v20 = vld [vmem:[%s6889_s7 + $0xdc8] sm:$0xff]  ;;  %v3157_v37 = vunpack.c.l.bf16 %v4264_v50 }
 0x365   :  { %3178 = vmatpush.msrb.mxu3 %v3125_v57  ;;  %3218 = vmatpush.msra.mxu1 %v3126_v38  ;;  %v3105_v57 = vunpack.c.l.bf16 %v4238_v61  ;;  %v3106_v38 = vunpack.c.h.bf16 %v4238_v61  ;;  %v3156_v59 = vunpack.c.h.bf16 %v4263_v20 }
 0x366   :  { %3022 = vmatpush.msrb.mxu0 %v2960_v2  ;;  %3062 = vmatpush.msra.mxu2 %v2961_v5  ;;  %v3155_v2 = vunpack.c.l.bf16 %v4263_v20  ;;  %v4262_v5 = vld [vmem:[%s6889_s7 + $0xdc0] sm:$0xff] }
 0x367   :  { %3179 = vmatpush.msrb.mxu3 %v3123_v3  ;;  %3219 = vmatpush.msra.mxu1 %v3124_v62  ;;  %v4284_v3 = vld [vmem:[%s6889_s7 + $0xe70] sm:$0xff]  ;;  %v3169_v62 = vrot.slane %v6039_v41, 5  ;;  %v3153_v39 = vunpack.c.l.bf16 %v4262_v5 }
 0x368   :  { %3023 = vmatpush.msrb.mxu0 %v2958_v28  ;;  %3063 = vmatpush.msra.mxu2 %v2959_v15  ;;  %v3319_v28 = vunpack.c.h.bf16 %v4285_v30  ;;  %v4261_v15 = vld [vmem:[%s6889_s7 + $0xdb8] sm:$0xff]  ;;  %v3316_v47 = vunpack.c.l.bf16 %v4284_v3 }
 0x369   :  { %3180 = vmatpush.msrb.mxu3 %v3121_v8  ;;  %3220 = vmatpush.msra.mxu1 %v3122_v7  ;;  %v3154_v8 = vunpack.c.h.bf16 %v4262_v5  ;;  %v4283_v7 = vld [vmem:[%s6889_s7 + $0xe68] sm:$0xff]  ;;  %v3151_v12 = vunpack.c.l.bf16 %v4261_v15  ;;  %v4300_v5 = vld [vmem:[%s6889_s7 + $0xef0] sm:$0xff] }
 0x36a   :  { %3024 = vmatpush.msrb.mxu0 %v2956_v10  ;;  %3064 = vmatpush.msra.mxu2 %v2957_v32  ;;  %v3317_v10 = vunpack.c.h.bf16 %v4284_v3  ;;  %v4260_v32 = vld [vmem:[%s6889_s7 + $0xdb0] sm:$0xff] }
 0x36b   :  { %3181 = vmatpush.msrb.mxu3 %v3119_v21  ;;  %3221 = vmatpush.msra.mxu1 %v3120_v22  ;;  %v3152_v21 = vunpack.c.h.bf16 %v4261_v15  ;;  %v4282_v22 = vld [vmem:[%s6889_s7 + $0xe60] sm:$0xff] }
 0x36c   :  { %3025 = vmatpush.msrb.mxu0 %v2954_v24  ;;  %3065 = vmatpush.msra.mxu2 %v2955_v25  ;;  %v3314_v24 = vunpack.c.l.bf16 %v4283_v7  ;;  %v3315_v25 = vunpack.c.h.bf16 %v4283_v7  ;;  %v3312_v19 = vunpack.c.l.bf16 %v4282_v22  ;;  %v3349_v7 = vunpack.c.h.bf16 %v4300_v5 }
 0x36d   :  { %3182 = vmatpush.msrb.mxu3 %v3117_v43  ;;  %3222 = vmatpush.msra.mxu1 %v3118_v27  ;;  %v3149_v43 = vunpack.c.l.bf16 %v4260_v32  ;;  %v3150_v27 = vunpack.c.h.bf16 %v4260_v32 }
 0x36e   :  { %3026 = vmatmul.f32.vlgmr.msrb.gmra.mxu0 %v2987_v49  ;;  %3066 = vmatmul.f32.vlgmr.msra.gmra.mxu2 %v2987_v49  ;;  %v3148_v49 = vunpack.c.h.bf16 %v4259_v29 }
 0x36f   :  { %3193 = vmatpush.msra.mxu0 %v3167_v42  ;;  %3233 = vmatpush.msrb.mxu2 %v3168_v31  ;;  %v3313_v42 = vunpack.c.h.bf16 %v4282_v22  ;;  %v4258_v31 = vld [vmem:[%s6889_s7 + $0xda0] sm:$0xff] }
 0x370   :  { %3183 = vmatpush.msrb.mxu3 %v3115_v40  ;;  %3223 = vmatpush.msra.mxu1 %v3116_v48  ;;  %v4280_v40 = vld [vmem:[%s6889_s7 + $0xe50] sm:$0xff]  ;;  %v3310_v48 = vunpack.c.l.bf16 %v4281_v17  ;;  %v3146_v46 = vunpack.c.h.bf16 %v4258_v31 }
 0x371   :  { %3194 = vmatpush.msra.mxu0 %v3165_v36  ;;  %3234 = vmatpush.msrb.mxu2 %v3166_v4  ;;  %v4257_v36 = vld [vmem:[%s6889_s7 + $0xd98] sm:$0xff]  ;;  %v3145_v4 = vunpack.c.l.bf16 %v4258_v31  ;;  %v3309_v53 = vunpack.c.h.bf16 %v4280_v40 }
 0x372   :  { %3184 = vmatpush.msrb.mxu3 %v3113_v11  ;;  %3224 = vmatpush.msra.mxu1 %v3114_v55  ;;  %v4279_v11 = vld [vmem:[%s6889_s7 + $0xe48] sm:$0xff]  ;;  %v3308_v55 = vunpack.c.l.bf16 %v4280_v40  ;;  %v3144_v0 = vunpack.c.h.bf16 %v4257_v36 }
 0x373   :  { %3195 = vmatpush.msra.mxu0 %v3163_v33  ;;  %3235 = vmatpush.msrb.mxu2 %v3164_v54  ;;  %v4256_v33 = vld [vmem:[%s6889_s7 + $0xd90] sm:$0xff]  ;;  %v3143_v54 = vunpack.c.l.bf16 %v4257_v36  ;;  %v3307_v52 = vunpack.c.h.bf16 %v4279_v11 }
 0x374   :  { %3185 = vmatpush.msrb.mxu3 %v3111_v14  ;;  %3225 = vmatpush.msra.mxu1 %v3112_v34  ;;  %v4278_v14 = vld [vmem:[%s6889_s7 + $0xe40] sm:$0xff]  ;;  %v3306_v34 = vunpack.c.l.bf16 %v4279_v11  ;;  %v3142_v18 = vunpack.c.h.bf16 %v4256_v33 }
 0x375   :  { %3196 = vmatpush.msra.mxu0 %v3161_v1  ;;  %3236 = vmatpush.msrb.mxu2 %v3162_v56  ;;  %v4255_v1 = vld [vmem:[%s6889_s7 + $0xd88] sm:$0xff]  ;;  %v3141_v56 = vunpack.c.l.bf16 %v4256_v33  ;;  %v3305_v50 = vunpack.c.h.bf16 %v4278_v14  ;;  %v4317_v33 = vld [vmem:[%s6889_s7 + $0xf78] sm:$0xff] }
 0x376   :  { %3186 = vmatpush.msrb.mxu3 %v3109_v35  ;;  %3226 = vmatpush.msra.mxu1 %v3110_v16  ;;  %v4277_v35 = vld [vmem:[%s6889_s7 + $0xe38] sm:$0xff]  ;;  %v3304_v16 = vunpack.c.l.bf16 %v4278_v14  ;;  %v3140_v61 = vunpack.c.h.bf16 %v4255_v1 }
 0x377   :  { %3197 = vmatpush.msra.mxu0 %v3159_v58  ;;  %3237 = vmatpush.msrb.mxu2 %v3160_v60  ;;  %v4254_v58 = vld [vmem:[%s6889_s7 + $0xd80] sm:$0xff]  ;;  %v3139_v60 = vunpack.c.l.bf16 %v4255_v1  ;;  %v3303_v20 = vunpack.c.h.bf16 %v4277_v35  ;;  %v3501_v1 = vunpack.c.l.bf16 %v4317_v33 }
 0x378   :  { %3187 = vmatpush.msrb.mxu3 %v3107_v44  ;;  %3227 = vmatpush.msra.mxu1 %v3108_v13  ;;  %v4276_v44 = vld [vmem:[%s6889_s7 + $0xe30] sm:$0xff]  ;;  %v3302_v13 = vunpack.c.l.bf16 %v4277_v35 }
 0x379   :  { %3198 = vmatpush.msra.mxu0 %v3157_v37  ;;  %3238 = vmatpush.msrb.mxu2 %v3158_v45  ;;  %v3137_v37 = vunpack.c.l.bf16 %v4254_v58  ;;  %v3138_v45 = vunpack.c.h.bf16 %v4254_v58  ;;  %v3301_v30 = vunpack.c.h.bf16 %v4276_v44 }
 0x37a   :  { %3188 = vmatpush.msrb.mxu3 %v3105_v57  ;;  %3228 = vmatpush.msra.mxu1 %v3106_v38  ;;  %v4301_v57 = vld [vmem:[%s6889_s7 + $0xef8] sm:$0xff]  ;;  %v3300_v38 = vunpack.c.l.bf16 %v4276_v44 }
 0x37b   :  { %3189 = vmatmul.f32.vlgmr.msrb.gmra.mxu3 %v3169_v62  ;;  %3199 = vmatpush.msra.mxu0 %v3155_v2  ;;  %v4275_v2 = vld [vmem:[%s6889_s7 + $0xe28] sm:$0xff]  ;;  %v3351_v3 = vunpack.c.h.bf16 %v4301_v57 }
 0x37c   :  { %3229 = vmatmul.f32.vlgmr.msra.gmra.mxu1 %v3169_v62  ;;  %3239 = vmatpush.msrb.mxu2 %v3156_v59  ;;  %v3350_v59 = vunpack.c.l.bf16 %v4301_v57  ;;  %v4274_v62 = vld [vmem:[%s6889_s7 + $0xe20] sm:$0xff]  ;;  %v3299_v15 = vunpack.c.h.bf16 %v4275_v2  ;;  %v4291_v57 = vld [vmem:[%s6889_s7 + $0xea8] sm:$0xff] }
 0x37d   :  { %3356 = vmatpush.msra.mxu3 %v3318_v23  ;;  %3396 = vmatpush.msrb.mxu1 %v3319_v28  ;;  %v3170_v23 = vrot.slane %v6110_v6, 5  ;;  %v3298_v28 = vunpack.c.l.bf16 %v4275_v2  ;;  %v3297_v32 = vunpack.c.h.bf16 %v4274_v62  ;;  %v4313_v2 = vld [vmem:[%s6889_s7 + $0xf58] sm:$0xff] }
 0x37e   :  { %3200 = vmatpush.msra.mxu0 %v3153_v39  ;;  %3240 = vmatpush.msrb.mxu2 %v3154_v8  ;;  %v4299_v39 = vld [vmem:[%s6889_s7 + $0xee8] sm:$0xff]  ;;  %v3348_v8 = vunpack.c.l.bf16 %v4300_v5 }
 0x37f   :  { %3357 = vmatpush.msra.mxu3 %v3316_v47  ;;  %3397 = vmatpush.msrb.mxu1 %v3317_v10  ;;  %v4273_v47 = vld [vmem:[%s6889_s7 + $0xe18] sm:$0xff]  ;;  %v3296_v10 = vunpack.c.l.bf16 %v4274_v62  ;;  %v3347_v22 = vunpack.c.h.bf16 %v4299_v39  ;;  %v3330_v62 = vunpack.c.l.bf16 %v4291_v57 }
 0x380   :  { %3201 = vmatpush.msra.mxu0 %v3151_v12  ;;  %3241 = vmatpush.msrb.mxu2 %v3152_v21  ;;  %v4298_v12 = vld [vmem:[%s6889_s7 + $0xee0] sm:$0xff]  ;;  %v3346_v21 = vunpack.c.l.bf16 %v4299_v39  ;;  %v3295_v29 = vunpack.c.h.bf16 %v4273_v47  ;;  %v3494_v39 = vunpack.c.h.bf16 %v4313_v2 }
 0x381   :  { %3358 = vmatpush.msra.mxu3 %v3314_v24  ;;  %3398 = vmatpush.msrb.mxu1 %v3315_v25  ;;  %v4272_v24 = vld [vmem:[%s6889_s7 + $0xe10] sm:$0xff]  ;;  %v3294_v25 = vunpack.c.l.bf16 %v4273_v47  ;;  %v3345_v17 = vunpack.c.h.bf16 %v4298_v12 }
 0x382   :  { %3202 = vmatpush.msra.mxu0 %v3149_v43  ;;  %3242 = vmatpush.msrb.mxu2 %v3150_v27  ;;  %v4297_v43 = vld [vmem:[%s6889_s7 + $0xed8] sm:$0xff]  ;;  %v3344_v27 = vunpack.c.l.bf16 %v4298_v12  ;;  %v3293_v31 = vunpack.c.h.bf16 %v4272_v24 }
 0x383   :  { %3359 = vmatpush.msra.mxu3 %v3312_v19  ;;  %3399 = vmatpush.msrb.mxu1 %v3313_v42  ;;  %v4271_v19 = vld [vmem:[%s6889_s7 + $0xe08] sm:$0xff]  ;;  %v3292_v42 = vunpack.c.l.bf16 %v4272_v24  ;;  %v3343_v40 = vunpack.c.h.bf16 %v4297_v43 }
 0x384   :  { %3203 = vmatpush.msra.mxu0 %v3147_v26  ;;  %3243 = vmatpush.msrb.mxu2 %v3148_v49  ;;  %v4296_v26 = vld [vmem:[%s6889_s7 + $0xed0] sm:$0xff]  ;;  %v3342_v49 = vunpack.c.l.bf16 %v4297_v43  ;;  %v3291_v36 = vunpack.c.h.bf16 %v4271_v19 }
 0x385   :  { %3360 = vmatpush.msra.mxu3 %v3310_v48  ;;  %3400 = vmatpush.msrb.mxu1 %v3311_v63  ;;  %v4270_v48 = vld [vmem:[%s6889_s7 + $0xe00] sm:$0xff]  ;;  %v3290_v63 = vunpack.c.l.bf16 %v4271_v19  ;;  %v3341_v11 = vunpack.c.h.bf16 %v4296_v26 }
 0x386   :  { %3204 = vmatpush.msra.mxu0 %v3145_v4  ;;  %3244 = vmatpush.msrb.mxu2 %v3146_v46  ;;  %v4295_v4 = vld [vmem:[%s6889_s7 + $0xec8] sm:$0xff]  ;;  %v3340_v46 = vunpack.c.l.bf16 %v4296_v26 }
 0x387   :  { %3361 = vmatpush.msra.mxu3 %v3308_v55  ;;  %3401 = vmatpush.msrb.mxu1 %v3309_v53  ;;  %v3288_v55 = vunpack.c.l.bf16 %v4270_v48  ;;  %v3289_v53 = vunpack.c.h.bf16 %v4270_v48  ;;  %v3339_v14 = vunpack.c.h.bf16 %v4295_v4 }
 0x388   :  { %3205 = vmatpush.msra.mxu0 %v3143_v54  ;;  %3245 = vmatpush.msrb.mxu2 %v3144_v0  ;;  %v3338_v54 = vunpack.c.l.bf16 %v4295_v4  ;;  %v4294_v0 = vld [vmem:[%s6889_s7 + $0xec0] sm:$0xff] }
 0x389   :  { %3362 = vmatpush.msra.mxu3 %v3306_v34  ;;  %3402 = vmatpush.msrb.mxu1 %v3307_v52  ;;  %v4316_v34 = vld [vmem:[%s6889_s7 + $0xf70] sm:$0xff]  ;;  %v3352_v52 = vrot.slane %v6039_v41, 6  ;;  %v3336_v35 = vunpack.c.l.bf16 %v4294_v0 }
 0x38a   :  { %3206 = vmatpush.msra.mxu0 %v3141_v56  ;;  %3246 = vmatpush.msrb.mxu2 %v3142_v18  ;;  %v3502_v56 = vunpack.c.h.bf16 %v4317_v33  ;;  %v4293_v18 = vld [vmem:[%s6889_s7 + $0xeb8] sm:$0xff]  ;;  %v3499_v58 = vunpack.c.l.bf16 %v4316_v34 }
 0x38b   :  { %3363 = vmatpush.msra.mxu3 %v3304_v16  ;;  %3403 = vmatpush.msrb.mxu1 %v3305_v50  ;;  %v3337_v16 = vunpack.c.h.bf16 %v4294_v0  ;;  %v4315_v50 = vld [vmem:[%s6889_s7 + $0xf68] sm:$0xff]  ;;  %v3334_v44 = vunpack.c.l.bf16 %v4293_v18  ;;  %v4332_v0 = vld [vmem:[%s6889_s7 + $0xff0] sm:$0xff] }
 0x38c   :  { %3207 = vmatpush.msra.mxu0 %v3139_v60  ;;  %3247 = vmatpush.msrb.mxu2 %v3140_v61  ;;  %v3500_v60 = vunpack.c.h.bf16 %v4316_v34  ;;  %v4292_v61 = vld [vmem:[%s6889_s7 + $0xeb0] sm:$0xff] }
 0x38d   :  { %3364 = vmatpush.msra.mxu3 %v3302_v13  ;;  %3404 = vmatpush.msrb.mxu1 %v3303_v20  ;;  %v3335_v13 = vunpack.c.h.bf16 %v4293_v18  ;;  %v4314_v20 = vld [vmem:[%s6889_s7 + $0xf60] sm:$0xff] }
 0x38e   :  { %3208 = vmatpush.msra.mxu0 %v3137_v37  ;;  %3248 = vmatpush.msrb.mxu2 %v3138_v45  ;;  %v3497_v37 = vunpack.c.l.bf16 %v4315_v50  ;;  %v3498_v45 = vunpack.c.h.bf16 %v4315_v50  ;;  %v3495_v5 = vunpack.c.l.bf16 %v4314_v20  ;;  %v3532_v50 = vunpack.c.h.bf16 %v4332_v0 }
 0x38f   :  { %3365 = vmatpush.msra.mxu3 %v3300_v38  ;;  %3405 = vmatpush.msrb.mxu1 %v3301_v30  ;;  %v3332_v38 = vunpack.c.l.bf16 %v4292_v61  ;;  %v3333_v30 = vunpack.c.h.bf16 %v4292_v61 }
 0x390   :  { %3209 = vmatmul.f32.vlgmr.msra.gmra.mxu0 %v3170_v23  ;;  %3249 = vmatmul.f32.vlgmr.msrb.gmra.mxu2 %v3170_v23  ;;  %v3331_v23 = vunpack.c.h.bf16 %v4291_v57 }
 0x391   :  { %3376 = vmatpush.msrb.mxu0 %v3350_v59  ;;  %3416 = vmatpush.msra.mxu2 %v3351_v3  ;;  %v3496_v59 = vunpack.c.h.bf16 %v4314_v20  ;;  %v4290_v3 = vld [vmem:[%s6889_s7 + $0xea0] sm:$0xff] }
 0x392   :  { %3366 = vmatpush.msra.mxu3 %v3298_v28  ;;  %3406 = vmatpush.msrb.mxu1 %v3299_v15  ;;  %v4312_v28 = vld [vmem:[%s6889_s7 + $0xf50] sm:$0xff]  ;;  %v3493_v15 = vunpack.c.l.bf16 %v4313_v2  ;;  %v3329_v47 = vunpack.c.h.bf16 %v4290_v3 }
 0x393   :  { %3377 = vmatpush.msrb.mxu0 %v3348_v8  ;;  %3417 = vmatpush.msra.mxu2 %v3349_v7  ;;  %v4289_v8 = vld [vmem:[%s6889_s7 + $0xe98] sm:$0xff]  ;;  %v3328_v7 = vunpack.c.l.bf16 %v4290_v3  ;;  %v3492_v12 = vunpack.c.h.bf16 %v4312_v28 }
 0x394   :  { %3367 = vmatpush.msra.mxu3 %v3296_v10  ;;  %3407 = vmatpush.msrb.mxu1 %v3297_v32  ;;  %v4311_v10 = vld [vmem:[%s6889_s7 + $0xf48] sm:$0xff]  ;;  %v3491_v32 = vunpack.c.l.bf16 %v4312_v28  ;;  %v3327_v24 = vunpack.c.h.bf16 %v4289_v8 }
 0x395   :  { %3378 = vmatpush.msrb.mxu0 %v3346_v21  ;;  %3418 = vmatpush.msra.mxu2 %v3347_v22  ;;  %v4288_v21 = vld [vmem:[%s6889_s7 + $0xe90] sm:$0xff]  ;;  %v3326_v22 = vunpack.c.l.bf16 %v4289_v8  ;;  %v3490_v43 = vunpack.c.h.bf16 %v4311_v10 }
 0x396   :  { %3368 = vmatpush.msra.mxu3 %v3294_v25  ;;  %3408 = vmatpush.msrb.mxu1 %v3295_v29  ;;  %v4310_v25 = vld [vmem:[%s6889_s7 + $0xf40] sm:$0xff]  ;;  %v3489_v29 = vunpack.c.l.bf16 %v4311_v10  ;;  %v3325_v19 = vunpack.c.h.bf16 %v4288_v21 }
 0x397   :  { %3379 = vmatpush.msrb.mxu0 %v3344_v27  ;;  %3419 = vmatpush.msra.mxu2 %v3345_v17  ;;  %v4287_v27 = vld [vmem:[%s6889_s7 + $0xe88] sm:$0xff]  ;;  %v3324_v17 = vunpack.c.l.bf16 %v4288_v21  ;;  %v3488_v26 = vunpack.c.h.bf16 %v4310_v25  ;;  %v4326_v21 = vld [vmem:[%s6889_s7 + $0xfc0] sm:$0xff] }
 0x398   :  { %3369 = vmatpush.msra.mxu3 %v3292_v42  ;;  %3409 = vmatpush.msrb.mxu1 %v3293_v31  ;;  %v4309_v42 = vld [vmem:[%s6889_s7 + $0xf38] sm:$0xff]  ;;  %v3487_v31 = vunpack.c.l.bf16 %v4310_v25  ;;  %v3323_v48 = vunpack.c.h.bf16 %v4287_v27 }
 0x399   :  { %3380 = vmatpush.msrb.mxu0 %v3342_v49  ;;  %3420 = vmatpush.msra.mxu2 %v3343_v40  ;;  %v4286_v49 = vld [vmem:[%s6889_s7 + $0xe80] sm:$0xff]  ;;  %v3322_v40 = vunpack.c.l.bf16 %v4287_v27  ;;  %v3486_v4 = vunpack.c.h.bf16 %v4309_v42  ;;  %v4325_v25 = vld [vmem:[%s6889_s7 + $0xfb8] sm:$0xff]  ;;  %v3636_v27 = vld [vmem:[%s6891_s9 + $0x70] sm:$0xff] }
 0x39a   :  { %3370 = vmatpush.msra.mxu3 %v3290_v63  ;;  %3410 = vmatpush.msrb.mxu1 %v3291_v36  ;;  %v4308_v63 = vld [vmem:[%s6889_s7 + $0xf30] sm:$0xff]  ;;  %v3485_v36 = vunpack.c.l.bf16 %v4309_v42  ;;  %v3517_v42 = vunpack.c.l.bf16 %v4325_v25 }
 0x39b   :  { %3381 = vmatpush.msrb.mxu0 %v3340_v46  ;;  %3421 = vmatpush.msra.mxu2 %v3341_v11  ;;  %v3320_v46 = vunpack.c.l.bf16 %v4286_v49  ;;  %v3321_v11 = vunpack.c.h.bf16 %v4286_v49  ;;  %v3484_v33 = vunpack.c.h.bf16 %v4308_v63 }
 0x39c   :  { %3371 = vmatpush.msra.mxu3 %v3288_v55  ;;  %3411 = vmatpush.msrb.mxu1 %v3289_v53  ;;  %v4333_v55 = vld [vmem:[%s6889_s7 + $0xff8] sm:$0xff]  ;;  %v3483_v53 = vunpack.c.l.bf16 %v4308_v63  ;;  %v4322_v63 = vld [vmem:[%s6889_s7 + $0xfa0] sm:$0xff] }
 0x39d   :  { %3372 = vmatmul.f32.vlgmr.msra.gmra.mxu3 %v3352_v52  ;;  %3382 = vmatpush.msrb.mxu0 %v3338_v54  ;;  %v4307_v54 = vld [vmem:[%s6889_s7 + $0xf28] sm:$0xff]  ;;  %v3534_v34 = vunpack.c.h.bf16 %v4333_v55 }
 0x39e   :  { %3412 = vmatmul.f32.vlgmr.msrb.gmra.mxu1 %v3352_v52  ;;  %3422 = vmatpush.msra.mxu2 %v3339_v14  ;;  %v3533_v14 = vunpack.c.l.bf16 %v4333_v55  ;;  %v4306_v52 = vld [vmem:[%s6889_s7 + $0xf20] sm:$0xff]  ;;  %v3482_v18 = vunpack.c.h.bf16 %v4307_v54  ;;  %v3511_v55 = vunpack.c.l.bf16 %v4322_v63 }
 0x39f   :  { %3539 = vmatpush.msrb.mxu3 %v3501_v1  ;;  %3579 = vmatpush.msra.mxu1 %v3502_v56  ;;  %v3353_v1 = vrot.slane %v6110_v6, 6  ;;  %v3481_v56 = vunpack.c.l.bf16 %v4307_v54  ;;  %v3480_v61 = vunpack.c.h.bf16 %v4306_v52  ;;  %v4320_v54 = vld [vmem:[%s6889_s7 + $0xf90] sm:$0xff] }
 0x3a0   :  { %3383 = vmatpush.msrb.mxu0 %v3336_v35  ;;  %3423 = vmatpush.msra.mxu2 %v3337_v16  ;;  %v4331_v35 = vld [vmem:[%s6889_s7 + $0xfe8] sm:$0xff]  ;;  %v3531_v16 = vunpack.c.l.bf16 %v4332_v0 }
 0x3a1   :  { %3540 = vmatpush.msrb.mxu3 %v3499_v58  ;;  %3580 = vmatpush.msra.mxu1 %v3500_v60  ;;  %v4305_v58 = vld [vmem:[%s6889_s7 + $0xf18] sm:$0xff]  ;;  %v3479_v60 = vunpack.c.l.bf16 %v4306_v52  ;;  %v3530_v20 = vunpack.c.h.bf16 %v4331_v35  ;;  %v4319_v52 = vld [vmem:[%s6889_s7 + $0xf88] sm:$0xff] }
 0x3a2   :  { %3384 = vmatpush.msrb.mxu0 %v3334_v44  ;;  %3424 = vmatpush.msra.mxu2 %v3335_v13  ;;  %v4330_v44 = vld [vmem:[%s6889_s7 + $0xfe0] sm:$0xff]  ;;  %v3529_v13 = vunpack.c.l.bf16 %v4331_v35  ;;  %v3478_v57 = vunpack.c.h.bf16 %v4305_v58 }
 0x3a3   :  { %3541 = vmatpush.msrb.mxu3 %v3497_v37  ;;  %3581 = vmatpush.msra.mxu1 %v3498_v45  ;;  %v4304_v37 = vld [vmem:[%s6889_s7 + $0xf10] sm:$0xff]  ;;  %v3477_v45 = vunpack.c.l.bf16 %v4305_v58  ;;  %v3528_v2 = vunpack.c.h.bf16 %v4330_v44  ;;  %v4318_v35 = vld [vmem:[%s6889_s7 + $0xf80] sm:$0xff]  ;;  %v3506_v58 = vunpack.c.h.bf16 %v4319_v52 }
 0x3a4   :  { %3385 = vmatpush.msrb.mxu0 %v3332_v38  ;;  %3425 = vmatpush.msra.mxu2 %v3333_v30  ;;  %v4329_v38 = vld [vmem:[%s6889_s7 + $0xfd8] sm:$0xff]  ;;  %v3527_v30 = vunpack.c.l.bf16 %v4330_v44  ;;  %v3476_v3 = vunpack.c.h.bf16 %v4304_v37  ;;  %v3504_v44 = vunpack.c.h.bf16 %v4318_v35 }
 0x3a5   :  { %3542 = vmatpush.msrb.mxu3 %v3495_v5  ;;  %3582 = vmatpush.msra.mxu1 %v3496_v59  ;;  %v4303_v5 = vld [vmem:[%s6889_s7 + $0xf08] sm:$0xff]  ;;  %v3475_v59 = vunpack.c.l.bf16 %v4304_v37  ;;  %v3526_v28 = vunpack.c.h.bf16 %v4329_v38 }
 0x3a6   :  { %3386 = vmatpush.msrb.mxu0 %v3330_v62  ;;  %3426 = vmatpush.msra.mxu2 %v3331_v23  ;;  %v4328_v62 = vld [vmem:[%s6889_s7 + $0xfd0] sm:$0xff]  ;;  %v3525_v23 = vunpack.c.l.bf16 %v4329_v38  ;;  %v3474_v8 = vunpack.c.h.bf16 %v4303_v5  ;;  %v3635_v37 = vld [vmem:[%s6891_s9 + $0x68] sm:$0xff]  ;;  %v4513_v38 = vld [vmem:[%s6884_s2] ss:$0 sm:$0xff] }
 0x3a7   :  { %3543 = vmatpush.msrb.mxu3 %v3493_v15  ;;  %3583 = vmatpush.msra.mxu1 %v3494_v39  ;;  %v4302_v15 = vld [vmem:[%s6889_s7 + $0xf00] sm:$0xff]  ;;  %v3473_v39 = vunpack.c.l.bf16 %v4303_v5  ;;  %v3524_v10 = vunpack.c.h.bf16 %v4328_v62  ;;  %v3623_v5 = vld [vmem:[%s6891_s9 + $0x8] sm:$0xff] }
 0x3a8   :  { %3387 = vmatpush.msrb.mxu0 %v3328_v7  ;;  %3427 = vmatpush.msra.mxu2 %v3329_v47  ;;  %v4327_v7 = vld [vmem:[%s6889_s7 + $0xfc8] sm:$0xff]  ;;  %v3523_v47 = vunpack.c.l.bf16 %v4328_v62 }
 0x3a9   :  { %3544 = vmatpush.msrb.mxu3 %v3491_v32  ;;  %3584 = vmatpush.msra.mxu1 %v3492_v12  ;;  %v3471_v32 = vunpack.c.l.bf16 %v4302_v15  ;;  %v3472_v12 = vunpack.c.h.bf16 %v4302_v15 }
 0x3aa   :  { %3388 = vmatpush.msrb.mxu0 %v3326_v22  ;;  %3428 = vmatpush.msra.mxu2 %v3327_v24  ;;  %v3521_v22 = vunpack.c.l.bf16 %v4327_v7  ;;  %v3522_v24 = vunpack.c.h.bf16 %v4327_v7  ;;  %v1768_v7 = vpop.f32.mrf.mxu1 }
 0x3ab   :  { %3545 = vmatpush.msrb.mxu3 %v3489_v29  ;;  %3585 = vmatpush.msra.mxu1 %v3490_v43  ;;  %v3535_v29 = vrot.slane %v6039_v41, 7  ;;  %v3519_v43 = vunpack.c.l.bf16 %v4326_v21  ;;  %v3634_v41 = vld [vmem:[%s6891_s9 + $0x60] sm:$0xff] }
 0x3ac   :  { %3389 = vmatpush.msrb.mxu0 %v3324_v17  ;;  %3429 = vmatpush.msra.mxu2 %v3325_v19  ;;  %v3520_v17 = vunpack.c.h.bf16 %v4326_v21  ;;  %v4324_v19 = vld [vmem:[%s6889_s7 + $0xfb0] sm:$0xff] }
 0x3ad   :  { %3546 = vmatpush.msrb.mxu3 %v3487_v31  ;;  %3586 = vmatpush.msra.mxu1 %v3488_v26  ;;  %v3518_v31 = vunpack.c.h.bf16 %v4325_v25  ;;  %v4323_v26 = vld [vmem:[%s6889_s7 + $0xfa8] sm:$0xff]  ;;  %v3515_v49 = vunpack.c.l.bf16 %v4324_v19 }
 0x3ae   :  { %3390 = vmatpush.msrb.mxu0 %v3322_v40  ;;  %3430 = vmatpush.msra.mxu2 %v3323_v48  ;;  %v3632_v40 = vld [vmem:[%s6891_s9 + $0x50] sm:$0xff]  ;;  %v3516_v48 = vunpack.c.h.bf16 %v4324_v19 }
 0x3af   :  { %3547 = vmatpush.msrb.mxu3 %v3485_v36  ;;  %3587 = vmatpush.msra.mxu1 %v3486_v4  ;;  %v3513_v36 = vunpack.c.l.bf16 %v4323_v26  ;;  %v3630_v4 = vld [vmem:[%s6891_s9 + $0x40] sm:$0xff] }
 0x3b0   :  { %3391 = vmatpush.msrb.mxu0 %v3320_v46  ;;  %3431 = vmatpush.msra.mxu2 %v3321_v11  ;;  %v3514_v46 = vunpack.c.h.bf16 %v4323_v26  ;;  %v4321_v11 = vld [vmem:[%s6889_s7 + $0xf98] sm:$0xff]  ;;  %s3824_s7 = sshll.u32 %s6899_s17, 4  ;;  %s3825_s7 = int_to_ptr.hbm [resolvable:$true] %s3824_s7 }
 0x3b1   :  { %3548 = vmatpush.msrb.mxu3 %v3483_v53  ;;  %3588 = vmatpush.msra.mxu1 %v3484_v33  ;;  %v3628_v53 = vld [vmem:[%s6891_s9 + $0x30] sm:$0xff]  ;;  %v3512_v33 = vunpack.c.h.bf16 %v4322_v63  ;;  %v3509_v0 = vunpack.c.l.bf16 %v4321_v11 }
 0x3b2   :  { %3392 = vmatmul.f32.vlgmr.msrb.gmra.mxu0 %v3353_v1  ;;  %3432 = vmatmul.f32.vlgmr.msra.gmra.mxu2 %v3353_v1  ;;  %v3507_v1 = vunpack.c.l.bf16 %v4320_v54 }
 0x3b3   :  { %3559 = vmatpush.msra.mxu0 %v3533_v14  ;;  %3599 = vmatpush.msrb.mxu2 %v3534_v34  ;;  %v3626_v14 = vld [vmem:[%s6891_s9 + $0x20] sm:$0xff]  ;;  %v3510_v34 = vunpack.c.h.bf16 %v4321_v11 }
 0x3b4   :  { %3549 = vmatpush.msrb.mxu3 %v3481_v56  ;;  %3589 = vmatpush.msra.mxu1 %v3482_v18  ;;  %v3624_v56 = vld [vmem:[%s6891_s9 + $0x10] sm:$0xff]  ;;  %v3508_v18 = vunpack.c.h.bf16 %v4320_v54 }
 0x3b5   :  { %3560 = vmatpush.msra.mxu0 %v3531_v16  ;;  %3600 = vmatpush.msrb.mxu2 %v3532_v50  ;;  %v3505_v16 = vunpack.c.l.bf16 %v4319_v52  ;;  %v3622_v50 = vld [vmem:[%s6891_s9] sm:$0xff] }
 0x3b6   :  { %3550 = vmatpush.msrb.mxu3 %v3479_v60  ;;  %3590 = vmatpush.msra.mxu1 %v3480_v61  ;;  %v3621_v60 = vld [vmem:[%s6884_s2] sm:$0x1]  ;;  %v3503_v61 = vunpack.c.l.bf16 %v4318_v35 }
 0x3b7   :  { %3561 = vmatpush.msra.mxu0 %v3529_v13  ;;  %3601 = vmatpush.msrb.mxu2 %v3530_v20  ;;  %v3536_v13 = vrot.slane %v6110_v6, 7  ;;  %v3637_v20 = vld [vmem:[%s6891_s9 + $0x78] sm:$0xff]  ;;  %v3631_v6 = vld [vmem:[%s6891_s9 + $0x48] sm:$0xff] }
 0x3b8   :  { %3551 = vmatpush.msrb.mxu3 %v3477_v45  ;;  %3591 = vmatpush.msra.mxu1 %v3478_v57  ;;  %v3633_v45 = vld [vmem:[%s6891_s9 + $0x58] sm:$0xff] }
 0x3b9   :  { %3562 = vmatpush.msra.mxu0 %v3527_v30  ;;  %3602 = vmatpush.msrb.mxu2 %v3528_v2  ;;  %v3629_v57 = vld [vmem:[%s6891_s9 + $0x38] sm:$0xff]  ;;  %v3627_v30 = vld [vmem:[%s6891_s9 + $0x28] sm:$0xff] }
 0x3ba   :  { %3552 = vmatpush.msrb.mxu3 %v3475_v59  ;;  %3592 = vmatpush.msra.mxu1 %v3476_v3  ;;  %v3625_v2 = vld [vmem:[%s6891_s9 + $0x18] sm:$0xff]  ;;  %v1911_v59 = vpop.f32.mrf.mxu3  ;;  %v1931_v3 = vpop.f32.mrf.mxu0 }
 0x3bb   :  { %3563 = vmatpush.msra.mxu0 %v3525_v23  ;;  %3603 = vmatpush.msrb.mxu2 %v3526_v28 }
 0x3bc   :  { %3553 = vmatpush.msrb.mxu3 %v3473_v39  ;;  %3593 = vmatpush.msra.mxu1 %v3474_v8  ;;  %v1788_v8 = vpop.f32.mrf.mxu2 }
 0x3bd   :  { %3564 = vmatpush.msra.mxu0 %v3523_v47  ;;  %3604 = vmatpush.msrb.mxu2 %v3524_v10 }
 0x3be   :  { %3554 = vmatpush.msrb.mxu3 %v3471_v32  ;;  %3594 = vmatpush.msra.mxu1 %v3472_v12  ;;  %v1951_v12 = vpop.f32.mrf.mxu1 }
 0x3bf   :  { %3555 = vmatmul.f32.vlgmr.msrb.gmra.mxu3 %v3535_v29  ;;  %3565 = vmatpush.msra.mxu0 %v3521_v22 }
 0x3c0   :  { %3595 = vmatmul.f32.vlgmr.msra.gmra.mxu1 %v3535_v29  ;;  %3605 = vmatpush.msrb.mxu2 %v3522_v24 }
 0x3c1   :  { %3656 = vmatpush.msra.mxu3 %v3636_v27  ;;  %3566 = vmatpush.msra.mxu0 %v3519_v43 }
 0x3c2   :  { %3606 = vmatpush.msrb.mxu2 %v3520_v17  ;;  %3718 = vrot.lane.b32.xlu0 %v4513_v38, %s4585_s3  ;;  %v2094_v62 = vpop.f32.mrf.mxu3  ;;  %v2114_v23 = vpop.f32.mrf.mxu0 }
 0x3c3   :  { %3657 = vmatpush.msra.mxu3 %v3634_v41  ;;  %3567 = vmatpush.msra.mxu0 %v3517_v42  ;;  %v1932_v41 = vadd.f32 %v1931_v3, %v1911_v59  ;;  %v2115_v26 = vadd.f32 %v2114_v23, %v2094_v62 }
 0x3c4   :  { %3607 = vmatpush.msrb.mxu2 %v3518_v31  ;;  %v1971_v32 = vpop.f32.mrf.mxu2 }
 0x3c5   :  { %3658 = vmatpush.msra.mxu3 %v3632_v40  ;;  %3568 = vmatpush.msra.mxu0 %v3515_v49  ;;  %v1972_v59 = vadd.f32 %v1971_v32, %v1951_v12 }
 0x3c6   :  { %3608 = vmatpush.msrb.mxu2 %v3516_v48  ;;  %v2134_v25 = vpop.f32.mrf.mxu1  ;;  %v1974_v48 = vadd.f32 %v1932_v41, %v6203_v9  ;;  %v3638_v9 = vld [vmem:[%s6893_s11] sm:$0x3] }
 0x3c7   :  { %3659 = vmatpush.msra.mxu3 %v3630_v4  ;;  %3569 = vmatpush.msra.mxu0 %v3513_v36 }
 0x3c8   :  { %3609 = vmatpush.msrb.mxu2 %v3514_v46  ;;  %v2157_v36 = vadd.f32 %v2115_v26, %v1974_v48 }
 0x3c9   :  { %3660 = vmatpush.msra.mxu3 %v3628_v53  ;;  %3570 = vmatpush.msra.mxu0 %v3511_v55 }
 0x3ca   :  { %3610 = vmatpush.msrb.mxu2 %v3512_v33  ;;  %v2273_v28 = vpop.f32.mrf.mxu3  ;;  %v2293_v15 = vpop.f32.mrf.mxu0 }
 0x3cb   :  { %3661 = vmatpush.msra.mxu3 %v3626_v14  ;;  %3571 = vmatpush.msra.mxu0 %v3509_v0  ;;  %v2294_v63 = vadd.f32 %v2293_v15, %v2273_v28 }
 0x3cc   :  { %3611 = vmatpush.msrb.mxu2 %v3510_v34  ;;  %v2154_v24 = vpop.f32.mrf.mxu2 }
 0x3cd   :  { %3662 = vmatpush.msra.mxu3 %v3624_v56  ;;  %3572 = vmatpush.msra.mxu0 %v3507_v1  ;;  %v2336_v11 = vadd.f32 %v2294_v63, %v2157_v36  ;;  %v2155_v23 = vadd.f32 %v2154_v24, %v2134_v25  ;;  %v3641_v25 = vperm.slane %v3638_v9, 1 }
 0x3ce   :  { %3612 = vmatpush.msrb.mxu2 %v3508_v18  ;;  %v2313_v17 = vpop.f32.mrf.mxu1 }
 0x3cf   :  { %3663 = vmatpush.msra.mxu3 %v3622_v50  ;;  %3573 = vmatpush.msra.mxu0 %v3505_v16 }
 0x3d0   :  { %4334 = vmatmul.msk.f32.vlgmr.msra.gmra.mxu3 %vm3644_vm12, %v3621_v60  ;;  %3613 = vmatpush.msrb.mxu2 %v3506_v58 }
 0x3d1   :  { %3574 = vmatpush.msra.mxu0 %v3503_v61 }
 0x3d2   :  { %3614 = vmatpush.msrb.mxu2 %v3504_v44  ;;  %3575 = vmatmul.f32.vlgmr.msra.gmra.mxu0 %v3536_v13  ;;  %v2458_v39 = vpop.f32.mrf.mxu3  ;;  %v2478_v47 = vpop.f32.mrf.mxu0 }
 0x3d3   :  { %3615 = vmatmul.f32.vlgmr.msrb.gmra.mxu2 %v3536_v13  ;;  %3676 = vmatpush.msrb.mxu0 %v3637_v20  ;;  %v2479_v4 = vadd.f32 %v2478_v47, %v2458_v39  ;;  %v3640_v20 = vperm.slane %v3638_v9, 0  ;;  %v3727_v9 = vld [vmem:[%s6894_s12 + $0x18] sm:$0xff] }
 0x3d4   :  { %v2333_v27 = vpop.f32.mrf.mxu2 }
 0x3d5   :  { %3677 = vmatpush.msrb.mxu0 %v3635_v37  ;;  %v2521_v33 = vadd.f32 %v2479_v4, %v2336_v11  ;;  %v2334_v47 = vadd.f32 %v2333_v27, %v2313_v17 }
 0x3d6   :  { %v2498_v49 = vpop.f32.mrf.mxu1 }
 0x3d7   :  { %3678 = vmatpush.msrb.mxu0 %v3633_v45 }
 0x3d9   :  { %3679 = vmatpush.msrb.mxu0 %v3631_v6 }
 0x3da   :  { %v2641_v10 = vpop.f32.mrf.mxu3  ;;  %v2661_v21 = vpop.f32.mrf.mxu0 }
 0x3db   :  { %3680 = vmatpush.msrb.mxu0 %v3629_v57  ;;  %v2662_v55 = vadd.f32 %v2661_v21, %v2641_v10 }
 0x3dc   :  { %v2518_v31 = vpop.f32.mrf.mxu2 }
 0x3dd   :  { %3681 = vmatpush.msrb.mxu0 %v3627_v30  ;;  %v2704_v34 = vadd.f32 %v2662_v55, %v2521_v33 }
 0x3de   :  { %v2681_v0 = vpop.f32.mrf.mxu1 }
 0x3df   :  { %3682 = vmatpush.msrb.mxu0 %v3625_v2 }
 0x3e1   :  { %3683 = vmatpush.msrb.mxu0 %v3623_v5  ;;  %v1789_v5 = vadd.f32 %v1788_v8, %v1768_v7 }
 0x3e2   :  { %4335 = vmatmul.msk.f32.vlgmr.msrb.gmra.mxu0 %vm3644_vm12, %v3621_v60  ;;  %v2824_v22 = vpop.f32.mrf.mxu3  ;;  %v2844_v29 = vpop.f32.mrf.mxu0 }
 0x3e3   :  { %v2845_v54 = vadd.f32 %v2844_v29, %v2824_v22  ;;  %v1792_v62 = vadd.f32 %v1789_v5, %v6116_v51  ;;  %v2519_v22 = vadd.f32 %v2518_v31, %v2498_v49 }
 0x3e4   :  { %v2701_v53 = vpop.f32.mrf.mxu2 }
 0x3e5   :  { %v2887_v1 = vadd.f32 %v2845_v54, %v2704_v34  ;;  %v1975_v39 = vadd.f32 %v1972_v59, %v1792_v62  ;;  %v3760_v59 = vld [vmem:[%s6896_s14 + $0x8] sm:$0xff]  ;;  %v3732_v62 = vld [vmem:[%s6895_s13] sm:$0x1]  ;;  %s4586_s13 = smov [#allocation4]  }
 0x3e6   :  { %v2864_v60 = vpop.f32.mrf.mxu1 }
 0x3e7   :  { %v2158_v21 = vadd.f32 %v2155_v23, %v1975_v39  ;;  %v3763_v39 = vld [vmem:[%s6897_s15] sm:$0x1]  ;;  %s4587_s15 = smov [#allocation2]  }
 0x3e8   :  { %s3811_s18 = sshll.u32 %s4587_s15, 4  ;;  %s3812_s18 = int_to_ptr.vmem [resolvable:$true] %s3811_s18 }
 0x3e9   :  { %v2337_v29 = vadd.f32 %v2334_v47, %v2158_v21 }
 0x3ea   :  { %v3007_v43 = vpop.f32.mrf.mxu3 }
 0x3eb   :  { %v3027_v19 = vpop.f32.mrf.mxu0 }
 0x3ec   :  { %v3028_v52 = vadd.f32 %v3027_v19, %v3007_v43  ;;  %v2884_v50 = vpop.f32.mrf.mxu2  ;;  %v2702_v43 = vadd.f32 %v2701_v53, %v2681_v0 }
 0x3ed   :  { %v2885_v41 = vadd.f32 %v2884_v50, %v2864_v60  ;;  %v3728_v50 = vld [vmem:[%s6894_s12 + $0x20] sm:$0xff]  ;;  %v3725_v60 = vld [vmem:[%s6894_s12 + $0x8] sm:$0xff] }
 0x3ee   :  { %v3070_v35 = vadd.f32 %v3028_v52, %v2887_v1  ;;  %v3047_v30 = vpop.f32.mrf.mxu1 }
 0x3f4   :  { %v3067_v57 = vpop.f32.mrf.mxu2 }
 0x3f5   :  { %v3068_v32 = vadd.f32 %v3067_v57, %v3047_v30  ;;  %v3761_v30 = vld [vmem:[%s6896_s14 + $0x10] sm:$0xff] }
 0x3f9   :  { %v3230_v28 = vpop.f32.mrf.mxu1 }
 0x3fe   :  { %v3190_v42 = vpop.f32.mrf.mxu3 }
 0x40d   :  { %v3210_v40 = vpop.f32.mrf.mxu0 }
 0x40e   :  { %v3211_v56 = vadd.f32 %v3210_v40, %v3190_v42  ;;  %v2522_v42 = vadd.f32 %v2519_v22, %v2337_v29 }
 0x410   :  { %v3253_v58 = vadd.f32 %v3211_v56, %v3070_v35  ;;  %v2705_v7 = vadd.f32 %v2702_v43, %v2522_v42  ;;  %v3730_v35 = vld [vmem:[%s6894_s12 + $0x30] sm:$0xff] }
 0x412   :  { %v2888_v51 = vadd.f32 %v2885_v41, %v2705_v7 }
 0x413   :  { %v3250_v3 = vpop.f32.mrf.mxu2 }
 0x414   :  { %v3251_v24 = vadd.f32 %v3250_v3, %v3230_v28  ;;  %v3071_v48 = vadd.f32 %v3068_v32, %v2888_v51  ;;  %v3759_v3 = vld [vmem:[%s6896_s14] sm:$0xff] }
 0x416   :  { %v3254_v4 = vadd.f32 %v3251_v24, %v3071_v48 }
 0x41b   :  { %v3413_v26 = vpop.f32.mrf.mxu1 }
 0x420   :  { %v3373_v46 = vpop.f32.mrf.mxu3 }
 0x42f   :  { %v3393_v14 = vpop.f32.mrf.mxu0 }
 0x430   :  { %v3394_v16 = vadd.f32 %v3393_v14, %v3373_v46 }
 0x432   :  { %v3436_v44 = vadd.f32 %v3394_v16, %v3253_v58  ;;  %v3729_v16 = vld [vmem:[%s6894_s12 + $0x28] sm:$0xff]  ;;  %v3726_v58 = vld [vmem:[%s6894_s12 + $0x10] sm:$0xff] }
 0x435   :  { %v3433_v19 = vpop.f32.mrf.mxu2 }
 0x436   :  { %v3434_v31 = vadd.f32 %v3433_v19, %v3413_v26 }
 0x438   :  { %v3437_v54 = vadd.f32 %v3434_v31, %v3254_v4 }
 0x43d   :  { %v3596_v46 = vpop.f32.mrf.mxu1 }
 0x442   :  { %v3556_v18 = vpop.f32.mrf.mxu3 }
 0x44f   :  { %v3576_v61 = vpop.f32.mrf.mxu0 }
 0x450   :  { %v3577_v13 = vadd.f32 %v3576_v61, %v3556_v18  ;;  %v3731_v18 = vld [vmem:[%s6894_s12 + $0x38] sm:$0xff]  ;;  %v3724_v61 = vld [vmem:[%s6894_s12] sm:$0xff] }
 0x451   :  { %3746 = vmatpush.msrb.mxu1 %v3731_v18 }
 0x452   :  { %v3619_v37 = vadd.f32 %v3577_v13, %v3436_v44  ;;  %v3719_v44 = vpop.permute.xlu0 %3718 }
 0x453   :  { %v3665_v45 = vpop.f32.mrf.mxu3  ;;  %3747 = vmatpush.msrb.mxu1 %v3730_v35 }
 0x454   :  { %v3666_v6 = vadd.f32 %v3665_v45, %v3640_v20 }
 0x455   :  { %3748 = vmatpush.msrb.mxu1 %v3729_v16 }
 0x456   :  { %v3688_v38 = vadd.f32 %v3666_v6, %v3619_v37  ;;  %v3616_v27 = vpop.f32.mrf.mxu2 }
 0x457   :  { %v3617_v11 = vadd.f32 %v3616_v27, %v3596_v46  ;;  %3749 = vmatpush.msrb.mxu1 %v3728_v50 }
 0x458   :  { %v4336_v2 = vmul.f32 -1.442695, %v3688_v38  ;;  %v3762_v38 = vld [vmem:[%s6896_s14 + $0x18] sm:$0xff]  ;;  %s3822_s14 = sshll.u32 %s4586_s13, 4  ;;  %s3823_s14 = int_to_ptr.vmem [resolvable:$true] %s3822_s14 }
 0x459   :  { %v3620_v34 = vadd.f32 %v3617_v11, %v3437_v54  ;;  %3750 = vmatpush.msrb.mxu1 %v3727_v9  ;;  %3779 = vmatpush.msra.mxu2 %v3762_v38 }
 0x45a   :  { %4514 = vpow2.f32 %v4336_v2 }
 0x45b   :  { %3751 = vmatpush.msrb.mxu1 %v3726_v58  ;;  %3780 = vmatpush.msra.mxu2 %v3761_v30 }
 0x45d   :  { %3752 = vmatpush.msrb.mxu1 %v3725_v60  ;;  %3781 = vmatpush.msra.mxu2 %v3760_v59 }
 0x45f   :  { %v3685_v17 = vpop.f32.mrf.mxu0  ;;  %3753 = vmatpush.msrb.mxu1 %v3724_v61  ;;  %3782 = vmatpush.msra.mxu2 %v3759_v3 }
 0x460   :  { %v4515_v15 = vpop.eup %4514  ;;  %v3686_v55 = vadd.f32 %v3685_v17, %v3641_v25 }
 0x461   :  { %v3692_v10 = vadd.f32 1.0, %v4515_v15 }
 0x463   :  { %4516 = vrcp.f32 %v3692_v10  ;;  %v3704_v63 = vand.u32 2147483648, %v3692_v10  ;;  %v3702_v36 = vand.u32 2147483647, %v3692_v10  ;;  %vm3698_vm14 = vweird.f32 %v3692_v10 }
 0x465   :  { %v3705_v33 = vor.u32 1.1754944e-38, %v3704_v63  ;;  %vm3703_vm0 = vcmp.eq.f32.partialorder %v3702_v36, 8.507059e+37 }
 0x469   :  { %v4517_v8 = vpop.eup %4516 }
 0x46a   :  { %v3694_v12 = vmul.f32 %v4517_v8, %v3692_v10  ;;  %vm3699_vm13 = vweird.f32 %v4517_v8 }
 0x46b   :  { %vm3700_vm15 = vmor %vm3698_vm14, %vm3699_vm13 }
 0x46c   :  { %v3695_v40 = vsub.f32 1.0, %v3694_v12 }
 0x46e   :  { %v3696_v49 = vmul.f32 %v4517_v8, %v3695_v40 }
 0x470   :  { %v3697_v53 = vadd.f32 %v4517_v8, %v3696_v49 }
 0x472   :  { %v3701_v0 = vsel %vm3700_vm15, %v4517_v8, %v3697_v53 }
 0x473   :  { %v3706_v14 = vsel %vm3703_vm0, %v3705_v33, %v3701_v0 }
 0x474   :  { %v3708_v52 = vmul.f32 %v3706_v14, %v3686_v55  ;;  %v3711_v13 = vsub.f32 1.0, %v3706_v14  ;;  %v3721_v37 = vmul.f32 %v3719_v44, %v3706_v14 }
 0x476   :  { %v3709_v1 = vadd.f32 %v3708_v52, %v3620_v34 }
 0x478   :  { %4518 = vtanh.f32 %v3709_v1 }
 0x47e   :  { %v4519_v56 = vpop.eup %4518 }
 0x47f   :  { %3713 = vrot.lane.b32.xlu2 %v4519_v56, %s4585_s3 }
 0x4d9   :  { %v3714_v20 = vpop.permute.xlu2 %3713 }
 0x4da   :  { %v3716_v45 = vmul.f32 %v3714_v20, %v3711_v13 }
 0x4dc   :  { %v3722_v6 = vadd.f32 %v3721_v37, %v3716_v45 }
 0x4de   :  { %v3723_v57 = vmax.f32 %v3722_v6, 0.0 }
 0x4e0   :  { %3734 = vrot.lane.b32.xlu1 %v3723_v57, %s4585_s3 }
 0x4e8   :  { %3801 = vrot.lane.b32.xlu1 %v3722_v6, %s4585_s3 }
 0x552   :  { %v3735_v2 = vpop.permute.xlu1 %3734 }
 0x553   :  { %4337 = vmatmul.msk.f32.vlgmr.msrb.gmra.mxu1 %vm3644_vm12, %v3735_v2 }
 0x55a   :  { %v3802_v5 = vpop.permute.xlu1 %3801 }
 0x55b   :  { %3805 = vst.msk [vmem:[#allocation4] sm:$0x1] %vm3804_vm1, %v3802_v5 }
 0x55c   :  { %3827 = dma.vmem_to_hbm [thread:$0]  %s3823_s14, 16, %s3825_s7, [#allocation5]  }
 0x5d0   :  { %v3755_v23 = vpop.f32.mrf.mxu1 }
 0x5d1   :  { %v3756_v28 = vadd.f32 %v3755_v23, %v3732_v62 }
 0x5d3   :  { %v3758_v15 = vmax.f32 %v3756_v28, 0.0 }
 0x5d5   :  { %4338 = vmatmul.msk.f32.vlgmr.msra.gmra.mxu2 %vm496_vm10, %v3758_v15 }
 0x658   :  { %v3784_v47 = vpop.f32.mrf.mxu2 }
 0x659   :  { %v3785_v10 = vadd.f32 %v3784_v47, %v3763_v39 }
 0x65b   :  { %v3788_v21 = vsel %vm3787_vm2, %v3785_v10, -inf }
 0x65c   :  { %3789 = vmax.xlane.f32.xlu2 %v3788_v21 }
 0x6cf   :  { %v3790_v22 = vpop.xlane.xlu2 %3789 }
 0x6d0   :  { %v3791_v29 = vsub.f32 %v3785_v10, %v3790_v22 }
 0x6d2   :  { %v3792_v43 = vmul.f32 1.442695, %v3791_v29 }
 0x6d4   :  { %4520 = vpow2.f32 %v3792_v43 }
 0x6da   :  { %v4521_v19 = vpop.eup %4520 }
 0x6db   :  { %v3794_v42 = vsel %vm3787_vm2, %v4521_v19, 0.0 }
 0x6dc   :  { %3795 = vadd.xlane.f32.xlu0 %v3794_v42 }
 0x74f   :  { %v3796_v41 = vpop.xlane.xlu0 %3795 }
 0x750   :  { %4522 = vrcp.f32 %v3796_v41 }
 0x756   :  { %v4523_v26 = vpop.eup %4522 }
 0x757   :  { %v3798_v8 = vmul.f32 %v4523_v26, %v4521_v19 }
 0x759   :  { %3799 = vst.msk [vmem:[#allocation2] sm:$0x1] %vm3787_vm2, %v3798_v8 }
 0x75a   :  { %3816 = dma.vmem_to_hbm [thread:$0]  %s3812_s18, 16, %s3814_s20, [#allocation3]  }
 0x75b   :  { %4572 = dma.done.wait [#allocation3], 16  }
 0x75c   :  { %4573 = vsyncadd [#allocation3], 4294967280 }
 0x75d   :  { %4574 = dma.done.wait [#allocation5], 16  }
 0x75e   :  { %4575 = vsyncadd [#allocation5], 4294967280 }
 0x75f   :  { %3836 = vsyncpa [#allocation3], 1 }
 0x760   :  { %3837 = vsyncpa [#allocation5], 1 }

</bundles_post_ra>
